<compile_context>
chip_gen: v7x
topology: tpu7x:2x2x1
jax: 0.10.0
libtpu: 0.0.40
codegen_flags: <defaults>
</compile_context>

<pallas_src>
import jax
import jax.numpy as jnp
from jax import lax
from jax.experimental import pallas as pl
from jax.experimental.pallas import tpu as pltpu

EPS = 1e-5
LANE = 128                        # pad the channel axis to the TPU lane width
_VMEM_LIMIT = 32 * 1024 * 1024    # safe on v5e/v6e/v7x
_ROW_TILE_CAP = 512               # max rows per tile in the BN-apply pass


def _make_conv_stats_kernel(Ho, Wo, kh, kw, Cpad):
    """Pass 1: conv (shifted-slice MXU matmuls) + per-channel sum / sum-of-squares."""

    def kernel(x_ref, w_ref, y_ref, sum_ref, sumsq_ref):
        # x_ref:   (H, W, Cin)          bf16  -- one whole image (block over batch)
        # w_ref:   (kh, Cin, kw*Cpad)   bf16  -- per-kernel-row combined weights
        # y_ref:   (Ho, Wo, Cpad)       f32   -- un-normalized conv output
        # sum_ref / sumsq_ref: (1, Cpad) f32  -- resident accumulators across the grid

        @pl.when(pl.program_id(0) == 0)
        def _init():
            sum_ref[...] = jnp.zeros_like(sum_ref)
            sumsq_ref[...] = jnp.zeros_like(sumsq_ref)

        ones_row = jnp.ones((1, Wo), jnp.float32)    # hoisted, reused by stat matmuls
        s_img = jnp.zeros((1, Cpad), jnp.float32)    # per-image partial sums
        ss_img = jnp.zeros((1, Cpad), jnp.float32)

        for h in range(Ho):                          # one output row per iteration
            acc = jnp.zeros((Wo, Cpad), jnp.float32)
            for i in range(kh):
                # One MXU matmul covers all kw taps of kernel row i at once.
                prod = jnp.dot(x_ref[h + i], w_ref[i],
                               preferred_element_type=jnp.float32)  # (W, kw*Cpad)
                for j in range(kw):
                    # Sublane shift by j; lane slice is 128-aligned (free).
                    acc = acc + prod[j:j + Wo, j * Cpad:(j + 1) * Cpad]
            y_ref[h] = acc
            # BN statistics via tiny MXU matmuls (keeps XLU reductions off the path).
            s_img = s_img + jnp.dot(ones_row, acc,
                                    preferred_element_type=jnp.float32)
            ss_img = ss_img + jnp.dot(ones_row, acc * acc,
                                      preferred_element_type=jnp.float32)

        sum_ref[...] += s_img
        sumsq_ref[...] += ss_img

    return kernel


def _bn_apply_kernel(y_ref, scale_ref, shift_ref, o_ref):
    """Pass 2: out = y * scale + shift (mean/var/gamma/beta folded into scale/shift)."""
    o_ref[...] = y_ref[...] * scale_ref[...] + shift_ref[...]


def _pick_row_tile(m, cap=_ROW_TILE_CAP):
    """Largest row tile that divides m, is a multiple of 8, and fits the cap."""
    if m <= cap:
        return m
    t = cap - cap % 8
    while t >= 8:
        if m % t == 0:
            return t
        t -= 8
    return m  # fallback: single whole block


@jax.jit
def def_conv_net_block(x, conv_w, conv_b, bn_gamma, bn_beta):
    """Forward pass of DefConvNetBlock (defconv=False).

    x:       [N, Cin, H, W]  (NCHW, PyTorch layout)
    conv_w:  [Cout, Cin, kh, kw]
    conv_b:  [Cout]  (accepted but unused: cancelled exactly by BN mean subtraction)
    returns: [N, Cout, Ho, Wo]
    """
    del conv_b
    N, Cin, H, W = x.shape
    Cout, _, kh, kw = conv_w.shape
    Ho, Wo = H - kh + 1, W - kw + 1
    Cpad = ((Cout + LANE - 1) // LANE) * LANE

    # --- host-side relayout only (no im2col blow-up; x traffic stays 1x) ---
    x_nhwc = x.transpose(0, 2, 3, 1).astype(jnp.bfloat16)            # [N, H, W, Cin]
    # Combined per-kernel-row weights: w_comb[i, c, j*Cpad + o] = conv_w[o, c, i, j]
    w_t = conv_w.transpose(2, 3, 1, 0)                               # [kh, kw, Cin, Cout]
    w_t = jnp.pad(w_t, ((0, 0), (0, 0), (0, 0), (0, Cpad - Cout)))   # [kh, kw, Cin, Cpad]
    w_comb = w_t.transpose(0, 2, 1, 3).reshape(kh, Cin, kw * Cpad)   # [kh, Cin, kw*Cpad]
    w_comb = w_comb.astype(jnp.bfloat16)
    gamma_row = jnp.pad(bn_gamma.astype(jnp.float32).reshape(1, Cout),
                        ((0, 0), (0, Cpad - Cout)))
    beta_row = jnp.pad(bn_beta.astype(jnp.float32).reshape(1, Cout),
                       ((0, 0), (0, Cpad - Cout)))

    # --- pass 1: conv + per-channel sum / sum-of-squares, grid over the batch ---
    kernel1 = _make_conv_stats_kernel(Ho, Wo, kh, kw, Cpad)
    y, ysum, ysumsq = pl.pallas_call(
        kernel1,
        out_shape=(
            jax.ShapeDtypeStruct((N, Ho, Wo, Cpad), jnp.float32),
            jax.ShapeDtypeStruct((1, Cpad), jnp.float32),
            jax.ShapeDtypeStruct((1, Cpad), jnp.float32),
        ),
        grid_spec=pltpu.PrefetchScalarGridSpec(
            num_scalar_prefetch=0,
            grid=(N,),
            in_specs=[
                pl.BlockSpec((None, H, W, Cin), lambda n: (n, 0, 0, 0)),
                pl.BlockSpec((kh, Cin, kw * Cpad), lambda n: (0, 0, 0)),
            ],
            out_specs=(
                pl.BlockSpec((None, Ho, Wo, Cpad), lambda n: (n, 0, 0, 0)),
                pl.BlockSpec((1, Cpad), lambda n: (0, 0)),
                pl.BlockSpec((1, Cpad), lambda n: (0, 0)),
            ),
        ),
        compiler_params=pltpu.CompilerParams(
            dimension_semantics=("arbitrary",),   # stats accumulated across the grid
            vmem_limit_bytes=_VMEM_LIMIT,
        ),
    )(x_nhwc, w_comb)

    # --- tiny per-channel math: fold mean/var/gamma/beta into scale & shift ---
    count = jnp.float32(N * Ho * Wo)
    mean = ysum / count                                     # [1, Cpad]
    var = jnp.maximum(ysumsq / count - mean * mean, 0.0)    # biased (training-mode) var
    scale = gamma_row * lax.rsqrt(var + EPS)                # [1, Cpad]
    shift = beta_row - mean * scale                         # [1, Cpad]

    # --- pass 2: apply BN over M = N*Ho*Wo rows, tiled & pipelined ---
    M = N * Ho * Wo
    TM = _pick_row_tile(M)
    y2d = y.reshape(M, Cpad)
    out2d = pl.pallas_call(
        _bn_apply_kernel,
        out_shape=jax.ShapeDtypeStruct((M, Cpad), jnp.float32),
        grid_spec=pltpu.PrefetchScalarGridSpec(
            num_scalar_prefetch=0,
            grid=(M // TM,),
            in_specs=[
                pl.BlockSpec((TM, Cpad), lambda m: (m, 0)),
                pl.BlockSpec((1, Cpad), lambda m: (0, 0)),
                pl.BlockSpec((1, Cpad), lambda m: (0, 0)),
            ],
            out_specs=pl.BlockSpec((TM, Cpad), lambda m: (m, 0)),
        ),
        compiler_params=pltpu.CompilerParams(
            dimension_semantics=("parallel",),
            vmem_limit_bytes=_VMEM_LIMIT,
        ),
    )(y2d, scale, shift)

    # [M, Cpad] -> [N, Ho, Wo, Cout] -> NCHW
    out = out2d.reshape(N, Ho, Wo, Cpad)[..., :Cout]
    return out.transpose(0, 3, 1, 2)


def _reference(x, conv_w, conv_b, bn_gamma, bn_beta):
    # Pure-JAX reference mirroring nn.Conv2d + nn.BatchNorm2d (training mode).
    y = lax.conv_general_dilated(
        x.astype(jnp.float32), conv_w.astype(jnp.float32),
        window_strides=(1, 1), padding="VALID",
        dimension_numbers=("NCHW", "OIHW", "NCHW"))
    y = y + conv_b.reshape(1, -1, 1, 1)
    mean = jnp.mean(y, axis=(0, 2, 3), keepdims=True)
    var = jnp.mean((y - mean) ** 2, axis=(0, 2, 3), keepdims=True)
    y = (y - mean) / jnp.sqrt(var + EPS)
    return y * bn_gamma.reshape(1, -1, 1, 1) + bn_beta.reshape(1, -1, 1, 1)


if __name__ == "__main__":
    # Small shapes: batch=2, in_channels=4, out_channels=8, kernel=3, spatial=16.
    N, Cin, H, W = 2, 4, 16, 16
    Cout, ksize = 8, 3

    key = jax.random.PRNGKey(0)
    kx, kwt, kb = jax.random.split(key, 3)

    x = jax.random.normal(kx, (N, Cin, H, W), dtype=jnp.float32)

    # Deterministic parameter init (shapes per nn.Conv2d / nn.BatchNorm2d defaults).
    fan_in = Cin * ksize * ksize
    bound = 1.0 / (fan_in ** 0.5)
    conv_w = jax.random.uniform(kwt, (Cout, Cin, ksize, ksize),
                                minval=-bound, maxval=bound, dtype=jnp.float32)
    conv_b = jax.random.uniform(kb, (Cout,), minval=-bound, maxval=bound,
                                dtype=jnp.float32)
    bn_gamma = jnp.ones((Cout,), dtype=jnp.float32)
    bn_beta = jnp.zeros((Cout,), dtype=jnp.float32)

    out = def_conv_net_block(x, conv_w, conv_b, bn_gamma, bn_beta)
    out = jax.block_until_ready(out)

    Ho, Wo = H - ksize + 1, W - ksize + 1
    assert out.shape == (N, Cout, Ho, Wo)

    # Tight check against a reference fed the same bf16-rounded conv operands
    # (isolates accumulation-order differences only).
    x_b = x.astype(jnp.bfloat16).astype(jnp.float32)
    w_b = conv_w.astype(jnp.bfloat16).astype(jnp.float32)
    ref_b16 = _reference(x_b, w_b, conv_b, bn_gamma, bn_beta)
    assert jnp.allclose(out, ref_b16, atol=2e-3, rtol=2e-3), \
        float(jnp.max(jnp.abs(out - ref_b16)))

    # Loose check against exact f32 module semantics (kernel uses bf16 MXU operands).
    ref_f32 = _reference(x, conv_w, conv_b, bn_gamma, bn_beta)
    assert jnp.allclose(out, ref_f32, atol=5e-2, rtol=5e-2), \
        float(jnp.max(jnp.abs(out - ref_f32)))

    print("KERNEL_OK")
</pallas_src>

<mosaic_0001>
module attributes {stable_mosaic.version = 11 : i64} {
  func.func @_bn_apply_kernel(%arg0: i32, %arg1: memref<392x128xf32, #tpu.memory_space<vmem>>, %arg2: memref<1x128xf32, #tpu.memory_space<vmem>>, %arg3: memref<1x128xf32, #tpu.memory_space<vmem>>, %arg4: memref<392x128xf32, #tpu.memory_space<vmem>>) attributes {dimension_semantics = [#tpu.dimension_semantics<parallel>], iteration_bounds = array<i64: 1>, scalar_prefetch = 0 : i64, scratch_operands = 0 : i64, tpu.core_type = #tpu.core_type<tc>, window_params = [{transform_indices = @transform_0, window_bounds = array<i64: 392, 128>}, {pipeline_mode = #tpu.pipeline_mode<synchronous>, transform_indices = @transform_1, window_bounds = array<i64: 1, 128>}, {pipeline_mode = #tpu.pipeline_mode<synchronous>, transform_indices = @transform_2, window_bounds = array<i64: 1, 128>}, {transform_indices = @transform_3, window_bounds = array<i64: 392, 128>}]} {
    %c0 = arith.constant 0 : index
    %c0_0 = arith.constant 0 : index
    %0 = vector.load %arg1[%c0, %c0_0] : memref<392x128xf32, #tpu.memory_space<vmem>>, vector<392x128xf32>
    %c0_1 = arith.constant 0 : index
    %c0_2 = arith.constant 0 : index
    %1 = vector.load %arg2[%c0_1, %c0_2] : memref<1x128xf32, #tpu.memory_space<vmem>>, vector<1x128xf32>
    %2 = vector.broadcast %1 : vector<1x128xf32> to vector<392x128xf32>
    %3 = arith.mulf %0, %2 : vector<392x128xf32>
    %c0_3 = arith.constant 0 : index
    %c0_4 = arith.constant 0 : index
    %4 = vector.load %arg3[%c0_3, %c0_4] : memref<1x128xf32, #tpu.memory_space<vmem>>, vector<1x128xf32>
    %5 = vector.broadcast %4 : vector<1x128xf32> to vector<392x128xf32>
    %6 = arith.addf %3, %5 : vector<392x128xf32>
    %c0_5 = arith.constant 0 : index
    %c0_6 = arith.constant 0 : index
    %7 = vector.load %arg4[%c0_5, %c0_6] : memref<392x128xf32, #tpu.memory_space<vmem>>, vector<392x128xf32>
    tpu.vector_store %arg4[%c0_5, %c0_6], %6 {strides = array<i32>} : memref<392x128xf32, #tpu.memory_space<vmem>>, vector<392x128xf32>,
    return
  }
  func.func @transform_0(%arg0: i32) -> (i32, i32) {
    %c0_i32 = arith.constant 0 : i32
    %c0_i32_0 = arith.constant 0 : i32
    return %arg0, %c0_i32 : i32, i32
  }
  func.func @transform_1(%arg0: i32) -> (i32, i32) {
    %c0_i32 = arith.constant 0 : i32
    %c0_i32_0 = arith.constant 0 : i32
    %c0_i32_1 = arith.constant 0 : i32
    return %c0_i32, %c0_i32_0 : i32, i32
  }
  func.func @transform_2(%arg0: i32) -> (i32, i32) {
    %c0_i32 = arith.constant 0 : i32
    %c0_i32_0 = arith.constant 0 : i32
    %c0_i32_1 = arith.constant 0 : i32
    return %c0_i32, %c0_i32_0 : i32, i32
  }
  func.func @transform_3(%arg0: i32) -> (i32, i32) {
    %c0_i32 = arith.constant 0 : i32
    %c0_i32_0 = arith.constant 0 : i32
    return %arg0, %c0_i32 : i32, i32
  }
}

module attributes {stable_mosaic.version = 11 : i64} {
  func.func @kernel(%arg0: i32, %arg1: memref<1x16x16x4xbf16, #tpu.memory_space<vmem>>, %arg2: memref<3x4x384xbf16, #tpu.memory_space<vmem>>, %arg3: memref<1x14x14x128xf32, #tpu.memory_space<vmem>>, %arg4: memref<1x128xf32, #tpu.memory_space<vmem>>, %arg5: memref<1x128xf32, #tpu.memory_space<vmem>>) attributes {dimension_semantics = [#tpu.dimension_semantics<arbitrary>], iteration_bounds = array<i64: 2>, scalar_prefetch = 0 : i64, scratch_operands = 0 : i64, tpu.core_type = #tpu.core_type<tc>, window_params = [{transform_indices = @transform_0, window_bounds = array<i64: 1, 16, 16, 4>}, {pipeline_mode = #tpu.pipeline_mode<synchronous>, transform_indices = @transform_1, window_bounds = array<i64: 3, 4, 384>}, {transform_indices = @transform_2, window_bounds = array<i64: 1, 14, 14, 128>}, {pipeline_mode = #tpu.pipeline_mode<synchronous>, transform_indices = @transform_3, window_bounds = array<i64: 1, 128>}, {pipeline_mode = #tpu.pipeline_mode<synchronous>, transform_indices = @transform_4, window_bounds = array<i64: 1, 128>}]} {
    %c0_i32 = arith.constant 0 : i32
    %0 = arith.cmpi eq, %arg0, %c0_i32 : i32
    %1 = arith.extui %0 : i1 to i32
    %c0_i32_0 = arith.constant 0 : i32
    %2 = arith.cmpi ne, %1, %c0_i32_0 : i32
    scf.if %2 {
      %cst_429 = arith.constant 0.000000e+00 : f32
      %600 = vector.broadcast %cst_429 : f32 to vector<1x128xf32>
      %c0_430 = arith.constant 0 : index
      %c0_431 = arith.constant 0 : index
      %601 = vector.load %arg4[%c0_430, %c0_431] : memref<1x128xf32, #tpu.memory_space<vmem>>, vector<1x128xf32>
      tpu.vector_store %arg4[%c0_430, %c0_431], %600 {strides = array<i32>} : memref<1x128xf32, #tpu.memory_space<vmem>>, vector<1x128xf32>,
      %cst_432 = arith.constant 0.000000e+00 : f32
      %602 = vector.broadcast %cst_432 : f32 to vector<1x128xf32>
      %c0_433 = arith.constant 0 : index
      %c0_434 = arith.constant 0 : index
      %603 = vector.load %arg5[%c0_433, %c0_434] : memref<1x128xf32, #tpu.memory_space<vmem>>, vector<1x128xf32>
      tpu.vector_store %arg5[%c0_433, %c0_434], %602 {strides = array<i32>} : memref<1x128xf32, #tpu.memory_space<vmem>>, vector<1x128xf32>,
    } else {
    }
    %cst = arith.constant 1.000000e+00 : f32
    %3 = vector.broadcast %cst : f32 to vector<1x14xf32>
    %cst_1 = arith.constant 0.000000e+00 : f32
    %4 = vector.broadcast %cst_1 : f32 to vector<1x128xf32>
    %cst_2 = arith.constant 0.000000e+00 : f32
    %5 = vector.broadcast %cst_2 : f32 to vector<1x128xf32>
    %cst_3 = arith.constant 0.000000e+00 : f32
    %6 = vector.broadcast %cst_3 : f32 to vector<14x128xf32>
    %c0 = arith.constant 0 : index
    %c0_4 = arith.constant 0 : index
    %c0_5 = arith.constant 0 : index
    %c0_6 = arith.constant 0 : index
    %7 = vector.load %arg1[%c0, %c0_4, %c0_5, %c0_6] : memref<1x16x16x4xbf16, #tpu.memory_space<vmem>>, vector<1x1x16x4xbf16>
    %8 = vector.shape_cast %7 : vector<1x1x16x4xbf16> to vector<16x4xbf16>
    %c0_7 = arith.constant 0 : index
    %c0_8 = arith.constant 0 : index
    %c0_9 = arith.constant 0 : index
    %9 = vector.load %arg2[%c0_7, %c0_8, %c0_9] : memref<3x4x384xbf16, #tpu.memory_space<vmem>>, vector<1x4x384xbf16>
    %10 = vector.shape_cast %9 : vector<1x4x384xbf16> to vector<4x384xbf16>
    %cst_10 = arith.constant dense<0.000000e+00> : vector<16x384xf32>
    %11 = tpu.matmul %8, %10, %cst_10 {dimension_numbers = #tpu.dot_dimension_numbers<[1], [0], [0], [1], [0, 0, 1, 1], [], []>} : vector<16x4xbf16>, vector<4x384xbf16>, vector<16x384xf32> -> vector<16x384xf32>
    %12 = vector.extract_strided_slice %11 {offsets = [0, 0], sizes = [14, 128], strides = [1, 1]} : vector<16x384xf32> to vector<14x128xf32>
    %13 = arith.addf %6, %12 : vector<14x128xf32>
    %14 = vector.extract_strided_slice %11 {offsets = [1, 128], sizes = [14, 128], strides = [1, 1]} : vector<16x384xf32> to vector<14x128xf32>
    %15 = arith.addf %13, %14 : vector<14x128xf32>
    %16 = vector.extract_strided_slice %11 {offsets = [2, 256], sizes = [14, 128], strides = [1, 1]} : vector<16x384xf32> to vector<14x128xf32>
    %17 = arith.addf %15, %16 : vector<14x128xf32>
    %c0_11 = arith.constant 0 : index
    %c1 = arith.constant 1 : index
    %c0_12 = arith.constant 0 : index
    %c0_13 = arith.constant 0 : index
    %18 = vector.load %arg1[%c0_11, %c1, %c0_12, %c0_13] : memref<1x16x16x4xbf16, #tpu.memory_space<vmem>>, vector<1x1x16x4xbf16>
    %19 = vector.shape_cast %18 : vector<1x1x16x4xbf16> to vector<16x4xbf16>
    %c1_14 = arith.constant 1 : index
    %c0_15 = arith.constant 0 : index
    %c0_16 = arith.constant 0 : index
    %20 = vector.load %arg2[%c1_14, %c0_15, %c0_16] : memref<3x4x384xbf16, #tpu.memory_space<vmem>>, vector<1x4x384xbf16>
    %21 = vector.shape_cast %20 : vector<1x4x384xbf16> to vector<4x384xbf16>
    %cst_17 = arith.constant dense<0.000000e+00> : vector<16x384xf32>
    %22 = tpu.matmul %19, %21, %cst_17 {dimension_numbers = #tpu.dot_dimension_numbers<[1], [0], [0], [1], [0, 0, 1, 1], [], []>} : vector<16x4xbf16>, vector<4x384xbf16>, vector<16x384xf32> -> vector<16x384xf32>
    %23 = vector.extract_strided_slice %22 {offsets = [0, 0], sizes = [14, 128], strides = [1, 1]} : vector<16x384xf32> to vector<14x128xf32>
    %24 = arith.addf %17, %23 : vector<14x128xf32>
    %25 = vector.extract_strided_slice %22 {offsets = [1, 128], sizes = [14, 128], strides = [1, 1]} : vector<16x384xf32> to vector<14x128xf32>
    %26 = arith.addf %24, %25 : vector<14x128xf32>
    %27 = vector.extract_strided_slice %22 {offsets = [2, 256], sizes = [14, 128], strides = [1, 1]} : vector<16x384xf32> to vector<14x128xf32>
    %28 = arith.addf %26, %27 : vector<14x128xf32>
    %c0_18 = arith.constant 0 : index
    %c2 = arith.constant 2 : index
    %c0_19 = arith.constant 0 : index
    %c0_20 = arith.constant 0 : index
    %29 = vector.load %arg1[%c0_18, %c2, %c0_19, %c0_20] : memref<1x16x16x4xbf16, #tpu.memory_space<vmem>>, vector<1x1x16x4xbf16>
    %30 = vector.shape_cast %29 : vector<1x1x16x4xbf16> to vector<16x4xbf16>
    %c2_21 = arith.constant 2 : index
    %c0_22 = arith.constant 0 : index
    %c0_23 = arith.constant 0 : index
    %31 = vector.load %arg2[%c2_21, %c0_22, %c0_23] : memref<3x4x384xbf16, #tpu.memory_space<vmem>>, vector<1x4x384xbf16>
    %32 = vector.shape_cast %31 : vector<1x4x384xbf16> to vector<4x384xbf16>
    %cst_24 = arith.constant dense<0.000000e+00> : vector<16x384xf32>
    %33 = tpu.matmul %30, %32, %cst_24 {dimension_numbers = #tpu.dot_dimension_numbers<[1], [0], [0], [1], [0, 0, 1, 1], [], []>} : vector<16x4xbf16>, vector<4x384xbf16>, vector<16x384xf32> -> vector<16x384xf32>
    %34 = vector.extract_strided_slice %33 {offsets = [0, 0], sizes = [14, 128], strides = [1, 1]} : vector<16x384xf32> to vector<14x128xf32>
    %35 = arith.addf %28, %34 : vector<14x128xf32>
    %36 = vector.extract_strided_slice %33 {offsets = [1, 128], sizes = [14, 128], strides = [1, 1]} : vector<16x384xf32> to vector<14x128xf32>
    %37 = arith.addf %35, %36 : vector<14x128xf32>
    %38 = vector.extract_strided_slice %33 {offsets = [2, 256], sizes = [14, 128], strides = [1, 1]} : vector<16x384xf32> to vector<14x128xf32>
    %39 = arith.addf %37, %38 : vector<14x128xf32>
    %c0_25 = arith.constant 0 : index
    %c0_26 = arith.constant 0 : index
    %c0_27 = arith.constant 0 : index
    %c0_28 = arith.constant 0 : index
    %40 = vector.load %arg3[%c0_25, %c0_26, %c0_27, %c0_28] : memref<1x14x14x128xf32, #tpu.memory_space<vmem>>, vector<1x1x14x128xf32>
    %41 = vector.shape_cast %40 : vector<1x1x14x128xf32> to vector<14x128xf32>
    %42 = vector.shape_cast %39 : vector<14x128xf32> to vector<1x1x14x128xf32>
    tpu.vector_store %arg3[%c0_25, %c0_26, %c0_27, %c0_28], %42 {strides = array<i32>} : memref<1x14x14x128xf32, #tpu.memory_space<vmem>>, vector<1x1x14x128xf32>,
    %cst_29 = arith.constant dense<0.000000e+00> : vector<1x128xf32>
    %43 = tpu.matmul %3, %39, %cst_29 {dimension_numbers = #tpu.dot_dimension_numbers<[1], [0], [0], [1], [0, 0, 1, 1], [], []>} : vector<1x14xf32>, vector<14x128xf32>, vector<1x128xf32> -> vector<1x128xf32>
    %44 = arith.addf %4, %43 : vector<1x128xf32>
    %45 = arith.mulf %39, %39 : vector<14x128xf32>
    %cst_30 = arith.constant dense<0.000000e+00> : vector<1x128xf32>
    %46 = tpu.matmul %3, %45, %cst_30 {dimension_numbers = #tpu.dot_dimension_numbers<[1], [0], [0], [1], [0, 0, 1, 1], [], []>} : vector<1x14xf32>, vector<14x128xf32>, vector<1x128xf32> -> vector<1x128xf32>
    %47 = arith.addf %5, %46 : vector<1x128xf32>
    %cst_31 = arith.constant 0.000000e+00 : f32
    %48 = vector.broadcast %cst_31 : f32 to vector<14x128xf32>
    %c0_32 = arith.constant 0 : index
    %c1_33 = arith.constant 1 : index
    %c0_34 = arith.constant 0 : index
    %c0_35 = arith.constant 0 : index
    %49 = vector.load %arg1[%c0_32, %c1_33, %c0_34, %c0_35] : memref<1x16x16x4xbf16, #tpu.memory_space<vmem>>, vector<1x1x16x4xbf16>
    %50 = vector.shape_cast %49 : vector<1x1x16x4xbf16> to vector<16x4xbf16>
    %c0_36 = arith.constant 0 : index
    %c0_37 = arith.constant 0 : index
    %c0_38 = arith.constant 0 : index
    %51 = vector.load %arg2[%c0_36, %c0_37, %c0_38] : memref<3x4x384xbf16, #tpu.memory_space<vmem>>, vector<1x4x384xbf16>
    %52 = vector.shape_cast %51 : vector<1x4x384xbf16> to vector<4x384xbf16>
    %cst_39 = arith.constant dense<0.000000e+00> : vector<16x384xf32>
    %53 = tpu.matmul %50, %52, %cst_39 {dimension_numbers = #tpu.dot_dimension_numbers<[1], [0], [0], [1], [0, 0, 1, 1], [], []>} : vector<16x4xbf16>, vector<4x384xbf16>, vector<16x384xf32> -> vector<16x384xf32>
    %54 = vector.extract_strided_slice %53 {offsets = [0, 0], sizes = [14, 128], strides = [1, 1]} : vector<16x384xf32> to vector<14x128xf32>
    %55 = arith.addf %48, %54 : vector<14x128xf32>
    %56 = vector.extract_strided_slice %53 {offsets = [1, 128], sizes = [14, 128], strides = [1, 1]} : vector<16x384xf32> to vector<14x128xf32>
    %57 = arith.addf %55, %56 : vector<14x128xf32>
    %58 = vector.extract_strided_slice %53 {offsets = [2, 256], sizes = [14, 128], strides = [1, 1]} : vector<16x384xf32> to vector<14x128xf32>
    %59 = arith.addf %57, %58 : vector<14x128xf32>
    %c0_40 = arith.constant 0 : index
    %c2_41 = arith.constant 2 : index
    %c0_42 = arith.constant 0 : index
    %c0_43 = arith.constant 0 : index
    %60 = vector.load %arg1[%c0_40, %c2_41, %c0_42, %c0_43] : memref<1x16x16x4xbf16, #tpu.memory_space<vmem>>, vector<1x1x16x4xbf16>
    %61 = vector.shape_cast %60 : vector<1x1x16x4xbf16> to vector<16x4xbf16>
    %c1_44 = arith.constant 1 : index
    %c0_45 = arith.constant 0 : index
    %c0_46 = arith.constant 0 : index
    %62 = vector.load %arg2[%c1_44, %c0_45, %c0_46] : memref<3x4x384xbf16, #tpu.memory_space<vmem>>, vector<1x4x384xbf16>
    %63 = vector.shape_cast %62 : vector<1x4x384xbf16> to vector<4x384xbf16>
    %cst_47 = arith.constant dense<0.000000e+00> : vector<16x384xf32>
    %64 = tpu.matmul %61, %63, %cst_47 {dimension_numbers = #tpu.dot_dimension_numbers<[1], [0], [0], [1], [0, 0, 1, 1], [], []>} : vector<16x4xbf16>, vector<4x384xbf16>, vector<16x384xf32> -> vector<16x384xf32>
    %65 = vector.extract_strided_slice %64 {offsets = [0, 0], sizes = [14, 128], strides = [1, 1]} : vector<16x384xf32> to vector<14x128xf32>
    %66 = arith.addf %59, %65 : vector<14x128xf32>
    %67 = vector.extract_strided_slice %64 {offsets = [1, 128], sizes = [14, 128], strides = [1, 1]} : vector<16x384xf32> to vector<14x128xf32>
    %68 = arith.addf %66, %67 : vector<14x128xf32>
    %69 = vector.extract_strided_slice %64 {offsets = [2, 256], sizes = [14, 128], strides = [1, 1]} : vector<16x384xf32> to vector<14x128xf32>
    %70 = arith.addf %68, %69 : vector<14x128xf32>
    %c0_48 = arith.constant 0 : index
    %c3 = arith.constant 3 : index
    %c0_49 = arith.constant 0 : index
    %c0_50 = arith.constant 0 : index
    %71 = vector.load %arg1[%c0_48, %c3, %c0_49, %c0_50] : memref<1x16x16x4xbf16, #tpu.memory_space<vmem>>, vector<1x1x16x4xbf16>
    %72 = vector.shape_cast %71 : vector<1x1x16x4xbf16> to vector<16x4xbf16>
    %c2_51 = arith.constant 2 : index
    %c0_52 = arith.constant 0 : index
    %c0_53 = arith.constant 0 : index
    %73 = vector.load %arg2[%c2_51, %c0_52, %c0_53] : memref<3x4x384xbf16, #tpu.memory_space<vmem>>, vector<1x4x384xbf16>
    %74 = vector.shape_cast %73 : vector<1x4x384xbf16> to vector<4x384xbf16>
    %cst_54 = arith.constant dense<0.000000e+00> : vector<16x384xf32>
    %75 = tpu.matmul %72, %74, %cst_54 {dimension_numbers = #tpu.dot_dimension_numbers<[1], [0], [0], [1], [0, 0, 1, 1], [], []>} : vector<16x4xbf16>, vector<4x384xbf16>, vector<16x384xf32> -> vector<16x384xf32>
    %76 = vector.extract_strided_slice %75 {offsets = [0, 0], sizes = [14, 128], strides = [1, 1]} : vector<16x384xf32> to vector<14x128xf32>
    %77 = arith.addf %70, %76 : vector<14x128xf32>
    %78 = vector.extract_strided_slice %75 {offsets = [1, 128], sizes = [14, 128], strides = [1, 1]} : vector<16x384xf32> to vector<14x128xf32>
    %79 = arith.addf %77, %78 : vector<14x128xf32>
    %80 = vector.extract_strided_slice %75 {offsets = [2, 256], sizes = [14, 128], strides = [1, 1]} : vector<16x384xf32> to vector<14x128xf32>
    %81 = arith.addf %79, %80 : vector<14x128xf32>
    %c0_55 = arith.constant 0 : index
    %c1_56 = arith.constant 1 : index
    %c0_57 = arith.constant 0 : index
    %c0_58 = arith.constant 0 : index
    %82 = vector.load %arg3[%c0_55, %c1_56, %c0_57, %c0_58] : memref<1x14x14x128xf32, #tpu.memory_space<vmem>>, vector<1x1x14x128xf32>
    %83 = vector.shape_cast %82 : vector<1x1x14x128xf32> to vector<14x128xf32>
    %84 = vector.shape_cast %81 : vector<14x128xf32> to vector<1x1x14x128xf32>
    tpu.vector_store %arg3[%c0_55, %c1_56, %c0_57, %c0_58], %84 {strides = array<i32>} : memref<1x14x14x128xf32, #tpu.memory_space<vmem>>, vector<1x1x14x128xf32>,
    %cst_59 = arith.constant dense<0.000000e+00> : vector<1x128xf32>
    %85 = tpu.matmul %3, %81, %cst_59 {dimension_numbers = #tpu.dot_dimension_numbers<[1], [0], [0], [1], [0, 0, 1, 1], [], []>} : vector<1x14xf32>, vector<14x128xf32>, vector<1x128xf32> -> vector<1x128xf32>
    %86 = arith.addf %44, %85 : vector<1x128xf32>
    %87 = arith.mulf %81, %81 : vector<14x128xf32>
    %cst_60 = arith.constant dense<0.000000e+00> : vector<1x128xf32>
    %88 = tpu.matmul %3, %87, %cst_60 {dimension_numbers = #tpu.dot_dimension_numbers<[1], [0], [0], [1], [0, 0, 1, 1], [], []>} : vector<1x14xf32>, vector<14x128xf32>, vector<1x128xf32> -> vector<1x128xf32>
    %89 = arith.addf %47, %88 : vector<1x128xf32>
    %cst_61 = arith.constant 0.000000e+00 : f32
    %90 = vector.broadcast %cst_61 : f32 to vector<14x128xf32>
    %c0_62 = arith.constant 0 : index
    %c2_63 = arith.constant 2 : index
    %c0_64 = arith.constant 0 : index
    %c0_65 = arith.constant 0 : index
    %91 = vector.load %arg1[%c0_62, %c2_63, %c0_64, %c0_65] : memref<1x16x16x4xbf16, #tpu.memory_space<vmem>>, vector<1x1x16x4xbf16>
    %92 = vector.shape_cast %91 : vector<1x1x16x4xbf16> to vector<16x4xbf16>
    %c0_66 = arith.constant 0 : index
    %c0_67 = arith.constant 0 : index
    %c0_68 = arith.constant 0 : index
    %93 = vector.load %arg2[%c0_66, %c0_67, %c0_68] : memref<3x4x384xbf16, #tpu.memory_space<vmem>>, vector<1x4x384xbf16>
    %94 = vector.shape_cast %93 : vector<1x4x384xbf16> to vector<4x384xbf16>
    %cst_69 = arith.constant dense<0.000000e+00> : vector<16x384xf32>
    %95 = tpu.matmul %92, %94, %cst_69 {dimension_numbers = #tpu.dot_dimension_numbers<[1], [0], [0], [1], [0, 0, 1, 1], [], []>} : vector<16x4xbf16>, vector<4x384xbf16>, vector<16x384xf32> -> vector<16x384xf32>
    %96 = vector.extract_strided_slice %95 {offsets = [0, 0], sizes = [14, 128], strides = [1, 1]} : vector<16x384xf32> to vector<14x128xf32>
    %97 = arith.addf %90, %96 : vector<14x128xf32>
    %98 = vector.extract_strided_slice %95 {offsets = [1, 128], sizes = [14, 128], strides = [1, 1]} : vector<16x384xf32> to vector<14x128xf32>
    %99 = arith.addf %97, %98 : vector<14x128xf32>
    %100 = vector.extract_strided_slice %95 {offsets = [2, 256], sizes = [14, 128], strides = [1, 1]} : vector<16x384xf32> to vector<14x128xf32>
    %101 = arith.addf %99, %100 : vector<14x128xf32>
    %c0_70 = arith.constant 0 : index
    %c3_71 = arith.constant 3 : index
    %c0_72 = arith.constant 0 : index
    %c0_73 = arith.constant 0 : index
    %102 = vector.load %arg1[%c0_70, %c3_71, %c0_72, %c0_73] : memref<1x16x16x4xbf16, #tpu.memory_space<vmem>>, vector<1x1x16x4xbf16>
    %103 = vector.shape_cast %102 : vector<1x1x16x4xbf16> to vector<16x4xbf16>
    %c1_74 = arith.constant 1 : index
    %c0_75 = arith.constant 0 : index
    %c0_76 = arith.constant 0 : index
    %104 = vector.load %arg2[%c1_74, %c0_75, %c0_76] : memref<3x4x384xbf16, #tpu.memory_space<vmem>>, vector<1x4x384xbf16>
    %105 = vector.shape_cast %104 : vector<1x4x384xbf16> to vector<4x384xbf16>
    %cst_77 = arith.constant dense<0.000000e+00> : vector<16x384xf32>
    %106 = tpu.matmul %103, %105, %cst_77 {dimension_numbers = #tpu.dot_dimension_numbers<[1], [0], [0], [1], [0, 0, 1, 1], [], []>} : vector<16x4xbf16>, vector<4x384xbf16>, vector<16x384xf32> -> vector<16x384xf32>
    %107 = vector.extract_strided_slice %106 {offsets = [0, 0], sizes = [14, 128], strides = [1, 1]} : vector<16x384xf32> to vector<14x128xf32>
    %108 = arith.addf %101, %107 : vector<14x128xf32>
    %109 = vector.extract_strided_slice %106 {offsets = [1, 128], sizes = [14, 128], strides = [1, 1]} : vector<16x384xf32> to vector<14x128xf32>
    %110 = arith.addf %108, %109 : vector<14x128xf32>
    %111 = vector.extract_strided_slice %106 {offsets = [2, 256], sizes = [14, 128], strides = [1, 1]} : vector<16x384xf32> to vector<14x128xf32>
    %112 = arith.addf %110, %111 : vector<14x128xf32>
    %c0_78 = arith.constant 0 : index
    %c4 = arith.constant 4 : index
    %c0_79 = arith.constant 0 : index
    %c0_80 = arith.constant 0 : index
    %113 = vector.load %arg1[%c0_78, %c4, %c0_79, %c0_80] : memref<1x16x16x4xbf16, #tpu.memory_space<vmem>>, vector<1x1x16x4xbf16>
    %114 = vector.shape_cast %113 : vector<1x1x16x4xbf16> to vector<16x4xbf16>
    %c2_81 = arith.constant 2 : index
    %c0_82 = arith.constant 0 : index
    %c0_83 = arith.constant 0 : index
    %115 = vector.load %arg2[%c2_81, %c0_82, %c0_83] : memref<3x4x384xbf16, #tpu.memory_space<vmem>>, vector<1x4x384xbf16>
    %116 = vector.shape_cast %115 : vector<1x4x384xbf16> to vector<4x384xbf16>
    %cst_84 = arith.constant dense<0.000000e+00> : vector<16x384xf32>
    %117 = tpu.matmul %114, %116, %cst_84 {dimension_numbers = #tpu.dot_dimension_numbers<[1], [0], [0], [1], [0, 0, 1, 1], [], []>} : vector<16x4xbf16>, vector<4x384xbf16>, vector<16x384xf32> -> vector<16x384xf32>
    %118 = vector.extract_strided_slice %117 {offsets = [0, 0], sizes = [14, 128], strides = [1, 1]} : vector<16x384xf32> to vector<14x128xf32>
    %119 = arith.addf %112, %118 : vector<14x128xf32>
    %120 = vector.extract_strided_slice %117 {offsets = [1, 128], sizes = [14, 128], strides = [1, 1]} : vector<16x384xf32> to vector<14x128xf32>
    %121 = arith.addf %119, %120 : vector<14x128xf32>
    %122 = vector.extract_strided_slice %117 {offsets = [2, 256], sizes = [14, 128], strides = [1, 1]} : vector<16x384xf32> to vector<14x128xf32>
    %123 = arith.addf %121, %122 : vector<14x128xf32>
    %c0_85 = arith.constant 0 : index
    %c2_86 = arith.constant 2 : index
    %c0_87 = arith.constant 0 : index
    %c0_88 = arith.constant 0 : index
    %124 = vector.load %arg3[%c0_85, %c2_86, %c0_87, %c0_88] : memref<1x14x14x128xf32, #tpu.memory_space<vmem>>, vector<1x1x14x128xf32>
    %125 = vector.shape_cast %124 : vector<1x1x14x128xf32> to vector<14x128xf32>
    %126 = vector.shape_cast %123 : vector<14x128xf32> to vector<1x1x14x128xf32>
    tpu.vector_store %arg3[%c0_85, %c2_86, %c0_87, %c0_88], %126 {strides = array<i32>} : memref<1x14x14x128xf32, #tpu.memory_space<vmem>>, vector<1x1x14x128xf32>,
    %cst_89 = arith.constant dense<0.000000e+00> : vector<1x128xf32>
    %127 = tpu.matmul %3, %123, %cst_89 {dimension_numbers = #tpu.dot_dimension_numbers<[1], [0], [0], [1], [0, 0, 1, 1], [], []>} : vector<1x14xf32>, vector<14x128xf32>, vector<1x128xf32> -> vector<1x128xf32>
    %128 = arith.addf %86, %127 : vector<1x128xf32>
    %129 = arith.mulf %123, %123 : vector<14x128xf32>
    %cst_90 = arith.constant dense<0.000000e+00> : vector<1x128xf32>
    %130 = tpu.matmul %3, %129, %cst_90 {dimension_numbers = #tpu.dot_dimension_numbers<[1], [0], [0], [1], [0, 0, 1, 1], [], []>} : vector<1x14xf32>, vector<14x128xf32>, vector<1x128xf32> -> vector<1x128xf32>
    %131 = arith.addf %89, %130 : vector<1x128xf32>
    %cst_91 = arith.constant 0.000000e+00 : f32
    %132 = vector.broadcast %cst_91 : f32 to vector<14x128xf32>
    %c0_92 = arith.constant 0 : index
    %c3_93 = arith.constant 3 : index
    %c0_94 = arith.constant 0 : index
    %c0_95 = arith.constant 0 : index
    %133 = vector.load %arg1[%c0_92, %c3_93, %c0_94, %c0_95] : memref<1x16x16x4xbf16, #tpu.memory_space<vmem>>, vector<1x1x16x4xbf16>
    %134 = vector.shape_cast %133 : vector<1x1x16x4xbf16> to vector<16x4xbf16>
    %c0_96 = arith.constant 0 : index
    %c0_97 = arith.constant 0 : index
    %c0_98 = arith.constant 0 : index
    %135 = vector.load %arg2[%c0_96, %c0_97, %c0_98] : memref<3x4x384xbf16, #tpu.memory_space<vmem>>, vector<1x4x384xbf16>
    %136 = vector.shape_cast %135 : vector<1x4x384xbf16> to vector<4x384xbf16>
    %cst_99 = arith.constant dense<0.000000e+00> : vector<16x384xf32>
    %137 = tpu.matmul %134, %136, %cst_99 {dimension_numbers = #tpu.dot_dimension_numbers<[1], [0], [0], [1], [0, 0, 1, 1], [], []>} : vector<16x4xbf16>, vector<4x384xbf16>, vector<16x384xf32> -> vector<16x384xf32>
    %138 = vector.extract_strided_slice %137 {offsets = [0, 0], sizes = [14, 128], strides = [1, 1]} : vector<16x384xf32> to vector<14x128xf32>
    %139 = arith.addf %132, %138 : vector<14x128xf32>
    %140 = vector.extract_strided_slice %137 {offsets = [1, 128], sizes = [14, 128], strides = [1, 1]} : vector<16x384xf32> to vector<14x128xf32>
    %141 = arith.addf %139, %140 : vector<14x128xf32>
    %142 = vector.extract_strided_slice %137 {offsets = [2, 256], sizes = [14, 128], strides = [1, 1]} : vector<16x384xf32> to vector<14x128xf32>
    %143 = arith.addf %141, %142 : vector<14x128xf32>
    %c0_100 = arith.constant 0 : index
    %c4_101 = arith.constant 4 : index
    %c0_102 = arith.constant 0 : index
    %c0_103 = arith.constant 0 : index
    %144 = vector.load %arg1[%c0_100, %c4_101, %c0_102, %c0_103] : memref<1x16x16x4xbf16, #tpu.memory_space<vmem>>, vector<1x1x16x4xbf16>
    %145 = vector.shape_cast %144 : vector<1x1x16x4xbf16> to vector<16x4xbf16>
    %c1_104 = arith.constant 1 : index
    %c0_105 = arith.constant 0 : index
    %c0_106 = arith.constant 0 : index
    %146 = vector.load %arg2[%c1_104, %c0_105, %c0_106] : memref<3x4x384xbf16, #tpu.memory_space<vmem>>, vector<1x4x384xbf16>
    %147 = vector.shape_cast %146 : vector<1x4x384xbf16> to vector<4x384xbf16>
    %cst_107 = arith.constant dense<0.000000e+00> : vector<16x384xf32>
    %148 = tpu.matmul %145, %147, %cst_107 {dimension_numbers = #tpu.dot_dimension_numbers<[1], [0], [0], [1], [0, 0, 1, 1], [], []>} : vector<16x4xbf16>, vector<4x384xbf16>, vector<16x384xf32> -> vector<16x384xf32>
    %149 = vector.extract_strided_slice %148 {offsets = [0, 0], sizes = [14, 128], strides = [1, 1]} : vector<16x384xf32> to vector<14x128xf32>
    %150 = arith.addf %143, %149 : vector<14x128xf32>
    %151 = vector.extract_strided_slice %148 {offsets = [1, 128], sizes = [14, 128], strides = [1, 1]} : vector<16x384xf32> to vector<14x128xf32>
    %152 = arith.addf %150, %151 : vector<14x128xf32>
    %153 = vector.extract_strided_slice %148 {offsets = [2, 256], sizes = [14, 128], strides = [1, 1]} : vector<16x384xf32> to vector<14x128xf32>
    %154 = arith.addf %152, %153 : vector<14x128xf32>
    %c0_108 = arith.constant 0 : index
    %c5 = arith.constant 5 : index
    %c0_109 = arith.constant 0 : index
    %c0_110 = arith.constant 0 : index
    %155 = vector.load %arg1[%c0_108, %c5, %c0_109, %c0_110] : memref<1x16x16x4xbf16, #tpu.memory_space<vmem>>, vector<1x1x16x4xbf16>
    %156 = vector.shape_cast %155 : vector<1x1x16x4xbf16> to vector<16x4xbf16>
    %c2_111 = arith.constant 2 : index
    %c0_112 = arith.constant 0 : index
    %c0_113 = arith.constant 0 : index
    %157 = vector.load %arg2[%c2_111, %c0_112, %c0_113] : memref<3x4x384xbf16, #tpu.memory_space<vmem>>, vector<1x4x384xbf16>
    %158 = vector.shape_cast %157 : vector<1x4x384xbf16> to vector<4x384xbf16>
    %cst_114 = arith.constant dense<0.000000e+00> : vector<16x384xf32>
    %159 = tpu.matmul %156, %158, %cst_114 {dimension_numbers = #tpu.dot_dimension_numbers<[1], [0], [0], [1], [0, 0, 1, 1], [], []>} : vector<16x4xbf16>, vector<4x384xbf16>, vector<16x384xf32> -> vector<16x384xf32>
    %160 = vector.extract_strided_slice %159 {offsets = [0, 0], sizes = [14, 128], strides = [1, 1]} : vector<16x384xf32> to vector<14x128xf32>
    %161 = arith.addf %154, %160 : vector<14x128xf32>
    %162 = vector.extract_strided_slice %159 {offsets = [1, 128], sizes = [14, 128], strides = [1, 1]} : vector<16x384xf32> to vector<14x128xf32>
    %163 = arith.addf %161, %162 : vector<14x128xf32>
    %164 = vector.extract_strided_slice %159 {offsets = [2, 256], sizes = [14, 128], strides = [1, 1]} : vector<16x384xf32> to vector<14x128xf32>
    %165 = arith.addf %163, %164 : vector<14x128xf32>
    %c0_115 = arith.constant 0 : index
    %c3_116 = arith.constant 3 : index
    %c0_117 = arith.constant 0 : index
    %c0_118 = arith.constant 0 : index
    %166 = vector.load %arg3[%c0_115, %c3_116, %c0_117, %c0_118] : memref<1x14x14x128xf32, #tpu.memory_space<vmem>>, vector<1x1x14x128xf32>
    %167 = vector.shape_cast %166 : vector<1x1x14x128xf32> to vector<14x128xf32>
    %168 = vector.shape_cast %165 : vector<14x128xf32> to vector<1x1x14x128xf32>
    tpu.vector_store %arg3[%c0_115, %c3_116, %c0_117, %c0_118], %168 {strides = array<i32>} : memref<1x14x14x128xf32, #tpu.memory_space<vmem>>, vector<1x1x14x128xf32>,
    %cst_119 = arith.constant dense<0.000000e+00> : vector<1x128xf32>
    %169 = tpu.matmul %3, %165, %cst_119 {dimension_numbers = #tpu.dot_dimension_numbers<[1], [0], [0], [1], [0, 0, 1, 1], [], []>} : vector<1x14xf32>, vector<14x128xf32>, vector<1x128xf32> -> vector<1x128xf32>
    %170 = arith.addf %128, %169 : vector<1x128xf32>
    %171 = arith.mulf %165, %165 : vector<14x128xf32>
    %cst_120 = arith.constant dense<0.000000e+00> : vector<1x128xf32>
    %172 = tpu.matmul %3, %171, %cst_120 {dimension_numbers = #tpu.dot_dimension_numbers<[1], [0], [0], [1], [0, 0, 1, 1], [], []>} : vector<1x14xf32>, vector<14x128xf32>, vector<1x128xf32> -> vector<1x128xf32>
    %173 = arith.addf %131, %172 : vector<1x128xf32>
    %cst_121 = arith.constant 0.000000e+00 : f32
    %174 = vector.broadcast %cst_121 : f32 to vector<14x128xf32>
    %c0_122 = arith.constant 0 : index
    %c4_123 = arith.constant 4 : index
    %c0_124 = arith.constant 0 : index
    %c0_125 = arith.constant 0 : index
    %175 = vector.load %arg1[%c0_122, %c4_123, %c0_124, %c0_125] : memref<1x16x16x4xbf16, #tpu.memory_space<vmem>>, vector<1x1x16x4xbf16>
    %176 = vector.shape_cast %175 : vector<1x1x16x4xbf16> to vector<16x4xbf16>
    %c0_126 = arith.constant 0 : index
    %c0_127 = arith.constant 0 : index
    %c0_128 = arith.constant 0 : index
    %177 = vector.load %arg2[%c0_126, %c0_127, %c0_128] : memref<3x4x384xbf16, #tpu.memory_space<vmem>>, vector<1x4x384xbf16>
    %178 = vector.shape_cast %177 : vector<1x4x384xbf16> to vector<4x384xbf16>
    %cst_129 = arith.constant dense<0.000000e+00> : vector<16x384xf32>
    %179 = tpu.matmul %176, %178, %cst_129 {dimension_numbers = #tpu.dot_dimension_numbers<[1], [0], [0], [1], [0, 0, 1, 1], [], []>} : vector<16x4xbf16>, vector<4x384xbf16>, vector<16x384xf32> -> vector<16x384xf32>
    %180 = vector.extract_strided_slice %179 {offsets = [0, 0], sizes = [14, 128], strides = [1, 1]} : vector<16x384xf32> to vector<14x128xf32>
    %181 = arith.addf %174, %180 : vector<14x128xf32>
    %182 = vector.extract_strided_slice %179 {offsets = [1, 128], sizes = [14, 128], strides = [1, 1]} : vector<16x384xf32> to vector<14x128xf32>
    %183 = arith.addf %181, %182 : vector<14x128xf32>
    %184 = vector.extract_strided_slice %179 {offsets = [2, 256], sizes = [14, 128], strides = [1, 1]} : vector<16x384xf32> to vector<14x128xf32>
    %185 = arith.addf %183, %184 : vector<14x128xf32>
    %c0_130 = arith.constant 0 : index
    %c5_131 = arith.constant 5 : index
    %c0_132 = arith.constant 0 : index
    %c0_133 = arith.constant 0 : index
    %186 = vector.load %arg1[%c0_130, %c5_131, %c0_132, %c0_133] : memref<1x16x16x4xbf16, #tpu.memory_space<vmem>>, vector<1x1x16x4xbf16>
    %187 = vector.shape_cast %186 : vector<1x1x16x4xbf16> to vector<16x4xbf16>
    %c1_134 = arith.constant 1 : index
    %c0_135 = arith.constant 0 : index
    %c0_136 = arith.constant 0 : index
    %188 = vector.load %arg2[%c1_134, %c0_135, %c0_136] : memref<3x4x384xbf16, #tpu.memory_space<vmem>>, vector<1x4x384xbf16>
    %189 = vector.shape_cast %188 : vector<1x4x384xbf16> to vector<4x384xbf16>
    %cst_137 = arith.constant dense<0.000000e+00> : vector<16x384xf32>
    %190 = tpu.matmul %187, %189, %cst_137 {dimension_numbers = #tpu.dot_dimension_numbers<[1], [0], [0], [1], [0, 0, 1, 1], [], []>} : vector<16x4xbf16>, vector<4x384xbf16>, vector<16x384xf32> -> vector<16x384xf32>
    %191 = vector.extract_strided_slice %190 {offsets = [0, 0], sizes = [14, 128], strides = [1, 1]} : vector<16x384xf32> to vector<14x128xf32>
    %192 = arith.addf %185, %191 : vector<14x128xf32>
    %193 = vector.extract_strided_slice %190 {offsets = [1, 128], sizes = [14, 128], strides = [1, 1]} : vector<16x384xf32> to vector<14x128xf32>
    %194 = arith.addf %192, %193 : vector<14x128xf32>
    %195 = vector.extract_strided_slice %190 {offsets = [2, 256], sizes = [14, 128], strides = [1, 1]} : vector<16x384xf32> to vector<14x128xf32>
    %196 = arith.addf %194, %195 : vector<14x128xf32>
    %c0_138 = arith.constant 0 : index
    %c6 = arith.constant 6 : index
    %c0_139 = arith.constant 0 : index
    %c0_140 = arith.constant 0 : index
    %197 = vector.load %arg1[%c0_138, %c6, %c0_139, %c0_140] : memref<1x16x16x4xbf16, #tpu.memory_space<vmem>>, vector<1x1x16x4xbf16>
    %198 = vector.shape_cast %197 : vector<1x1x16x4xbf16> to vector<16x4xbf16>
    %c2_141 = arith.constant 2 : index
    %c0_142 = arith.constant 0 : index
    %c0_143 = arith.constant 0 : index
    %199 = vector.load %arg2[%c2_141, %c0_142, %c0_143] : memref<3x4x384xbf16, #tpu.memory_space<vmem>>, vector<1x4x384xbf16>
    %200 = vector.shape_cast %199 : vector<1x4x384xbf16> to vector<4x384xbf16>
    %cst_144 = arith.constant dense<0.000000e+00> : vector<16x384xf32>
    %201 = tpu.matmul %198, %200, %cst_144 {dimension_numbers = #tpu.dot_dimension_numbers<[1], [0], [0], [1], [0, 0, 1, 1], [], []>} : vector<16x4xbf16>, vector<4x384xbf16>, vector<16x384xf32> -> vector<16x384xf32>
    %202 = vector.extract_strided_slice %201 {offsets = [0, 0], sizes = [14, 128], strides = [1, 1]} : vector<16x384xf32> to vector<14x128xf32>
    %203 = arith.addf %196, %202 : vector<14x128xf32>
    %204 = vector.extract_strided_slice %201 {offsets = [1, 128], sizes = [14, 128], strides = [1, 1]} : vector<16x384xf32> to vector<14x128xf32>
    %205 = arith.addf %203, %204 : vector<14x128xf32>
    %206 = vector.extract_strided_slice %201 {offsets = [2, 256], sizes = [14, 128], strides = [1, 1]} : vector<16x384xf32> to vector<14x128xf32>
    %207 = arith.addf %205, %206 : vector<14x128xf32>
    %c0_145 = arith.constant 0 : index
    %c4_146 = arith.constant 4 : index
    %c0_147 = arith.constant 0 : index
    %c0_148 = arith.constant 0 : index
    %208 = vector.load %arg3[%c0_145, %c4_146, %c0_147, %c0_148] : memref<1x14x14x128xf32, #tpu.memory_space<vmem>>, vector<1x1x14x128xf32>
    %209 = vector.shape_cast %208 : vector<1x1x14x128xf32> to vector<14x128xf32>
    %210 = vector.shape_cast %207 : vector<14x128xf32> to vector<1x1x14x128xf32>
    tpu.vector_store %arg3[%c0_145, %c4_146, %c0_147, %c0_148], %210 {strides = array<i32>} : memref<1x14x14x128xf32, #tpu.memory_space<vmem>>, vector<1x1x14x128xf32>,
    %cst_149 = arith.constant dense<0.000000e+00> : vector<1x128xf32>
    %211 = tpu.matmul %3, %207, %cst_149 {dimension_numbers = #tpu.dot_dimension_numbers<[1], [0], [0], [1], [0, 0, 1, 1], [], []>} : vector<1x14xf32>, vector<14x128xf32>, vector<1x128xf32> -> vector<1x128xf32>
    %212 = arith.addf %170, %211 : vector<1x128xf32>
    %213 = arith.mulf %207, %207 : vector<14x128xf32>
    %cst_150 = arith.constant dense<0.000000e+00> : vector<1x128xf32>
    %214 = tpu.matmul %3, %213, %cst_150 {dimension_numbers = #tpu.dot_dimension_numbers<[1], [0], [0], [1], [0, 0, 1, 1], [], []>} : vector<1x14xf32>, vector<14x128xf32>, vector<1x128xf32> -> vector<1x128xf32>
    %215 = arith.addf %173, %214 : vector<1x128xf32>
    %cst_151 = arith.constant 0.000000e+00 : f32
    %216 = vector.broadcast %cst_151 : f32 to vector<14x128xf32>
    %c0_152 = arith.constant 0 : index
    %c5_153 = arith.constant 5 : index
    %c0_154 = arith.constant 0 : index
    %c0_155 = arith.constant 0 : index
    %217 = vector.load %arg1[%c0_152, %c5_153, %c0_154, %c0_155] : memref<1x16x16x4xbf16, #tpu.memory_space<vmem>>, vector<1x1x16x4xbf16>
    %218 = vector.shape_cast %217 : vector<1x1x16x4xbf16> to vector<16x4xbf16>
    %c0_156 = arith.constant 0 : index
    %c0_157 = arith.constant 0 : index
    %c0_158 = arith.constant 0 : index
    %219 = vector.load %arg2[%c0_156, %c0_157, %c0_158] : memref<3x4x384xbf16, #tpu.memory_space<vmem>>, vector<1x4x384xbf16>
    %220 = vector.shape_cast %219 : vector<1x4x384xbf16> to vector<4x384xbf16>
    %cst_159 = arith.constant dense<0.000000e+00> : vector<16x384xf32>
    %221 = tpu.matmul %218, %220, %cst_159 {dimension_numbers = #tpu.dot_dimension_numbers<[1], [0], [0], [1], [0, 0, 1, 1], [], []>} : vector<16x4xbf16>, vector<4x384xbf16>, vector<16x384xf32> -> vector<16x384xf32>
    %222 = vector.extract_strided_slice %221 {offsets = [0, 0], sizes = [14, 128], strides = [1, 1]} : vector<16x384xf32> to vector<14x128xf32>
    %223 = arith.addf %216, %222 : vector<14x128xf32>
    %224 = vector.extract_strided_slice %221 {offsets = [1, 128], sizes = [14, 128], strides = [1, 1]} : vector<16x384xf32> to vector<14x128xf32>
    %225 = arith.addf %223, %224 : vector<14x128xf32>
    %226 = vector.extract_strided_slice %221 {offsets = [2, 256], sizes = [14, 128], strides = [1, 1]} : vector<16x384xf32> to vector<14x128xf32>
    %227 = arith.addf %225, %226 : vector<14x128xf32>
    %c0_160 = arith.constant 0 : index
    %c6_161 = arith.constant 6 : index
    %c0_162 = arith.constant 0 : index
    %c0_163 = arith.constant 0 : index
    %228 = vector.load %arg1[%c0_160, %c6_161, %c0_162, %c0_163] : memref<1x16x16x4xbf16, #tpu.memory_space<vmem>>, vector<1x1x16x4xbf16>
    %229 = vector.shape_cast %228 : vector<1x1x16x4xbf16> to vector<16x4xbf16>
    %c1_164 = arith.constant 1 : index
    %c0_165 = arith.constant 0 : index
    %c0_166 = arith.constant 0 : index
    %230 = vector.load %arg2[%c1_164, %c0_165, %c0_166] : memref<3x4x384xbf16, #tpu.memory_space<vmem>>, vector<1x4x384xbf16>
    %231 = vector.shape_cast %230 : vector<1x4x384xbf16> to vector<4x384xbf16>
    %cst_167 = arith.constant dense<0.000000e+00> : vector<16x384xf32>
    %232 = tpu.matmul %229, %231, %cst_167 {dimension_numbers = #tpu.dot_dimension_numbers<[1], [0], [0], [1], [0, 0, 1, 1], [], []>} : vector<16x4xbf16>, vector<4x384xbf16>, vector<16x384xf32> -> vector<16x384xf32>
    %233 = vector.extract_strided_slice %232 {offsets = [0, 0], sizes = [14, 128], strides = [1, 1]} : vector<16x384xf32> to vector<14x128xf32>
    %234 = arith.addf %227, %233 : vector<14x128xf32>
    %235 = vector.extract_strided_slice %232 {offsets = [1, 128], sizes = [14, 128], strides = [1, 1]} : vector<16x384xf32> to vector<14x128xf32>
    %236 = arith.addf %234, %235 : vector<14x128xf32>
    %237 = vector.extract_strided_slice %232 {offsets = [2, 256], sizes = [14, 128], strides = [1, 1]} : vector<16x384xf32> to vector<14x128xf32>
    %238 = arith.addf %236, %237 : vector<14x128xf32>
    %c0_168 = arith.constant 0 : index
    %c7 = arith.constant 7 : index
    %c0_169 = arith.constant 0 : index
    %c0_170 = arith.constant 0 : index
    %239 = vector.load %arg1[%c0_168, %c7, %c0_169, %c0_170] : memref<1x16x16x4xbf16, #tpu.memory_space<vmem>>, vector<1x1x16x4xbf16>
    %240 = vector.shape_cast %239 : vector<1x1x16x4xbf16> to vector<16x4xbf16>
    %c2_171 = arith.constant 2 : index
    %c0_172 = arith.constant 0 : index
    %c0_173 = arith.constant 0 : index
    %241 = vector.load %arg2[%c2_171, %c0_172, %c0_173] : memref<3x4x384xbf16, #tpu.memory_space<vmem>>, vector<1x4x384xbf16>
    %242 = vector.shape_cast %241 : vector<1x4x384xbf16> to vector<4x384xbf16>
    %cst_174 = arith.constant dense<0.000000e+00> : vector<16x384xf32>
    %243 = tpu.matmul %240, %242, %cst_174 {dimension_numbers = #tpu.dot_dimension_numbers<[1], [0], [0], [1], [0, 0, 1, 1], [], []>} : vector<16x4xbf16>, vector<4x384xbf16>, vector<16x384xf32> -> vector<16x384xf32>
    %244 = vector.extract_strided_slice %243 {offsets = [0, 0], sizes = [14, 128], strides = [1, 1]} : vector<16x384xf32> to vector<14x128xf32>
    %245 = arith.addf %238, %244 : vector<14x128xf32>
    %246 = vector.extract_strided_slice %243 {offsets = [1, 128], sizes = [14, 128], strides = [1, 1]} : vector<16x384xf32> to vector<14x128xf32>
    %247 = arith.addf %245, %246 : vector<14x128xf32>
    %248 = vector.extract_strided_slice %243 {offsets = [2, 256], sizes = [14, 128], strides = [1, 1]} : vector<16x384xf32> to vector<14x128xf32>
    %249 = arith.addf %247, %248 : vector<14x128xf32>
    %c0_175 = arith.constant 0 : index
    %c5_176 = arith.constant 5 : index
    %c0_177 = arith.constant 0 : index
    %c0_178 = arith.constant 0 : index
    %250 = vector.load %arg3[%c0_175, %c5_176, %c0_177, %c0_178] : memref<1x14x14x128xf32, #tpu.memory_space<vmem>>, vector<1x1x14x128xf32>
    %251 = vector.shape_cast %250 : vector<1x1x14x128xf32> to vector<14x128xf32>
    %252 = vector.shape_cast %249 : vector<14x128xf32> to vector<1x1x14x128xf32>
    tpu.vector_store %arg3[%c0_175, %c5_176, %c0_177, %c0_178], %252 {strides = array<i32>} : memref<1x14x14x128xf32, #tpu.memory_space<vmem>>, vector<1x1x14x128xf32>,
    %cst_179 = arith.constant dense<0.000000e+00> : vector<1x128xf32>
    %253 = tpu.matmul %3, %249, %cst_179 {dimension_numbers = #tpu.dot_dimension_numbers<[1], [0], [0], [1], [0, 0, 1, 1], [], []>} : vector<1x14xf32>, vector<14x128xf32>, vector<1x128xf32> -> vector<1x128xf32>
    %254 = arith.addf %212, %253 : vector<1x128xf32>
    %255 = arith.mulf %249, %249 : vector<14x128xf32>
    %cst_180 = arith.constant dense<0.000000e+00> : vector<1x128xf32>
    %256 = tpu.matmul %3, %255, %cst_180 {dimension_numbers = #tpu.dot_dimension_numbers<[1], [0], [0], [1], [0, 0, 1, 1], [], []>} : vector<1x14xf32>, vector<14x128xf32>, vector<1x128xf32> -> vector<1x128xf32>
    %257 = arith.addf %215, %256 : vector<1x128xf32>
    %cst_181 = arith.constant 0.000000e+00 : f32
    %258 = vector.broadcast %cst_181 : f32 to vector<14x128xf32>
    %c0_182 = arith.constant 0 : index
    %c6_183 = arith.constant 6 : index
    %c0_184 = arith.constant 0 : index
    %c0_185 = arith.constant 0 : index
    %259 = vector.load %arg1[%c0_182, %c6_183, %c0_184, %c0_185] : memref<1x16x16x4xbf16, #tpu.memory_space<vmem>>, vector<1x1x16x4xbf16>
    %260 = vector.shape_cast %259 : vector<1x1x16x4xbf16> to vector<16x4xbf16>
    %c0_186 = arith.constant 0 : index
    %c0_187 = arith.constant 0 : index
    %c0_188 = arith.constant 0 : index
    %261 = vector.load %arg2[%c0_186, %c0_187, %c0_188] : memref<3x4x384xbf16, #tpu.memory_space<vmem>>, vector<1x4x384xbf16>
    %262 = vector.shape_cast %261 : vector<1x4x384xbf16> to vector<4x384xbf16>
    %cst_189 = arith.constant dense<0.000000e+00> : vector<16x384xf32>
    %263 = tpu.matmul %260, %262, %cst_189 {dimension_numbers = #tpu.dot_dimension_numbers<[1], [0], [0], [1], [0, 0, 1, 1], [], []>} : vector<16x4xbf16>, vector<4x384xbf16>, vector<16x384xf32> -> vector<16x384xf32>
    %264 = vector.extract_strided_slice %263 {offsets = [0, 0], sizes = [14, 128], strides = [1, 1]} : vector<16x384xf32> to vector<14x128xf32>
    %265 = arith.addf %258, %264 : vector<14x128xf32>
    %266 = vector.extract_strided_slice %263 {offsets = [1, 128], sizes = [14, 128], strides = [1, 1]} : vector<16x384xf32> to vector<14x128xf32>
    %267 = arith.addf %265, %266 : vector<14x128xf32>
    %268 = vector.extract_strided_slice %263 {offsets = [2, 256], sizes = [14, 128], strides = [1, 1]} : vector<16x384xf32> to vector<14x128xf32>
    %269 = arith.addf %267, %268 : vector<14x128xf32>
    %c0_190 = arith.constant 0 : index
    %c7_191 = arith.constant 7 : index
    %c0_192 = arith.constant 0 : index
    %c0_193 = arith.constant 0 : index
    %270 = vector.load %arg1[%c0_190, %c7_191, %c0_192, %c0_193] : memref<1x16x16x4xbf16, #tpu.memory_space<vmem>>, vector<1x1x16x4xbf16>
    %271 = vector.shape_cast %270 : vector<1x1x16x4xbf16> to vector<16x4xbf16>
    %c1_194 = arith.constant 1 : index
    %c0_195 = arith.constant 0 : index
    %c0_196 = arith.constant 0 : index
    %272 = vector.load %arg2[%c1_194, %c0_195, %c0_196] : memref<3x4x384xbf16, #tpu.memory_space<vmem>>, vector<1x4x384xbf16>
    %273 = vector.shape_cast %272 : vector<1x4x384xbf16> to vector<4x384xbf16>
    %cst_197 = arith.constant dense<0.000000e+00> : vector<16x384xf32>
    %274 = tpu.matmul %271, %273, %cst_197 {dimension_numbers = #tpu.dot_dimension_numbers<[1], [0], [0], [1], [0, 0, 1, 1], [], []>} : vector<16x4xbf16>, vector<4x384xbf16>, vector<16x384xf32> -> vector<16x384xf32>
    %275 = vector.extract_strided_slice %274 {offsets = [0, 0], sizes = [14, 128], strides = [1, 1]} : vector<16x384xf32> to vector<14x128xf32>
    %276 = arith.addf %269, %275 : vector<14x128xf32>
    %277 = vector.extract_strided_slice %274 {offsets = [1, 128], sizes = [14, 128], strides = [1, 1]} : vector<16x384xf32> to vector<14x128xf32>
    %278 = arith.addf %276, %277 : vector<14x128xf32>
    %279 = vector.extract_strided_slice %274 {offsets = [2, 256], sizes = [14, 128], strides = [1, 1]} : vector<16x384xf32> to vector<14x128xf32>
    %280 = arith.addf %278, %279 : vector<14x128xf32>
    %c0_198 = arith.constant 0 : index
    %c8 = arith.constant 8 : index
    %c0_199 = arith.constant 0 : index
    %c0_200 = arith.constant 0 : index
    %281 = vector.load %arg1[%c0_198, %c8, %c0_199, %c0_200] : memref<1x16x16x4xbf16, #tpu.memory_space<vmem>>, vector<1x1x16x4xbf16>
    %282 = vector.shape_cast %281 : vector<1x1x16x4xbf16> to vector<16x4xbf16>
    %c2_201 = arith.constant 2 : index
    %c0_202 = arith.constant 0 : index
    %c0_203 = arith.constant 0 : index
    %283 = vector.load %arg2[%c2_201, %c0_202, %c0_203] : memref<3x4x384xbf16, #tpu.memory_space<vmem>>, vector<1x4x384xbf16>
    %284 = vector.shape_cast %283 : vector<1x4x384xbf16> to vector<4x384xbf16>
    %cst_204 = arith.constant dense<0.000000e+00> : vector<16x384xf32>
    %285 = tpu.matmul %282, %284, %cst_204 {dimension_numbers = #tpu.dot_dimension_numbers<[1], [0], [0], [1], [0, 0, 1, 1], [], []>} : vector<16x4xbf16>, vector<4x384xbf16>, vector<16x384xf32> -> vector<16x384xf32>
    %286 = vector.extract_strided_slice %285 {offsets = [0, 0], sizes = [14, 128], strides = [1, 1]} : vector<16x384xf32> to vector<14x128xf32>
    %287 = arith.addf %280, %286 : vector<14x128xf32>
    %288 = vector.extract_strided_slice %285 {offsets = [1, 128], sizes = [14, 128], strides = [1, 1]} : vector<16x384xf32> to vector<14x128xf32>
    %289 = arith.addf %287, %288 : vector<14x128xf32>
    %290 = vector.extract_strided_slice %285 {offsets = [2, 256], sizes = [14, 128], strides = [1, 1]} : vector<16x384xf32> to vector<14x128xf32>
    %291 = arith.addf %289, %290 : vector<14x128xf32>
    %c0_205 = arith.constant 0 : index
    %c6_206 = arith.constant 6 : index
    %c0_207 = arith.constant 0 : index
    %c0_208 = arith.constant 0 : index
    %292 = vector.load %arg3[%c0_205, %c6_206, %c0_207, %c0_208] : memref<1x14x14x128xf32, #tpu.memory_space<vmem>>, vector<1x1x14x128xf32>
    %293 = vector.shape_cast %292 : vector<1x1x14x128xf32> to vector<14x128xf32>
    %294 = vector.shape_cast %291 : vector<14x128xf32> to vector<1x1x14x128xf32>
    tpu.vector_store %arg3[%c0_205, %c6_206, %c0_207, %c0_208], %294 {strides = array<i32>} : memref<1x14x14x128xf32, #tpu.memory_space<vmem>>, vector<1x1x14x128xf32>,
    %cst_209 = arith.constant dense<0.000000e+00> : vector<1x128xf32>
    %295 = tpu.matmul %3, %291, %cst_209 {dimension_numbers = #tpu.dot_dimension_numbers<[1], [0], [0], [1], [0, 0, 1, 1], [], []>} : vector<1x14xf32>, vector<14x128xf32>, vector<1x128xf32> -> vector<1x128xf32>
    %296 = arith.addf %254, %295 : vector<1x128xf32>
    %297 = arith.mulf %291, %291 : vector<14x128xf32>
    %cst_210 = arith.constant dense<0.000000e+00> : vector<1x128xf32>
    %298 = tpu.matmul %3, %297, %cst_210 {dimension_numbers = #tpu.dot_dimension_numbers<[1], [0], [0], [1], [0, 0, 1, 1], [], []>} : vector<1x14xf32>, vector<14x128xf32>, vector<1x128xf32> -> vector<1x128xf32>
    %299 = arith.addf %257, %298 : vector<1x128xf32>
    %cst_211 = arith.constant 0.000000e+00 : f32
    %300 = vector.broadcast %cst_211 : f32 to vector<14x128xf32>
    %c0_212 = arith.constant 0 : index
    %c7_213 = arith.constant 7 : index
    %c0_214 = arith.constant 0 : index
    %c0_215 = arith.constant 0 : index
    %301 = vector.load %arg1[%c0_212, %c7_213, %c0_214, %c0_215] : memref<1x16x16x4xbf16, #tpu.memory_space<vmem>>, vector<1x1x16x4xbf16>
    %302 = vector.shape_cast %301 : vector<1x1x16x4xbf16> to vector<16x4xbf16>
    %c0_216 = arith.constant 0 : index
    %c0_217 = arith.constant 0 : index
    %c0_218 = arith.constant 0 : index
    %303 = vector.load %arg2[%c0_216, %c0_217, %c0_218] : memref<3x4x384xbf16, #tpu.memory_space<vmem>>, vector<1x4x384xbf16>
    %304 = vector.shape_cast %303 : vector<1x4x384xbf16> to vector<4x384xbf16>
    %cst_219 = arith.constant dense<0.000000e+00> : vector<16x384xf32>
    %305 = tpu.matmul %302, %304, %cst_219 {dimension_numbers = #tpu.dot_dimension_numbers<[1], [0], [0], [1], [0, 0, 1, 1], [], []>} : vector<16x4xbf16>, vector<4x384xbf16>, vector<16x384xf32> -> vector<16x384xf32>
    %306 = vector.extract_strided_slice %305 {offsets = [0, 0], sizes = [14, 128], strides = [1, 1]} : vector<16x384xf32> to vector<14x128xf32>
    %307 = arith.addf %300, %306 : vector<14x128xf32>
    %308 = vector.extract_strided_slice %305 {offsets = [1, 128], sizes = [14, 128], strides = [1, 1]} : vector<16x384xf32> to vector<14x128xf32>
    %309 = arith.addf %307, %308 : vector<14x128xf32>
    %310 = vector.extract_strided_slice %305 {offsets = [2, 256], sizes = [14, 128], strides = [1, 1]} : vector<16x384xf32> to vector<14x128xf32>
    %311 = arith.addf %309, %310 : vector<14x128xf32>
    %c0_220 = arith.constant 0 : index
    %c8_221 = arith.constant 8 : index
    %c0_222 = arith.constant 0 : index
    %c0_223 = arith.constant 0 : index
    %312 = vector.load %arg1[%c0_220, %c8_221, %c0_222, %c0_223] : memref<1x16x16x4xbf16, #tpu.memory_space<vmem>>, vector<1x1x16x4xbf16>
    %313 = vector.shape_cast %312 : vector<1x1x16x4xbf16> to vector<16x4xbf16>
    %c1_224 = arith.constant 1 : index
    %c0_225 = arith.constant 0 : index
    %c0_226 = arith.constant 0 : index
    %314 = vector.load %arg2[%c1_224, %c0_225, %c0_226] : memref<3x4x384xbf16, #tpu.memory_space<vmem>>, vector<1x4x384xbf16>
    %315 = vector.shape_cast %314 : vector<1x4x384xbf16> to vector<4x384xbf16>
    %cst_227 = arith.constant dense<0.000000e+00> : vector<16x384xf32>
    %316 = tpu.matmul %313, %315, %cst_227 {dimension_numbers = #tpu.dot_dimension_numbers<[1], [0], [0], [1], [0, 0, 1, 1], [], []>} : vector<16x4xbf16>, vector<4x384xbf16>, vector<16x384xf32> -> vector<16x384xf32>
    %317 = vector.extract_strided_slice %316 {offsets = [0, 0], sizes = [14, 128], strides = [1, 1]} : vector<16x384xf32> to vector<14x128xf32>
    %318 = arith.addf %311, %317 : vector<14x128xf32>
    %319 = vector.extract_strided_slice %316 {offsets = [1, 128], sizes = [14, 128], strides = [1, 1]} : vector<16x384xf32> to vector<14x128xf32>
    %320 = arith.addf %318, %319 : vector<14x128xf32>
    %321 = vector.extract_strided_slice %316 {offsets = [2, 256], sizes = [14, 128], strides = [1, 1]} : vector<16x384xf32> to vector<14x128xf32>
    %322 = arith.addf %320, %321 : vector<14x128xf32>
    %c0_228 = arith.constant 0 : index
    %c9 = arith.constant 9 : index
    %c0_229 = arith.constant 0 : index
    %c0_230 = arith.constant 0 : index
    %323 = vector.load %arg1[%c0_228, %c9, %c0_229, %c0_230] : memref<1x16x16x4xbf16, #tpu.memory_space<vmem>>, vector<1x1x16x4xbf16>
    %324 = vector.shape_cast %323 : vector<1x1x16x4xbf16> to vector<16x4xbf16>
    %c2_231 = arith.constant 2 : index
    %c0_232 = arith.constant 0 : index
    %c0_233 = arith.constant 0 : index
    %325 = vector.load %arg2[%c2_231, %c0_232, %c0_233] : memref<3x4x384xbf16, #tpu.memory_space<vmem>>, vector<1x4x384xbf16>
    %326 = vector.shape_cast %325 : vector<1x4x384xbf16> to vector<4x384xbf16>
    %cst_234 = arith.constant dense<0.000000e+00> : vector<16x384xf32>
    %327 = tpu.matmul %324, %326, %cst_234 {dimension_numbers = #tpu.dot_dimension_numbers<[1], [0], [0], [1], [0, 0, 1, 1], [], []>} : vector<16x4xbf16>, vector<4x384xbf16>, vector<16x384xf32> -> vector<16x384xf32>
    %328 = vector.extract_strided_slice %327 {offsets = [0, 0], sizes = [14, 128], strides = [1, 1]} : vector<16x384xf32> to vector<14x128xf32>
    %329 = arith.addf %322, %328 : vector<14x128xf32>
    %330 = vector.extract_strided_slice %327 {offsets = [1, 128], sizes = [14, 128], strides = [1, 1]} : vector<16x384xf32> to vector<14x128xf32>
    %331 = arith.addf %329, %330 : vector<14x128xf32>
    %332 = vector.extract_strided_slice %327 {offsets = [2, 256], sizes = [14, 128], strides = [1, 1]} : vector<16x384xf32> to vector<14x128xf32>
    %333 = arith.addf %331, %332 : vector<14x128xf32>
    %c0_235 = arith.constant 0 : index
    %c7_236 = arith.constant 7 : index
    %c0_237 = arith.constant 0 : index
    %c0_238 = arith.constant 0 : index
    %334 = vector.load %arg3[%c0_235, %c7_236, %c0_237, %c0_238] : memref<1x14x14x128xf32, #tpu.memory_space<vmem>>, vector<1x1x14x128xf32>
    %335 = vector.shape_cast %334 : vector<1x1x14x128xf32> to vector<14x128xf32>
    %336 = vector.shape_cast %333 : vector<14x128xf32> to vector<1x1x14x128xf32>
    tpu.vector_store %arg3[%c0_235, %c7_236, %c0_237, %c0_238], %336 {strides = array<i32>} : memref<1x14x14x128xf32, #tpu.memory_space<vmem>>, vector<1x1x14x128xf32>,
    %cst_239 = arith.constant dense<0.000000e+00> : vector<1x128xf32>
    %337 = tpu.matmul %3, %333, %cst_239 {dimension_numbers = #tpu.dot_dimension_numbers<[1], [0], [0], [1], [0, 0, 1, 1], [], []>} : vector<1x14xf32>, vector<14x128xf32>, vector<1x128xf32> -> vector<1x128xf32>
    %338 = arith.addf %296, %337 : vector<1x128xf32>
    %339 = arith.mulf %333, %333 : vector<14x128xf32>
    %cst_240 = arith.constant dense<0.000000e+00> : vector<1x128xf32>
    %340 = tpu.matmul %3, %339, %cst_240 {dimension_numbers = #tpu.dot_dimension_numbers<[1], [0], [0], [1], [0, 0, 1, 1], [], []>} : vector<1x14xf32>, vector<14x128xf32>, vector<1x128xf32> -> vector<1x128xf32>
    %341 = arith.addf %299, %340 : vector<1x128xf32>
    %cst_241 = arith.constant 0.000000e+00 : f32
    %342 = vector.broadcast %cst_241 : f32 to vector<14x128xf32>
    %c0_242 = arith.constant 0 : index
    %c8_243 = arith.constant 8 : index
    %c0_244 = arith.constant 0 : index
    %c0_245 = arith.constant 0 : index
    %343 = vector.load %arg1[%c0_242, %c8_243, %c0_244, %c0_245] : memref<1x16x16x4xbf16, #tpu.memory_space<vmem>>, vector<1x1x16x4xbf16>
    %344 = vector.shape_cast %343 : vector<1x1x16x4xbf16> to vector<16x4xbf16>
    %c0_246 = arith.constant 0 : index
    %c0_247 = arith.constant 0 : index
    %c0_248 = arith.constant 0 : index
    %345 = vector.load %arg2[%c0_246, %c0_247, %c0_248] : memref<3x4x384xbf16, #tpu.memory_space<vmem>>, vector<1x4x384xbf16>
    %346 = vector.shape_cast %345 : vector<1x4x384xbf16> to vector<4x384xbf16>
    %cst_249 = arith.constant dense<0.000000e+00> : vector<16x384xf32>
    %347 = tpu.matmul %344, %346, %cst_249 {dimension_numbers = #tpu.dot_dimension_numbers<[1], [0], [0], [1], [0, 0, 1, 1], [], []>} : vector<16x4xbf16>, vector<4x384xbf16>, vector<16x384xf32> -> vector<16x384xf32>
    %348 = vector.extract_strided_slice %347 {offsets = [0, 0], sizes = [14, 128], strides = [1, 1]} : vector<16x384xf32> to vector<14x128xf32>
    %349 = arith.addf %342, %348 : vector<14x128xf32>
    %350 = vector.extract_strided_slice %347 {offsets = [1, 128], sizes = [14, 128], strides = [1, 1]} : vector<16x384xf32> to vector<14x128xf32>
    %351 = arith.addf %349, %350 : vector<14x128xf32>
    %352 = vector.extract_strided_slice %347 {offsets = [2, 256], sizes = [14, 128], strides = [1, 1]} : vector<16x384xf32> to vector<14x128xf32>
    %353 = arith.addf %351, %352 : vector<14x128xf32>
    %c0_250 = arith.constant 0 : index
    %c9_251 = arith.constant 9 : index
    %c0_252 = arith.constant 0 : index
    %c0_253 = arith.constant 0 : index
    %354 = vector.load %arg1[%c0_250, %c9_251, %c0_252, %c0_253] : memref<1x16x16x4xbf16, #tpu.memory_space<vmem>>, vector<1x1x16x4xbf16>
    %355 = vector.shape_cast %354 : vector<1x1x16x4xbf16> to vector<16x4xbf16>
    %c1_254 = arith.constant 1 : index
    %c0_255 = arith.constant 0 : index
    %c0_256 = arith.constant 0 : index
    %356 = vector.load %arg2[%c1_254, %c0_255, %c0_256] : memref<3x4x384xbf16, #tpu.memory_space<vmem>>, vector<1x4x384xbf16>
    %357 = vector.shape_cast %356 : vector<1x4x384xbf16> to vector<4x384xbf16>
    %cst_257 = arith.constant dense<0.000000e+00> : vector<16x384xf32>
    %358 = tpu.matmul %355, %357, %cst_257 {dimension_numbers = #tpu.dot_dimension_numbers<[1], [0], [0], [1], [0, 0, 1, 1], [], []>} : vector<16x4xbf16>, vector<4x384xbf16>, vector<16x384xf32> -> vector<16x384xf32>
    %359 = vector.extract_strided_slice %358 {offsets = [0, 0], sizes = [14, 128], strides = [1, 1]} : vector<16x384xf32> to vector<14x128xf32>
    %360 = arith.addf %353, %359 : vector<14x128xf32>
    %361 = vector.extract_strided_slice %358 {offsets = [1, 128], sizes = [14, 128], strides = [1, 1]} : vector<16x384xf32> to vector<14x128xf32>
    %362 = arith.addf %360, %361 : vector<14x128xf32>
    %363 = vector.extract_strided_slice %358 {offsets = [2, 256], sizes = [14, 128], strides = [1, 1]} : vector<16x384xf32> to vector<14x128xf32>
    %364 = arith.addf %362, %363 : vector<14x128xf32>
    %c0_258 = arith.constant 0 : index
    %c10 = arith.constant 10 : index
    %c0_259 = arith.constant 0 : index
    %c0_260 = arith.constant 0 : index
    %365 = vector.load %arg1[%c0_258, %c10, %c0_259, %c0_260] : memref<1x16x16x4xbf16, #tpu.memory_space<vmem>>, vector<1x1x16x4xbf16>
    %366 = vector.shape_cast %365 : vector<1x1x16x4xbf16> to vector<16x4xbf16>
    %c2_261 = arith.constant 2 : index
    %c0_262 = arith.constant 0 : index
    %c0_263 = arith.constant 0 : index
    %367 = vector.load %arg2[%c2_261, %c0_262, %c0_263] : memref<3x4x384xbf16, #tpu.memory_space<vmem>>, vector<1x4x384xbf16>
    %368 = vector.shape_cast %367 : vector<1x4x384xbf16> to vector<4x384xbf16>
    %cst_264 = arith.constant dense<0.000000e+00> : vector<16x384xf32>
    %369 = tpu.matmul %366, %368, %cst_264 {dimension_numbers = #tpu.dot_dimension_numbers<[1], [0], [0], [1], [0, 0, 1, 1], [], []>} : vector<16x4xbf16>, vector<4x384xbf16>, vector<16x384xf32> -> vector<16x384xf32>
    %370 = vector.extract_strided_slice %369 {offsets = [0, 0], sizes = [14, 128], strides = [1, 1]} : vector<16x384xf32> to vector<14x128xf32>
    %371 = arith.addf %364, %370 : vector<14x128xf32>
    %372 = vector.extract_strided_slice %369 {offsets = [1, 128], sizes = [14, 128], strides = [1, 1]} : vector<16x384xf32> to vector<14x128xf32>
    %373 = arith.addf %371, %372 : vector<14x128xf32>
    %374 = vector.extract_strided_slice %369 {offsets = [2, 256], sizes = [14, 128], strides = [1, 1]} : vector<16x384xf32> to vector<14x128xf32>
    %375 = arith.addf %373, %374 : vector<14x128xf32>
    %c0_265 = arith.constant 0 : index
    %c8_266 = arith.constant 8 : index
    %c0_267 = arith.constant 0 : index
    %c0_268 = arith.constant 0 : index
    %376 = vector.load %arg3[%c0_265, %c8_266, %c0_267, %c0_268] : memref<1x14x14x128xf32, #tpu.memory_space<vmem>>, vector<1x1x14x128xf32>
    %377 = vector.shape_cast %376 : vector<1x1x14x128xf32> to vector<14x128xf32>
    %378 = vector.shape_cast %375 : vector<14x128xf32> to vector<1x1x14x128xf32>
    tpu.vector_store %arg3[%c0_265, %c8_266, %c0_267, %c0_268], %378 {strides = array<i32>} : memref<1x14x14x128xf32, #tpu.memory_space<vmem>>, vector<1x1x14x128xf32>,
    %cst_269 = arith.constant dense<0.000000e+00> : vector<1x128xf32>
    %379 = tpu.matmul %3, %375, %cst_269 {dimension_numbers = #tpu.dot_dimension_numbers<[1], [0], [0], [1], [0, 0, 1, 1], [], []>} : vector<1x14xf32>, vector<14x128xf32>, vector<1x128xf32> -> vector<1x128xf32>
    %380 = arith.addf %338, %379 : vector<1x128xf32>
    %381 = arith.mulf %375, %375 : vector<14x128xf32>
    %cst_270 = arith.constant dense<0.000000e+00> : vector<1x128xf32>
    %382 = tpu.matmul %3, %381, %cst_270 {dimension_numbers = #tpu.dot_dimension_numbers<[1], [0], [0], [1], [0, 0, 1, 1], [], []>} : vector<1x14xf32>, vector<14x128xf32>, vector<1x128xf32> -> vector<1x128xf32>
    %383 = arith.addf %341, %382 : vector<1x128xf32>
    %cst_271 = arith.constant 0.000000e+00 : f32
    %384 = vector.broadcast %cst_271 : f32 to vector<14x128xf32>
    %c0_272 = arith.constant 0 : index
    %c9_273 = arith.constant 9 : index
    %c0_274 = arith.constant 0 : index
    %c0_275 = arith.constant 0 : index
    %385 = vector.load %arg1[%c0_272, %c9_273, %c0_274, %c0_275] : memref<1x16x16x4xbf16, #tpu.memory_space<vmem>>, vector<1x1x16x4xbf16>
    %386 = vector.shape_cast %385 : vector<1x1x16x4xbf16> to vector<16x4xbf16>
    %c0_276 = arith.constant 0 : index
    %c0_277 = arith.constant 0 : index
    %c0_278 = arith.constant 0 : index
    %387 = vector.load %arg2[%c0_276, %c0_277, %c0_278] : memref<3x4x384xbf16, #tpu.memory_space<vmem>>, vector<1x4x384xbf16>
    %388 = vector.shape_cast %387 : vector<1x4x384xbf16> to vector<4x384xbf16>
    %cst_279 = arith.constant dense<0.000000e+00> : vector<16x384xf32>
    %389 = tpu.matmul %386, %388, %cst_279 {dimension_numbers = #tpu.dot_dimension_numbers<[1], [0], [0], [1], [0, 0, 1, 1], [], []>} : vector<16x4xbf16>, vector<4x384xbf16>, vector<16x384xf32> -> vector<16x384xf32>
    %390 = vector.extract_strided_slice %389 {offsets = [0, 0], sizes = [14, 128], strides = [1, 1]} : vector<16x384xf32> to vector<14x128xf32>
    %391 = arith.addf %384, %390 : vector<14x128xf32>
    %392 = vector.extract_strided_slice %389 {offsets = [1, 128], sizes = [14, 128], strides = [1, 1]} : vector<16x384xf32> to vector<14x128xf32>
    %393 = arith.addf %391, %392 : vector<14x128xf32>
    %394 = vector.extract_strided_slice %389 {offsets = [2, 256], sizes = [14, 128], strides = [1, 1]} : vector<16x384xf32> to vector<14x128xf32>
    %395 = arith.addf %393, %394 : vector<14x128xf32>
    %c0_280 = arith.constant 0 : index
    %c10_281 = arith.constant 10 : index
    %c0_282 = arith.constant 0 : index
    %c0_283 = arith.constant 0 : index
    %396 = vector.load %arg1[%c0_280, %c10_281, %c0_282, %c0_283] : memref<1x16x16x4xbf16, #tpu.memory_space<vmem>>, vector<1x1x16x4xbf16>
    %397 = vector.shape_cast %396 : vector<1x1x16x4xbf16> to vector<16x4xbf16>
    %c1_284 = arith.constant 1 : index
    %c0_285 = arith.constant 0 : index
    %c0_286 = arith.constant 0 : index
    %398 = vector.load %arg2[%c1_284, %c0_285, %c0_286] : memref<3x4x384xbf16, #tpu.memory_space<vmem>>, vector<1x4x384xbf16>
    %399 = vector.shape_cast %398 : vector<1x4x384xbf16> to vector<4x384xbf16>
    %cst_287 = arith.constant dense<0.000000e+00> : vector<16x384xf32>
    %400 = tpu.matmul %397, %399, %cst_287 {dimension_numbers = #tpu.dot_dimension_numbers<[1], [0], [0], [1], [0, 0, 1, 1], [], []>} : vector<16x4xbf16>, vector<4x384xbf16>, vector<16x384xf32> -> vector<16x384xf32>
    %401 = vector.extract_strided_slice %400 {offsets = [0, 0], sizes = [14, 128], strides = [1, 1]} : vector<16x384xf32> to vector<14x128xf32>
    %402 = arith.addf %395, %401 : vector<14x128xf32>
    %403 = vector.extract_strided_slice %400 {offsets = [1, 128], sizes = [14, 128], strides = [1, 1]} : vector<16x384xf32> to vector<14x128xf32>
    %404 = arith.addf %402, %403 : vector<14x128xf32>
    %405 = vector.extract_strided_slice %400 {offsets = [2, 256], sizes = [14, 128], strides = [1, 1]} : vector<16x384xf32> to vector<14x128xf32>
    %406 = arith.addf %404, %405 : vector<14x128xf32>
    %c0_288 = arith.constant 0 : index
    %c11 = arith.constant 11 : index
    %c0_289 = arith.constant 0 : index
    %c0_290 = arith.constant 0 : index
    %407 = vector.load %arg1[%c0_288, %c11, %c0_289, %c0_290] : memref<1x16x16x4xbf16, #tpu.memory_space<vmem>>, vector<1x1x16x4xbf16>
    %408 = vector.shape_cast %407 : vector<1x1x16x4xbf16> to vector<16x4xbf16>
    %c2_291 = arith.constant 2 : index
    %c0_292 = arith.constant 0 : index
    %c0_293 = arith.constant 0 : index
    %409 = vector.load %arg2[%c2_291, %c0_292, %c0_293] : memref<3x4x384xbf16, #tpu.memory_space<vmem>>, vector<1x4x384xbf16>
    %410 = vector.shape_cast %409 : vector<1x4x384xbf16> to vector<4x384xbf16>
    %cst_294 = arith.constant dense<0.000000e+00> : vector<16x384xf32>
    %411 = tpu.matmul %408, %410, %cst_294 {dimension_numbers = #tpu.dot_dimension_numbers<[1], [0], [0], [1], [0, 0, 1, 1], [], []>} : vector<16x4xbf16>, vector<4x384xbf16>, vector<16x384xf32> -> vector<16x384xf32>
    %412 = vector.extract_strided_slice %411 {offsets = [0, 0], sizes = [14, 128], strides = [1, 1]} : vector<16x384xf32> to vector<14x128xf32>
    %413 = arith.addf %406, %412 : vector<14x128xf32>
    %414 = vector.extract_strided_slice %411 {offsets = [1, 128], sizes = [14, 128], strides = [1, 1]} : vector<16x384xf32> to vector<14x128xf32>
    %415 = arith.addf %413, %414 : vector<14x128xf32>
    %416 = vector.extract_strided_slice %411 {offsets = [2, 256], sizes = [14, 128], strides = [1, 1]} : vector<16x384xf32> to vector<14x128xf32>
    %417 = arith.addf %415, %416 : vector<14x128xf32>
    %c0_295 = arith.constant 0 : index
    %c9_296 = arith.constant 9 : index
    %c0_297 = arith.constant 0 : index
    %c0_298 = arith.constant 0 : index
    %418 = vector.load %arg3[%c0_295, %c9_296, %c0_297, %c0_298] : memref<1x14x14x128xf32, #tpu.memory_space<vmem>>, vector<1x1x14x128xf32>
    %419 = vector.shape_cast %418 : vector<1x1x14x128xf32> to vector<14x128xf32>
    %420 = vector.shape_cast %417 : vector<14x128xf32> to vector<1x1x14x128xf32>
    tpu.vector_store %arg3[%c0_295, %c9_296, %c0_297, %c0_298], %420 {strides = array<i32>} : memref<1x14x14x128xf32, #tpu.memory_space<vmem>>, vector<1x1x14x128xf32>,
    %cst_299 = arith.constant dense<0.000000e+00> : vector<1x128xf32>
    %421 = tpu.matmul %3, %417, %cst_299 {dimension_numbers = #tpu.dot_dimension_numbers<[1], [0], [0], [1], [0, 0, 1, 1], [], []>} : vector<1x14xf32>, vector<14x128xf32>, vector<1x128xf32> -> vector<1x128xf32>
    %422 = arith.addf %380, %421 : vector<1x128xf32>
    %423 = arith.mulf %417, %417 : vector<14x128xf32>
    %cst_300 = arith.constant dense<0.000000e+00> : vector<1x128xf32>
    %424 = tpu.matmul %3, %423, %cst_300 {dimension_numbers = #tpu.dot_dimension_numbers<[1], [0], [0], [1], [0, 0, 1, 1], [], []>} : vector<1x14xf32>, vector<14x128xf32>, vector<1x128xf32> -> vector<1x128xf32>
    %425 = arith.addf %383, %424 : vector<1x128xf32>
    %cst_301 = arith.constant 0.000000e+00 : f32
    %426 = vector.broadcast %cst_301 : f32 to vector<14x128xf32>
    %c0_302 = arith.constant 0 : index
    %c10_303 = arith.constant 10 : index
    %c0_304 = arith.constant 0 : index
    %c0_305 = arith.constant 0 : index
    %427 = vector.load %arg1[%c0_302, %c10_303, %c0_304, %c0_305] : memref<1x16x16x4xbf16, #tpu.memory_space<vmem>>, vector<1x1x16x4xbf16>
    %428 = vector.shape_cast %427 : vector<1x1x16x4xbf16> to vector<16x4xbf16>
    %c0_306 = arith.constant 0 : index
    %c0_307 = arith.constant 0 : index
    %c0_308 = arith.constant 0 : index
    %429 = vector.load %arg2[%c0_306, %c0_307, %c0_308] : memref<3x4x384xbf16, #tpu.memory_space<vmem>>, vector<1x4x384xbf16>
    %430 = vector.shape_cast %429 : vector<1x4x384xbf16> to vector<4x384xbf16>
    %cst_309 = arith.constant dense<0.000000e+00> : vector<16x384xf32>
    %431 = tpu.matmul %428, %430, %cst_309 {dimension_numbers = #tpu.dot_dimension_numbers<[1], [0], [0], [1], [0, 0, 1, 1], [], []>} : vector<16x4xbf16>, vector<4x384xbf16>, vector<16x384xf32> -> vector<16x384xf32>
    %432 = vector.extract_strided_slice %431 {offsets = [0, 0], sizes = [14, 128], strides = [1, 1]} : vector<16x384xf32> to vector<14x128xf32>
    %433 = arith.addf %426, %432 : vector<14x128xf32>
    %434 = vector.extract_strided_slice %431 {offsets = [1, 128], sizes = [14, 128], strides = [1, 1]} : vector<16x384xf32> to vector<14x128xf32>
    %435 = arith.addf %433, %434 : vector<14x128xf32>
    %436 = vector.extract_strided_slice %431 {offsets = [2, 256], sizes = [14, 128], strides = [1, 1]} : vector<16x384xf32> to vector<14x128xf32>
    %437 = arith.addf %435, %436 : vector<14x128xf32>
    %c0_310 = arith.constant 0 : index
    %c11_311 = arith.constant 11 : index
    %c0_312 = arith.constant 0 : index
    %c0_313 = arith.constant 0 : index
    %438 = vector.load %arg1[%c0_310, %c11_311, %c0_312, %c0_313] : memref<1x16x16x4xbf16, #tpu.memory_space<vmem>>, vector<1x1x16x4xbf16>
    %439 = vector.shape_cast %438 : vector<1x1x16x4xbf16> to vector<16x4xbf16>
    %c1_314 = arith.constant 1 : index
    %c0_315 = arith.constant 0 : index
    %c0_316 = arith.constant 0 : index
    %440 = vector.load %arg2[%c1_314, %c0_315, %c0_316] : memref<3x4x384xbf16, #tpu.memory_space<vmem>>, vector<1x4x384xbf16>
    %441 = vector.shape_cast %440 : vector<1x4x384xbf16> to vector<4x384xbf16>
    %cst_317 = arith.constant dense<0.000000e+00> : vector<16x384xf32>
    %442 = tpu.matmul %439, %441, %cst_317 {dimension_numbers = #tpu.dot_dimension_numbers<[1], [0], [0], [1], [0, 0, 1, 1], [], []>} : vector<16x4xbf16>, vector<4x384xbf16>, vector<16x384xf32> -> vector<16x384xf32>
    %443 = vector.extract_strided_slice %442 {offsets = [0, 0], sizes = [14, 128], strides = [1, 1]} : vector<16x384xf32> to vector<14x128xf32>
    %444 = arith.addf %437, %443 : vector<14x128xf32>
    %445 = vector.extract_strided_slice %442 {offsets = [1, 128], sizes = [14, 128], strides = [1, 1]} : vector<16x384xf32> to vector<14x128xf32>
    %446 = arith.addf %444, %445 : vector<14x128xf32>
    %447 = vector.extract_strided_slice %442 {offsets = [2, 256], sizes = [14, 128], strides = [1, 1]} : vector<16x384xf32> to vector<14x128xf32>
    %448 = arith.addf %446, %447 : vector<14x128xf32>
    %c0_318 = arith.constant 0 : index
    %c12 = arith.constant 12 : index
    %c0_319 = arith.constant 0 : index
    %c0_320 = arith.constant 0 : index
    %449 = vector.load %arg1[%c0_318, %c12, %c0_319, %c0_320] : memref<1x16x16x4xbf16, #tpu.memory_space<vmem>>, vector<1x1x16x4xbf16>
    %450 = vector.shape_cast %449 : vector<1x1x16x4xbf16> to vector<16x4xbf16>
    %c2_321 = arith.constant 2 : index
    %c0_322 = arith.constant 0 : index
    %c0_323 = arith.constant 0 : index
    %451 = vector.load %arg2[%c2_321, %c0_322, %c0_323] : memref<3x4x384xbf16, #tpu.memory_space<vmem>>, vector<1x4x384xbf16>
    %452 = vector.shape_cast %451 : vector<1x4x384xbf16> to vector<4x384xbf16>
    %cst_324 = arith.constant dense<0.000000e+00> : vector<16x384xf32>
    %453 = tpu.matmul %450, %452, %cst_324 {dimension_numbers = #tpu.dot_dimension_numbers<[1], [0], [0], [1], [0, 0, 1, 1], [], []>} : vector<16x4xbf16>, vector<4x384xbf16>, vector<16x384xf32> -> vector<16x384xf32>
    %454 = vector.extract_strided_slice %453 {offsets = [0, 0], sizes = [14, 128], strides = [1, 1]} : vector<16x384xf32> to vector<14x128xf32>
    %455 = arith.addf %448, %454 : vector<14x128xf32>
    %456 = vector.extract_strided_slice %453 {offsets = [1, 128], sizes = [14, 128], strides = [1, 1]} : vector<16x384xf32> to vector<14x128xf32>
    %457 = arith.addf %455, %456 : vector<14x128xf32>
    %458 = vector.extract_strided_slice %453 {offsets = [2, 256], sizes = [14, 128], strides = [1, 1]} : vector<16x384xf32> to vector<14x128xf32>
    %459 = arith.addf %457, %458 : vector<14x128xf32>
    %c0_325 = arith.constant 0 : index
    %c10_326 = arith.constant 10 : index
    %c0_327 = arith.constant 0 : index
    %c0_328 = arith.constant 0 : index
    %460 = vector.load %arg3[%c0_325, %c10_326, %c0_327, %c0_328] : memref<1x14x14x128xf32, #tpu.memory_space<vmem>>, vector<1x1x14x128xf32>
    %461 = vector.shape_cast %460 : vector<1x1x14x128xf32> to vector<14x128xf32>
    %462 = vector.shape_cast %459 : vector<14x128xf32> to vector<1x1x14x128xf32>
    tpu.vector_store %arg3[%c0_325, %c10_326, %c0_327, %c0_328], %462 {strides = array<i32>} : memref<1x14x14x128xf32, #tpu.memory_space<vmem>>, vector<1x1x14x128xf32>,
    %cst_329 = arith.constant dense<0.000000e+00> : vector<1x128xf32>
    %463 = tpu.matmul %3, %459, %cst_329 {dimension_numbers = #tpu.dot_dimension_numbers<[1], [0], [0], [1], [0, 0, 1, 1], [], []>} : vector<1x14xf32>, vector<14x128xf32>, vector<1x128xf32> -> vector<1x128xf32>
    %464 = arith.addf %422, %463 : vector<1x128xf32>
    %465 = arith.mulf %459, %459 : vector<14x128xf32>
    %cst_330 = arith.constant dense<0.000000e+00> : vector<1x128xf32>
    %466 = tpu.matmul %3, %465, %cst_330 {dimension_numbers = #tpu.dot_dimension_numbers<[1], [0], [0], [1], [0, 0, 1, 1], [], []>} : vector<1x14xf32>, vector<14x128xf32>, vector<1x128xf32> -> vector<1x128xf32>
    %467 = arith.addf %425, %466 : vector<1x128xf32>
    %cst_331 = arith.constant 0.000000e+00 : f32
    %468 = vector.broadcast %cst_331 : f32 to vector<14x128xf32>
    %c0_332 = arith.constant 0 : index
    %c11_333 = arith.constant 11 : index
    %c0_334 = arith.constant 0 : index
    %c0_335 = arith.constant 0 : index
    %469 = vector.load %arg1[%c0_332, %c11_333, %c0_334, %c0_335] : memref<1x16x16x4xbf16, #tpu.memory_space<vmem>>, vector<1x1x16x4xbf16>
    %470 = vector.shape_cast %469 : vector<1x1x16x4xbf16> to vector<16x4xbf16>
    %c0_336 = arith.constant 0 : index
    %c0_337 = arith.constant 0 : index
    %c0_338 = arith.constant 0 : index
    %471 = vector.load %arg2[%c0_336, %c0_337, %c0_338] : memref<3x4x384xbf16, #tpu.memory_space<vmem>>, vector<1x4x384xbf16>
    %472 = vector.shape_cast %471 : vector<1x4x384xbf16> to vector<4x384xbf16>
    %cst_339 = arith.constant dense<0.000000e+00> : vector<16x384xf32>
    %473 = tpu.matmul %470, %472, %cst_339 {dimension_numbers = #tpu.dot_dimension_numbers<[1], [0], [0], [1], [0, 0, 1, 1], [], []>} : vector<16x4xbf16>, vector<4x384xbf16>, vector<16x384xf32> -> vector<16x384xf32>
    %474 = vector.extract_strided_slice %473 {offsets = [0, 0], sizes = [14, 128], strides = [1, 1]} : vector<16x384xf32> to vector<14x128xf32>
    %475 = arith.addf %468, %474 : vector<14x128xf32>
    %476 = vector.extract_strided_slice %473 {offsets = [1, 128], sizes = [14, 128], strides = [1, 1]} : vector<16x384xf32> to vector<14x128xf32>
    %477 = arith.addf %475, %476 : vector<14x128xf32>
    %478 = vector.extract_strided_slice %473 {offsets = [2, 256], sizes = [14, 128], strides = [1, 1]} : vector<16x384xf32> to vector<14x128xf32>
    %479 = arith.addf %477, %478 : vector<14x128xf32>
    %c0_340 = arith.constant 0 : index
    %c12_341 = arith.constant 12 : index
    %c0_342 = arith.constant 0 : index
    %c0_343 = arith.constant 0 : index
    %480 = vector.load %arg1[%c0_340, %c12_341, %c0_342, %c0_343] : memref<1x16x16x4xbf16, #tpu.memory_space<vmem>>, vector<1x1x16x4xbf16>
    %481 = vector.shape_cast %480 : vector<1x1x16x4xbf16> to vector<16x4xbf16>
    %c1_344 = arith.constant 1 : index
    %c0_345 = arith.constant 0 : index
    %c0_346 = arith.constant 0 : index
    %482 = vector.load %arg2[%c1_344, %c0_345, %c0_346] : memref<3x4x384xbf16, #tpu.memory_space<vmem>>, vector<1x4x384xbf16>
    %483 = vector.shape_cast %482 : vector<1x4x384xbf16> to vector<4x384xbf16>
    %cst_347 = arith.constant dense<0.000000e+00> : vector<16x384xf32>
    %484 = tpu.matmul %481, %483, %cst_347 {dimension_numbers = #tpu.dot_dimension_numbers<[1], [0], [0], [1], [0, 0, 1, 1], [], []>} : vector<16x4xbf16>, vector<4x384xbf16>, vector<16x384xf32> -> vector<16x384xf32>
    %485 = vector.extract_strided_slice %484 {offsets = [0, 0], sizes = [14, 128], strides = [1, 1]} : vector<16x384xf32> to vector<14x128xf32>
    %486 = arith.addf %479, %485 : vector<14x128xf32>
    %487 = vector.extract_strided_slice %484 {offsets = [1, 128], sizes = [14, 128], strides = [1, 1]} : vector<16x384xf32> to vector<14x128xf32>
    %488 = arith.addf %486, %487 : vector<14x128xf32>
    %489 = vector.extract_strided_slice %484 {offsets = [2, 256], sizes = [14, 128], strides = [1, 1]} : vector<16x384xf32> to vector<14x128xf32>
    %490 = arith.addf %488, %489 : vector<14x128xf32>
    %c0_348 = arith.constant 0 : index
    %c13 = arith.constant 13 : index
    %c0_349 = arith.constant 0 : index
    %c0_350 = arith.constant 0 : index
    %491 = vector.load %arg1[%c0_348, %c13, %c0_349, %c0_350] : memref<1x16x16x4xbf16, #tpu.memory_space<vmem>>, vector<1x1x16x4xbf16>
    %492 = vector.shape_cast %491 : vector<1x1x16x4xbf16> to vector<16x4xbf16>
    %c2_351 = arith.constant 2 : index
    %c0_352 = arith.constant 0 : index
    %c0_353 = arith.constant 0 : index
    %493 = vector.load %arg2[%c2_351, %c0_352, %c0_353] : memref<3x4x384xbf16, #tpu.memory_space<vmem>>, vector<1x4x384xbf16>
    %494 = vector.shape_cast %493 : vector<1x4x384xbf16> to vector<4x384xbf16>
    %cst_354 = arith.constant dense<0.000000e+00> : vector<16x384xf32>
    %495 = tpu.matmul %492, %494, %cst_354 {dimension_numbers = #tpu.dot_dimension_numbers<[1], [0], [0], [1], [0, 0, 1, 1], [], []>} : vector<16x4xbf16>, vector<4x384xbf16>, vector<16x384xf32> -> vector<16x384xf32>
    %496 = vector.extract_strided_slice %495 {offsets = [0, 0], sizes = [14, 128], strides = [1, 1]} : vector<16x384xf32> to vector<14x128xf32>
    %497 = arith.addf %490, %496 : vector<14x128xf32>
    %498 = vector.extract_strided_slice %495 {offsets = [1, 128], sizes = [14, 128], strides = [1, 1]} : vector<16x384xf32> to vector<14x128xf32>
    %499 = arith.addf %497, %498 : vector<14x128xf32>
    %500 = vector.extract_strided_slice %495 {offsets = [2, 256], sizes = [14, 128], strides = [1, 1]} : vector<16x384xf32> to vector<14x128xf32>
    %501 = arith.addf %499, %500 : vector<14x128xf32>
    %c0_355 = arith.constant 0 : index
    %c11_356 = arith.constant 11 : index
    %c0_357 = arith.constant 0 : index
    %c0_358 = arith.constant 0 : index
    %502 = vector.load %arg3[%c0_355, %c11_356, %c0_357, %c0_358] : memref<1x14x14x128xf32, #tpu.memory_space<vmem>>, vector<1x1x14x128xf32>
    %503 = vector.shape_cast %502 : vector<1x1x14x128xf32> to vector<14x128xf32>
    %504 = vector.shape_cast %501 : vector<14x128xf32> to vector<1x1x14x128xf32>
    tpu.vector_store %arg3[%c0_355, %c11_356, %c0_357, %c0_358], %504 {strides = array<i32>} : memref<1x14x14x128xf32, #tpu.memory_space<vmem>>, vector<1x1x14x128xf32>,
    %cst_359 = arith.constant dense<0.000000e+00> : vector<1x128xf32>
    %505 = tpu.matmul %3, %501, %cst_359 {dimension_numbers = #tpu.dot_dimension_numbers<[1], [0], [0], [1], [0, 0, 1, 1], [], []>} : vector<1x14xf32>, vector<14x128xf32>, vector<1x128xf32> -> vector<1x128xf32>
    %506 = arith.addf %464, %505 : vector<1x128xf32>
    %507 = arith.mulf %501, %501 : vector<14x128xf32>
    %cst_360 = arith.constant dense<0.000000e+00> : vector<1x128xf32>
    %508 = tpu.matmul %3, %507, %cst_360 {dimension_numbers = #tpu.dot_dimension_numbers<[1], [0], [0], [1], [0, 0, 1, 1], [], []>} : vector<1x14xf32>, vector<14x128xf32>, vector<1x128xf32> -> vector<1x128xf32>
    %509 = arith.addf %467, %508 : vector<1x128xf32>
    %cst_361 = arith.constant 0.000000e+00 : f32
    %510 = vector.broadcast %cst_361 : f32 to vector<14x128xf32>
    %c0_362 = arith.constant 0 : index
    %c12_363 = arith.constant 12 : index
    %c0_364 = arith.constant 0 : index
    %c0_365 = arith.constant 0 : index
    %511 = vector.load %arg1[%c0_362, %c12_363, %c0_364, %c0_365] : memref<1x16x16x4xbf16, #tpu.memory_space<vmem>>, vector<1x1x16x4xbf16>
    %512 = vector.shape_cast %511 : vector<1x1x16x4xbf16> to vector<16x4xbf16>
    %c0_366 = arith.constant 0 : index
    %c0_367 = arith.constant 0 : index
    %c0_368 = arith.constant 0 : index
    %513 = vector.load %arg2[%c0_366, %c0_367, %c0_368] : memref<3x4x384xbf16, #tpu.memory_space<vmem>>, vector<1x4x384xbf16>
    %514 = vector.shape_cast %513 : vector<1x4x384xbf16> to vector<4x384xbf16>
    %cst_369 = arith.constant dense<0.000000e+00> : vector<16x384xf32>
    %515 = tpu.matmul %512, %514, %cst_369 {dimension_numbers = #tpu.dot_dimension_numbers<[1], [0], [0], [1], [0, 0, 1, 1], [], []>} : vector<16x4xbf16>, vector<4x384xbf16>, vector<16x384xf32> -> vector<16x384xf32>
    %516 = vector.extract_strided_slice %515 {offsets = [0, 0], sizes = [14, 128], strides = [1, 1]} : vector<16x384xf32> to vector<14x128xf32>
    %517 = arith.addf %510, %516 : vector<14x128xf32>
    %518 = vector.extract_strided_slice %515 {offsets = [1, 128], sizes = [14, 128], strides = [1, 1]} : vector<16x384xf32> to vector<14x128xf32>
    %519 = arith.addf %517, %518 : vector<14x128xf32>
    %520 = vector.extract_strided_slice %515 {offsets = [2, 256], sizes = [14, 128], strides = [1, 1]} : vector<16x384xf32> to vector<14x128xf32>
    %521 = arith.addf %519, %520 : vector<14x128xf32>
    %c0_370 = arith.constant 0 : index
    %c13_371 = arith.constant 13 : index
    %c0_372 = arith.constant 0 : index
    %c0_373 = arith.constant 0 : index
    %522 = vector.load %arg1[%c0_370, %c13_371, %c0_372, %c0_373] : memref<1x16x16x4xbf16, #tpu.memory_space<vmem>>, vector<1x1x16x4xbf16>
    %523 = vector.shape_cast %522 : vector<1x1x16x4xbf16> to vector<16x4xbf16>
    %c1_374 = arith.constant 1 : index
    %c0_375 = arith.constant 0 : index
    %c0_376 = arith.constant 0 : index
    %524 = vector.load %arg2[%c1_374, %c0_375, %c0_376] : memref<3x4x384xbf16, #tpu.memory_space<vmem>>, vector<1x4x384xbf16>
    %525 = vector.shape_cast %524 : vector<1x4x384xbf16> to vector<4x384xbf16>
    %cst_377 = arith.constant dense<0.000000e+00> : vector<16x384xf32>
    %526 = tpu.matmul %523, %525, %cst_377 {dimension_numbers = #tpu.dot_dimension_numbers<[1], [0], [0], [1], [0, 0, 1, 1], [], []>} : vector<16x4xbf16>, vector<4x384xbf16>, vector<16x384xf32> -> vector<16x384xf32>
    %527 = vector.extract_strided_slice %526 {offsets = [0, 0], sizes = [14, 128], strides = [1, 1]} : vector<16x384xf32> to vector<14x128xf32>
    %528 = arith.addf %521, %527 : vector<14x128xf32>
    %529 = vector.extract_strided_slice %526 {offsets = [1, 128], sizes = [14, 128], strides = [1, 1]} : vector<16x384xf32> to vector<14x128xf32>
    %530 = arith.addf %528, %529 : vector<14x128xf32>
    %531 = vector.extract_strided_slice %526 {offsets = [2, 256], sizes = [14, 128], strides = [1, 1]} : vector<16x384xf32> to vector<14x128xf32>
    %532 = arith.addf %530, %531 : vector<14x128xf32>
    %c0_378 = arith.constant 0 : index
    %c14 = arith.constant 14 : index
    %c0_379 = arith.constant 0 : index
    %c0_380 = arith.constant 0 : index
    %533 = vector.load %arg1[%c0_378, %c14, %c0_379, %c0_380] : memref<1x16x16x4xbf16, #tpu.memory_space<vmem>>, vector<1x1x16x4xbf16>
    %534 = vector.shape_cast %533 : vector<1x1x16x4xbf16> to vector<16x4xbf16>
    %c2_381 = arith.constant 2 : index
    %c0_382 = arith.constant 0 : index
    %c0_383 = arith.constant 0 : index
    %535 = vector.load %arg2[%c2_381, %c0_382, %c0_383] : memref<3x4x384xbf16, #tpu.memory_space<vmem>>, vector<1x4x384xbf16>
    %536 = vector.shape_cast %535 : vector<1x4x384xbf16> to vector<4x384xbf16>
    %cst_384 = arith.constant dense<0.000000e+00> : vector<16x384xf32>
    %537 = tpu.matmul %534, %536, %cst_384 {dimension_numbers = #tpu.dot_dimension_numbers<[1], [0], [0], [1], [0, 0, 1, 1], [], []>} : vector<16x4xbf16>, vector<4x384xbf16>, vector<16x384xf32> -> vector<16x384xf32>
    %538 = vector.extract_strided_slice %537 {offsets = [0, 0], sizes = [14, 128], strides = [1, 1]} : vector<16x384xf32> to vector<14x128xf32>
    %539 = arith.addf %532, %538 : vector<14x128xf32>
    %540 = vector.extract_strided_slice %537 {offsets = [1, 128], sizes = [14, 128], strides = [1, 1]} : vector<16x384xf32> to vector<14x128xf32>
    %541 = arith.addf %539, %540 : vector<14x128xf32>
    %542 = vector.extract_strided_slice %537 {offsets = [2, 256], sizes = [14, 128], strides = [1, 1]} : vector<16x384xf32> to vector<14x128xf32>
    %543 = arith.addf %541, %542 : vector<14x128xf32>
    %c0_385 = arith.constant 0 : index
    %c12_386 = arith.constant 12 : index
    %c0_387 = arith.constant 0 : index
    %c0_388 = arith.constant 0 : index
    %544 = vector.load %arg3[%c0_385, %c12_386, %c0_387, %c0_388] : memref<1x14x14x128xf32, #tpu.memory_space<vmem>>, vector<1x1x14x128xf32>
    %545 = vector.shape_cast %544 : vector<1x1x14x128xf32> to vector<14x128xf32>
    %546 = vector.shape_cast %543 : vector<14x128xf32> to vector<1x1x14x128xf32>
    tpu.vector_store %arg3[%c0_385, %c12_386, %c0_387, %c0_388], %546 {strides = array<i32>} : memref<1x14x14x128xf32, #tpu.memory_space<vmem>>, vector<1x1x14x128xf32>,
    %cst_389 = arith.constant dense<0.000000e+00> : vector<1x128xf32>
    %547 = tpu.matmul %3, %543, %cst_389 {dimension_numbers = #tpu.dot_dimension_numbers<[1], [0], [0], [1], [0, 0, 1, 1], [], []>} : vector<1x14xf32>, vector<14x128xf32>, vector<1x128xf32> -> vector<1x128xf32>
    %548 = arith.addf %506, %547 : vector<1x128xf32>
    %549 = arith.mulf %543, %543 : vector<14x128xf32>
    %cst_390 = arith.constant dense<0.000000e+00> : vector<1x128xf32>
    %550 = tpu.matmul %3, %549, %cst_390 {dimension_numbers = #tpu.dot_dimension_numbers<[1], [0], [0], [1], [0, 0, 1, 1], [], []>} : vector<1x14xf32>, vector<14x128xf32>, vector<1x128xf32> -> vector<1x128xf32>
    %551 = arith.addf %509, %550 : vector<1x128xf32>
    %cst_391 = arith.constant 0.000000e+00 : f32
    %552 = vector.broadcast %cst_391 : f32 to vector<14x128xf32>
    %c0_392 = arith.constant 0 : index
    %c13_393 = arith.constant 13 : index
    %c0_394 = arith.constant 0 : index
    %c0_395 = arith.constant 0 : index
    %553 = vector.load %arg1[%c0_392, %c13_393, %c0_394, %c0_395] : memref<1x16x16x4xbf16, #tpu.memory_space<vmem>>, vector<1x1x16x4xbf16>
    %554 = vector.shape_cast %553 : vector<1x1x16x4xbf16> to vector<16x4xbf16>
    %c0_396 = arith.constant 0 : index
    %c0_397 = arith.constant 0 : index
    %c0_398 = arith.constant 0 : index
    %555 = vector.load %arg2[%c0_396, %c0_397, %c0_398] : memref<3x4x384xbf16, #tpu.memory_space<vmem>>, vector<1x4x384xbf16>
    %556 = vector.shape_cast %555 : vector<1x4x384xbf16> to vector<4x384xbf16>
    %cst_399 = arith.constant dense<0.000000e+00> : vector<16x384xf32>
    %557 = tpu.matmul %554, %556, %cst_399 {dimension_numbers = #tpu.dot_dimension_numbers<[1], [0], [0], [1], [0, 0, 1, 1], [], []>} : vector<16x4xbf16>, vector<4x384xbf16>, vector<16x384xf32> -> vector<16x384xf32>
    %558 = vector.extract_strided_slice %557 {offsets = [0, 0], sizes = [14, 128], strides = [1, 1]} : vector<16x384xf32> to vector<14x128xf32>
    %559 = arith.addf %552, %558 : vector<14x128xf32>
    %560 = vector.extract_strided_slice %557 {offsets = [1, 128], sizes = [14, 128], strides = [1, 1]} : vector<16x384xf32> to vector<14x128xf32>
    %561 = arith.addf %559, %560 : vector<14x128xf32>
    %562 = vector.extract_strided_slice %557 {offsets = [2, 256], sizes = [14, 128], strides = [1, 1]} : vector<16x384xf32> to vector<14x128xf32>
    %563 = arith.addf %561, %562 : vector<14x128xf32>
    %c0_400 = arith.constant 0 : index
    %c14_401 = arith.constant 14 : index
    %c0_402 = arith.constant 0 : index
    %c0_403 = arith.constant 0 : index
    %564 = vector.load %arg1[%c0_400, %c14_401, %c0_402, %c0_403] : memref<1x16x16x4xbf16, #tpu.memory_space<vmem>>, vector<1x1x16x4xbf16>
    %565 = vector.shape_cast %564 : vector<1x1x16x4xbf16> to vector<16x4xbf16>
    %c1_404 = arith.constant 1 : index
    %c0_405 = arith.constant 0 : index
    %c0_406 = arith.constant 0 : index
    %566 = vector.load %arg2[%c1_404, %c0_405, %c0_406] : memref<3x4x384xbf16, #tpu.memory_space<vmem>>, vector<1x4x384xbf16>
    %567 = vector.shape_cast %566 : vector<1x4x384xbf16> to vector<4x384xbf16>
    %cst_407 = arith.constant dense<0.000000e+00> : vector<16x384xf32>
    %568 = tpu.matmul %565, %567, %cst_407 {dimension_numbers = #tpu.dot_dimension_numbers<[1], [0], [0], [1], [0, 0, 1, 1], [], []>} : vector<16x4xbf16>, vector<4x384xbf16>, vector<16x384xf32> -> vector<16x384xf32>
    %569 = vector.extract_strided_slice %568 {offsets = [0, 0], sizes = [14, 128], strides = [1, 1]} : vector<16x384xf32> to vector<14x128xf32>
    %570 = arith.addf %563, %569 : vector<14x128xf32>
    %571 = vector.extract_strided_slice %568 {offsets = [1, 128], sizes = [14, 128], strides = [1, 1]} : vector<16x384xf32> to vector<14x128xf32>
    %572 = arith.addf %570, %571 : vector<14x128xf32>
    %573 = vector.extract_strided_slice %568 {offsets = [2, 256], sizes = [14, 128], strides = [1, 1]} : vector<16x384xf32> to vector<14x128xf32>
    %574 = arith.addf %572, %573 : vector<14x128xf32>
    %c0_408 = arith.constant 0 : index
    %c15 = arith.constant 15 : index
    %c0_409 = arith.constant 0 : index
    %c0_410 = arith.constant 0 : index
    %575 = vector.load %arg1[%c0_408, %c15, %c0_409, %c0_410] : memref<1x16x16x4xbf16, #tpu.memory_space<vmem>>, vector<1x1x16x4xbf16>
    %576 = vector.shape_cast %575 : vector<1x1x16x4xbf16> to vector<16x4xbf16>
    %c2_411 = arith.constant 2 : index
    %c0_412 = arith.constant 0 : index
    %c0_413 = arith.constant 0 : index
    %577 = vector.load %arg2[%c2_411, %c0_412, %c0_413] : memref<3x4x384xbf16, #tpu.memory_space<vmem>>, vector<1x4x384xbf16>
    %578 = vector.shape_cast %577 : vector<1x4x384xbf16> to vector<4x384xbf16>
    %cst_414 = arith.constant dense<0.000000e+00> : vector<16x384xf32>
    %579 = tpu.matmul %576, %578, %cst_414 {dimension_numbers = #tpu.dot_dimension_numbers<[1], [0], [0], [1], [0, 0, 1, 1], [], []>} : vector<16x4xbf16>, vector<4x384xbf16>, vector<16x384xf32> -> vector<16x384xf32>
    %580 = vector.extract_strided_slice %579 {offsets = [0, 0], sizes = [14, 128], strides = [1, 1]} : vector<16x384xf32> to vector<14x128xf32>
    %581 = arith.addf %574, %580 : vector<14x128xf32>
    %582 = vector.extract_strided_slice %579 {offsets = [1, 128], sizes = [14, 128], strides = [1, 1]} : vector<16x384xf32> to vector<14x128xf32>
    %583 = arith.addf %581, %582 : vector<14x128xf32>
    %584 = vector.extract_strided_slice %579 {offsets = [2, 256], sizes = [14, 128], strides = [1, 1]} : vector<16x384xf32> to vector<14x128xf32>
    %585 = arith.addf %583, %584 : vector<14x128xf32>
    %c0_415 = arith.constant 0 : index
    %c13_416 = arith.constant 13 : index
    %c0_417 = arith.constant 0 : index
    %c0_418 = arith.constant 0 : index
    %586 = vector.load %arg3[%c0_415, %c13_416, %c0_417, %c0_418] : memref<1x14x14x128xf32, #tpu.memory_space<vmem>>, vector<1x1x14x128xf32>
    %587 = vector.shape_cast %586 : vector<1x1x14x128xf32> to vector<14x128xf32>
    %588 = vector.shape_cast %585 : vector<14x128xf32> to vector<1x1x14x128xf32>
    tpu.vector_store %arg3[%c0_415, %c13_416, %c0_417, %c0_418], %588 {strides = array<i32>} : memref<1x14x14x128xf32, #tpu.memory_space<vmem>>, vector<1x1x14x128xf32>,
    %cst_419 = arith.constant dense<0.000000e+00> : vector<1x128xf32>
    %589 = tpu.matmul %3, %585, %cst_419 {dimension_numbers = #tpu.dot_dimension_numbers<[1], [0], [0], [1], [0, 0, 1, 1], [], []>} : vector<1x14xf32>, vector<14x128xf32>, vector<1x128xf32> -> vector<1x128xf32>
    %590 = arith.addf %548, %589 : vector<1x128xf32>
    %591 = arith.mulf %585, %585 : vector<14x128xf32>
    %cst_420 = arith.constant dense<0.000000e+00> : vector<1x128xf32>
    %592 = tpu.matmul %3, %591, %cst_420 {dimension_numbers = #tpu.dot_dimension_numbers<[1], [0], [0], [1], [0, 0, 1, 1], [], []>} : vector<1x14xf32>, vector<14x128xf32>, vector<1x128xf32> -> vector<1x128xf32>
    %593 = arith.addf %551, %592 : vector<1x128xf32>
    %c0_421 = arith.constant 0 : index
    %c0_422 = arith.constant 0 : index
    %594 = vector.load %arg4[%c0_421, %c0_422] : memref<1x128xf32, #tpu.memory_space<vmem>>, vector<1x128xf32>
    %595 = arith.addf %594, %590 : vector<1x128xf32>
    %c0_423 = arith.constant 0 : index
    %c0_424 = arith.constant 0 : index
    %596 = vector.load %arg4[%c0_423, %c0_424] : memref<1x128xf32, #tpu.memory_space<vmem>>, vector<1x128xf32>
    tpu.vector_store %arg4[%c0_423, %c0_424], %595 {strides = array<i32>} : memref<1x128xf32, #tpu.memory_space<vmem>>, vector<1x128xf32>,
    %c0_425 = arith.constant 0 : index
    %c0_426 = arith.constant 0 : index
    %597 = vector.load %arg5[%c0_425, %c0_426] : memref<1x128xf32, #tpu.memory_space<vmem>>, vector<1x128xf32>
    %598 = arith.addf %597, %593 : vector<1x128xf32>
    %c0_427 = arith.constant 0 : index
    %c0_428 = arith.constant 0 : index
    %599 = vector.load %arg5[%c0_427, %c0_428] : memref<1x128xf32, #tpu.memory_space<vmem>>, vector<1x128xf32>
    tpu.vector_store %arg5[%c0_427, %c0_428], %598 {strides = array<i32>} : memref<1x128xf32, #tpu.memory_space<vmem>>, vector<1x128xf32>,
    return
  }
  func.func @transform_0(%arg0: i32) -> (i32, i32, i32, i32) {
    %c0_i32 = arith.constant 0 : i32
    %c0_i32_0 = arith.constant 0 : i32
    %c0_i32_1 = arith.constant 0 : i32
    %c0_i32_2 = arith.constant 0 : i32
    return %arg0, %c0_i32, %c0_i32_0, %c0_i32_1 : i32, i32, i32, i32
  }
  func.func @transform_1(%arg0: i32) -> (i32, i32, i32) {
    %c0_i32 = arith.constant 0 : i32
    %c0_i32_0 = arith.constant 0 : i32
    %c0_i32_1 = arith.constant 0 : i32
    %c0_i32_2 = arith.constant 0 : i32
    return %c0_i32, %c0_i32_0, %c0_i32_1 : i32, i32, i32
  }
  func.func @transform_2(%arg0: i32) -> (i32, i32, i32, i32) {
    %c0_i32 = arith.constant 0 : i32
    %c0_i32_0 = arith.constant 0 : i32
    %c0_i32_1 = arith.constant 0 : i32
    %c0_i32_2 = arith.constant 0 : i32
    return %arg0, %c0_i32, %c0_i32_0, %c0_i32_1 : i32, i32, i32, i32
  }
  func.func @transform_3(%arg0: i32) -> (i32, i32) {
    %c0_i32 = arith.constant 0 : i32
    %c0_i32_0 = arith.constant 0 : i32
    %c0_i32_1 = arith.constant 0 : i32
    return %c0_i32, %c0_i32_0 : i32, i32
  }
  func.func @transform_4(%arg0: i32) -> (i32, i32) {
    %c0_i32 = arith.constant 0 : i32
    %c0_i32_0 = arith.constant 0 : i32
    %c0_i32_1 = arith.constant 0 : i32
    return %c0_i32, %c0_i32_0 : i32, i32
  }
}

</mosaic_0001>

<bundles_post_ra>
// kernel: def_conv_net_block.3
= control target key start
LH: loop header
LB: loop body
LE: loop exit
PB: predicated region body
PF: predicated region fallthrough
CT: control target
= control target key end

     0   :  { %s652_s0 = inlined_call_operand.vmem [shape: f32[392,128], index: 0, kind: input, shape index: {}]   ;;  %s653_s1 = inlined_call_operand.vmem [shape: f32[1,128], index: 1, kind: input, shape index: {}]   ;;  %s654_s2 = inlined_call_operand.vmem [shape: f32[1,128], index: 2, kind: input, shape index: {}]   ;;  %s655_s3 = inlined_call_operand.vmem [shape: f32[392,128], index: 3, kind: output, shape index: {}]  }
   0x1   :  { %v14_v0 = vld [vmem:[%s652_s0] sm:$0xff]  ;;  %v15_v4 = vld [vmem:[%s652_s0 + $0x8] sm:$0xff]  ;;  %v16_v5 = vld [vmem:[%s652_s0 + $0x10] sm:$0xff] }
   0x2   :  { %v256_v1 = vld [vmem:[%s653_s1] ss:$0 sm:$0xff]  ;;  %v17_v6 = vld [vmem:[%s652_s0 + $0x18] sm:$0xff]  ;;  %v19_v11 = vld [vmem:[%s652_s0 + $0x28] sm:$0xff] }
   0x3   :  { %v261_v2 = vld [vmem:[%s654_s2] ss:$0 sm:$0xff]  ;;  %v70_v3 = vmul.f32 %v256_v1, %v14_v0  ;;  %v71_v7 = vmul.f32 %v256_v1, %v15_v4  ;;  %v72_v8 = vmul.f32 %v256_v1, %v16_v5  ;;  %v73_v9 = vmul.f32 %v256_v1, %v17_v6  ;;  %v20_v12 = vld [vmem:[%s652_s0 + $0x30] sm:$0xff]  ;;  %v21_v17 = vld [vmem:[%s652_s0 + $0x38] sm:$0xff] }
   0x4   :  { %v18_v10 = vld [vmem:[%s652_s0 + $0x20] sm:$0xff]  ;;  %v75_v15 = vmul.f32 %v256_v1, %v19_v11  ;;  %v76_v16 = vmul.f32 %v256_v1, %v20_v12  ;;  %v23_v19 = vld [vmem:[%s652_s0 + $0x48] sm:$0xff]  ;;  %v77_v23 = vmul.f32 %v256_v1, %v21_v17  ;;  %v24_v24 = vld [vmem:[%s652_s0 + $0x50] sm:$0xff] }
   0x5   :  { %v126_v13 = vadd.f32 %v261_v2, %v70_v3  ;;  %v74_v14 = vmul.f32 %v256_v1, %v18_v10  ;;  %v22_v18 = vld [vmem:[%s652_s0 + $0x40] sm:$0xff]  ;;  %v127_v20 = vadd.f32 %v261_v2, %v71_v7  ;;  %v128_v21 = vadd.f32 %v261_v2, %v72_v8  ;;  %v25_v25 = vld [vmem:[%s652_s0 + $0x58] sm:$0xff]  ;;  %v27_v31 = vld [vmem:[%s652_s0 + $0x68] sm:$0xff] }
   0x6   :  { %v129_v22 = vadd.f32 %v261_v2, %v73_v9  ;;  %v26_v26 = vld [vmem:[%s652_s0 + $0x60] sm:$0xff]  ;;  %v131_v28 = vadd.f32 %v261_v2, %v75_v15  ;;  %v132_v29 = vadd.f32 %v261_v2, %v76_v16  ;;  %v78_v30 = vmul.f32 %v256_v1, %v22_v18  ;;  %v28_v32 = vld [vmem:[%s652_s0 + $0x70] sm:$0xff]  ;;  %v29_v33 = vld [vmem:[%s652_s0 + $0x78] sm:$0xff] }
   0x7   :  { %175 = vst [vmem:[%s655_s3] sm:$0xff] %v126_v13  ;;  %v130_v27 = vadd.f32 %v261_v2, %v74_v14  ;;  %176 = vst [vmem:[%s655_s3 + $0x8] sm:$0xff] %v127_v20  ;;  %v133_v34 = vadd.f32 %v261_v2, %v77_v23  ;;  %v79_v35 = vmul.f32 %v256_v1, %v23_v19  ;;  %v30_v38 = vld [vmem:[%s652_s0 + $0x80] sm:$0xff]  ;;  %v31_v43 = vld [vmem:[%s652_s0 + $0x88] sm:$0xff] }
   0x8   :  { %177 = vst [vmem:[%s655_s3 + $0x10] sm:$0xff] %v128_v21  ;;  %178 = vst [vmem:[%s655_s3 + $0x18] sm:$0xff] %v129_v22  ;;  %v80_v36 = vmul.f32 %v256_v1, %v24_v24  ;;  %v81_v37 = vmul.f32 %v256_v1, %v25_v25  ;;  %v134_v39 = vadd.f32 %v261_v2, %v78_v30  ;;  %v32_v44 = vld [vmem:[%s652_s0 + $0x90] sm:$0xff]  ;;  %v33_v45 = vld [vmem:[%s652_s0 + $0x98] sm:$0xff] }
   0x9   :  { %179 = vst [vmem:[%s655_s3 + $0x20] sm:$0xff] %v130_v27  ;;  %180 = vst [vmem:[%s655_s3 + $0x28] sm:$0xff] %v131_v28  ;;  %v82_v40 = vmul.f32 %v256_v1, %v26_v26  ;;  %v83_v41 = vmul.f32 %v256_v1, %v27_v31  ;;  %v84_v42 = vmul.f32 %v256_v1, %v28_v32  ;;  %v34_v50 = vld [vmem:[%s652_s0 + $0xa0] sm:$0xff]  ;;  %v35_v51 = vld [vmem:[%s652_s0 + $0xa8] sm:$0xff] }
   0xa   :  { %181 = vst [vmem:[%s655_s3 + $0x30] sm:$0xff] %v132_v29  ;;  %182 = vst [vmem:[%s655_s3 + $0x38] sm:$0xff] %v133_v34  ;;  %v135_v46 = vadd.f32 %v261_v2, %v79_v35  ;;  %v136_v47 = vadd.f32 %v261_v2, %v80_v36  ;;  %v137_v48 = vadd.f32 %v261_v2, %v81_v37  ;;  %v36_v52 = vld [vmem:[%s652_s0 + $0xb0] sm:$0xff]  ;;  %v37_v57 = vld [vmem:[%s652_s0 + $0xb8] sm:$0xff] }
   0xb   :  { %v85_v49 = vmul.f32 %v256_v1, %v29_v33  ;;  %183 = vst [vmem:[%s655_s3 + $0x40] sm:$0xff] %v134_v39  ;;  %v138_v53 = vadd.f32 %v261_v2, %v82_v40  ;;  %v139_v54 = vadd.f32 %v261_v2, %v83_v41  ;;  %v140_v55 = vadd.f32 %v261_v2, %v84_v42  ;;  %v38_v62 = vld [vmem:[%s652_s0 + $0xc0] sm:$0xff]  ;;  %v39_v5 = vld [vmem:[%s652_s0 + $0xc8] sm:$0xff]  ;;  %v40_v6 = vld [vmem:[%s652_s0 + $0xd0] sm:$0xff] }
   0xc   :  { %v86_v56 = vmul.f32 %v256_v1, %v30_v38  ;;  %184 = vst [vmem:[%s655_s3 + $0x48] sm:$0xff] %v135_v46  ;;  %185 = vst [vmem:[%s655_s3 + $0x50] sm:$0xff] %v136_v47  ;;  %v87_v59 = vmul.f32 %v256_v1, %v31_v43  ;;  %v88_v60 = vmul.f32 %v256_v1, %v32_v44  ;;  %v41_v7 = vld [vmem:[%s652_s0 + $0xd8] sm:$0xff]  ;;  %v42_v12 = vld [vmem:[%s652_s0 + $0xe0] sm:$0xff] }
   0xd   :  { %186 = vst [vmem:[%s655_s3 + $0x58] sm:$0xff] %v137_v48  ;;  %v141_v58 = vadd.f32 %v261_v2, %v85_v49  ;;  %v89_v61 = vmul.f32 %v256_v1, %v33_v45  ;;  %187 = vst [vmem:[%s655_s3 + $0x60] sm:$0xff] %v138_v53  ;;  %v90_v0 = vmul.f32 %v256_v1, %v34_v50  ;;  %v43_v13 = vld [vmem:[%s652_s0 + $0xe8] sm:$0xff]  ;;  %v44_v14 = vld [vmem:[%s652_s0 + $0xf0] sm:$0xff] }
   0xe   :  { %188 = vst [vmem:[%s655_s3 + $0x68] sm:$0xff] %v139_v54  ;;  %189 = vst [vmem:[%s655_s3 + $0x70] sm:$0xff] %v140_v55  ;;  %v142_v63 = vadd.f32 %v261_v2, %v86_v56  ;;  %v91_v3 = vmul.f32 %v256_v1, %v35_v51  ;;  %v92_v4 = vmul.f32 %v256_v1, %v36_v52  ;;  %v45_v19 = vld [vmem:[%s652_s0 + $0xf8] sm:$0xff]  ;;  %v46_v24 = vld [vmem:[%s652_s0 + $0x100] sm:$0xff] }
   0xf   :  { %190 = vst [vmem:[%s655_s3 + $0x78] sm:$0xff] %v141_v58  ;;  %v143_v8 = vadd.f32 %v261_v2, %v87_v59  ;;  %v144_v9 = vadd.f32 %v261_v2, %v88_v60  ;;  %v145_v10 = vadd.f32 %v261_v2, %v89_v61  ;;  %v93_v11 = vmul.f32 %v256_v1, %v37_v57  ;;  %v47_v29 = vld [vmem:[%s652_s0 + $0x108] sm:$0xff]  ;;  %v48_v30 = vld [vmem:[%s652_s0 + $0x110] sm:$0xff]  ;;  %v49_v31 = vld [vmem:[%s652_s0 + $0x118] sm:$0xff] }
  0x10   :  { %191 = vst [vmem:[%s655_s3 + $0x80] sm:$0xff] %v142_v63  ;;  %v146_v15 = vadd.f32 %v261_v2, %v90_v0  ;;  %v147_v16 = vadd.f32 %v261_v2, %v91_v3  ;;  %v148_v17 = vadd.f32 %v261_v2, %v92_v4  ;;  %v94_v18 = vmul.f32 %v256_v1, %v38_v62  ;;  %v50_v36 = vld [vmem:[%s652_s0 + $0x120] sm:$0xff]  ;;  %v51_v37 = vld [vmem:[%s652_s0 + $0x128] sm:$0xff]  ;;  %v52_v38 = vld [vmem:[%s652_s0 + $0x130] sm:$0xff] }
  0x11   :  { %192 = vst [vmem:[%s655_s3 + $0x88] sm:$0xff] %v143_v8  ;;  %193 = vst [vmem:[%s655_s3 + $0x90] sm:$0xff] %v144_v9  ;;  %v149_v20 = vadd.f32 %v261_v2, %v93_v11  ;;  %v95_v21 = vmul.f32 %v256_v1, %v39_v5  ;;  %v96_v22 = vmul.f32 %v256_v1, %v40_v6  ;;  %v53_v43 = vld [vmem:[%s652_s0 + $0x138] sm:$0xff]  ;;  %v54_v48 = vld [vmem:[%s652_s0 + $0x140] sm:$0xff] }
  0x12   :  { %194 = vst [vmem:[%s655_s3 + $0x98] sm:$0xff] %v145_v10  ;;  %v97_v23 = vmul.f32 %v256_v1, %v41_v7  ;;  %195 = vst [vmem:[%s655_s3 + $0xa0] sm:$0xff] %v146_v15  ;;  %v150_v25 = vadd.f32 %v261_v2, %v94_v18  ;;  %v98_v26 = vmul.f32 %v256_v1, %v42_v12  ;;  %v55_v53 = vld [vmem:[%s652_s0 + $0x148] sm:$0xff]  ;;  %v56_v54 = vld [vmem:[%s652_s0 + $0x150] sm:$0xff] }
  0x13   :  { %196 = vst [vmem:[%s655_s3 + $0xa8] sm:$0xff] %v147_v16  ;;  %197 = vst [vmem:[%s655_s3 + $0xb0] sm:$0xff] %v148_v17  ;;  %v99_v27 = vmul.f32 %v256_v1, %v43_v13  ;;  %v100_v28 = vmul.f32 %v256_v1, %v44_v14  ;;  %v151_v32 = vadd.f32 %v261_v2, %v95_v21  ;;  %v57_v55 = vld [vmem:[%s652_s0 + $0x158] sm:$0xff]  ;;  %v58_v60 = vld [vmem:[%s652_s0 + $0x160] sm:$0xff] }
  0x14   :  { %198 = vst [vmem:[%s655_s3 + $0xb8] sm:$0xff] %v149_v20  ;;  %v152_v33 = vadd.f32 %v261_v2, %v96_v22  ;;  %v153_v34 = vadd.f32 %v261_v2, %v97_v23  ;;  %v101_v35 = vmul.f32 %v256_v1, %v45_v19  ;;  %199 = vst [vmem:[%s655_s3 + $0xc0] sm:$0xff] %v150_v25  ;;  %v59_v61 = vld [vmem:[%s652_s0 + $0x168] sm:$0xff]  ;;  %v60_v62 = vld [vmem:[%s652_s0 + $0x170] sm:$0xff] }
  0x15   :  { %v154_v39 = vadd.f32 %v261_v2, %v98_v26  ;;  %v155_v40 = vadd.f32 %v261_v2, %v99_v27  ;;  %v156_v41 = vadd.f32 %v261_v2, %v100_v28  ;;  %v102_v42 = vmul.f32 %v256_v1, %v46_v24  ;;  %200 = vst [vmem:[%s655_s3 + $0xc8] sm:$0xff] %v151_v32  ;;  %v61_v5 = vld [vmem:[%s652_s0 + $0x178] sm:$0xff]  ;;  %v62_v10 = vld [vmem:[%s652_s0 + $0x180] sm:$0xff] }
  0x16   :  { %201 = vst [vmem:[%s655_s3 + $0xd0] sm:$0xff] %v152_v33  ;;  %202 = vst [vmem:[%s655_s3 + $0xd8] sm:$0xff] %v153_v34  ;;  %v157_v44 = vadd.f32 %v261_v2, %v101_v35  ;;  %v103_v45 = vmul.f32 %v256_v1, %v47_v29  ;;  %v104_v46 = vmul.f32 %v256_v1, %v48_v30 }
  0x17   :  { %v105_v47 = vmul.f32 %v256_v1, %v49_v31  ;;  %203 = vst [vmem:[%s655_s3 + $0xe0] sm:$0xff] %v154_v39  ;;  %204 = vst [vmem:[%s655_s3 + $0xe8] sm:$0xff] %v155_v40  ;;  %v158_v49 = vadd.f32 %v261_v2, %v102_v42  ;;  %v106_v50 = vmul.f32 %v256_v1, %v50_v36 }
  0x18   :  { %205 = vst [vmem:[%s655_s3 + $0xf0] sm:$0xff] %v156_v41  ;;  %v107_v51 = vmul.f32 %v256_v1, %v51_v37  ;;  %v108_v52 = vmul.f32 %v256_v1, %v52_v38  ;;  %206 = vst [vmem:[%s655_s3 + $0xf8] sm:$0xff] %v157_v44  ;;  %v159_v56 = vadd.f32 %v261_v2, %v103_v45 }
  0x19   :  { %v160_v57 = vadd.f32 %v261_v2, %v104_v46  ;;  %v161_v58 = vadd.f32 %v261_v2, %v105_v47  ;;  %v109_v59 = vmul.f32 %v256_v1, %v53_v43  ;;  %207 = vst [vmem:[%s655_s3 + $0x100] sm:$0xff] %v158_v49  ;;  %v162_v63 = vadd.f32 %v261_v2, %v106_v50 }
  0x1a   :  { %v163_v0 = vadd.f32 %v261_v2, %v107_v51  ;;  %v164_v3 = vadd.f32 %v261_v2, %v108_v52  ;;  %v110_v4 = vmul.f32 %v256_v1, %v54_v48  ;;  %208 = vst [vmem:[%s655_s3 + $0x108] sm:$0xff] %v159_v56  ;;  %v111_v7 = vmul.f32 %v256_v1, %v55_v53 }
  0x1b   :  { %209 = vst [vmem:[%s655_s3 + $0x110] sm:$0xff] %v160_v57  ;;  %210 = vst [vmem:[%s655_s3 + $0x118] sm:$0xff] %v161_v58  ;;  %v165_v6 = vadd.f32 %v261_v2, %v109_v59  ;;  %v112_v8 = vmul.f32 %v256_v1, %v56_v54  ;;  %v113_v9 = vmul.f32 %v256_v1, %v57_v55 }
  0x1c   :  { %211 = vst [vmem:[%s655_s3 + $0x120] sm:$0xff] %v162_v63  ;;  %212 = vst [vmem:[%s655_s3 + $0x128] sm:$0xff] %v163_v0  ;;  %v166_v11 = vadd.f32 %v261_v2, %v110_v4  ;;  %v114_v12 = vmul.f32 %v256_v1, %v58_v60  ;;  %v115_v13 = vmul.f32 %v256_v1, %v59_v61 }
  0x1d   :  { %213 = vst [vmem:[%s655_s3 + $0x130] sm:$0xff] %v164_v3  ;;  %v116_v14 = vmul.f32 %v256_v1, %v60_v62  ;;  %214 = vst [vmem:[%s655_s3 + $0x138] sm:$0xff] %v165_v6  ;;  %v167_v15 = vadd.f32 %v261_v2, %v111_v7  ;;  %v168_v16 = vadd.f32 %v261_v2, %v112_v8 }
  0x1e   :  { %v169_v17 = vadd.f32 %v261_v2, %v113_v9  ;;  %v117_v18 = vmul.f32 %v256_v1, %v61_v5  ;;  %215 = vst [vmem:[%s655_s3 + $0x140] sm:$0xff] %v166_v11  ;;  %v170_v19 = vadd.f32 %v261_v2, %v114_v12  ;;  %v171_v20 = vadd.f32 %v261_v2, %v115_v13 }
  0x1f   :  { %v172_v21 = vadd.f32 %v261_v2, %v116_v14  ;;  %v118_v22 = vmul.f32 %v256_v1, %v62_v10  ;;  %216 = vst [vmem:[%s655_s3 + $0x148] sm:$0xff] %v167_v15  ;;  %217 = vst [vmem:[%s655_s3 + $0x150] sm:$0xff] %v168_v16 }
  0x20   :  { %218 = vst [vmem:[%s655_s3 + $0x158] sm:$0xff] %v169_v17  ;;  %v173_v23 = vadd.f32 %v261_v2, %v117_v18  ;;  %219 = vst [vmem:[%s655_s3 + $0x160] sm:$0xff] %v170_v19 }
  0x21   :  { %220 = vst [vmem:[%s655_s3 + $0x168] sm:$0xff] %v171_v20  ;;  %221 = vst [vmem:[%s655_s3 + $0x170] sm:$0xff] %v172_v21  ;;  %v174_v1 = vadd.f32 %v261_v2, %v118_v22 }
  0x22   :  { %222 = vst [vmem:[%s655_s3 + $0x178] sm:$0xff] %v173_v23 }
  0x23   :  { %223 = vst [vmem:[%s655_s3 + $0x180] sm:$0xff] %v174_v1 }

// kernel: def_conv_net_block.2
= control target key start
LH: loop header
LB: loop body
LE: loop exit
PB: predicated region body
PF: predicated region fallthrough
CT: control target
= control target key end

     0   :  { %s9599_s15 = smov 0   ;;  %s10674_s0 = inlined_call_operand.vmem [shape: bf16[2,16,16,4], index: 0, kind: input, shape index: {}]   ;;  %s10675_s1 = inlined_call_operand.vmem [shape: bf16[3,4,384], index: 1, kind: input, shape index: {}]   ;;  %s10676_s2 = inlined_call_operand.vmem [shape: f32[2,14,14,128], index: 2, kind: output, shape index: {0}]   ;;  %s10677_s3 = inlined_call_operand.vmem [shape: f32[1,128], index: 3, kind: output, shape index: {1}]   ;;  %s10678_s4 = inlined_call_operand.vmem [shape: f32[1,128], index: 4, kind: output, shape index: {2}]  }
   0x1 LB: > { %s8357_s16 = sadd.s32 4294967295, %s9564_s15   ;;  %p8361_p0 = scmp.ge.s32.totalorder %s9564_s15, 1  ;;  %s9564_s15 = sphi %s9599_s15, %s15_s15  }
   0x2   : > { %p157_p1 = scmp.lt.s32.totalorder %s9564_s15, 3 }
   0x4   : > { %p158_p2 = pnand %p8361_p0, %p157_p1 }
   0x5   : > { %p183_p3 = scmp.lt.s32.totalorder (!%p158_p2), %s8357_s16, 1  ;;  %p8365_p4 = scmp.ne.s32.totalorder (!%p158_p2), %s8357_s16, 0 }
   0x6   : > { %161 = sbr.rel (%p158_p2) target bundleno = 3490 (0xda2), region = 28 }
   0xd   : > { %s184_s17 = scalar_select %p183_p3, %s8357_s16, 1 }
   0xe   : > { %197 = sbr.rel (%p8365_p4) target bundleno = 21 (0x15), region = 32  ;;  %v9566_v0 = vmov (!%p8365_p4), 0.0  }
   0xf   : > { %s8728_s18 = sshll.u32 %s184_s17, 7  ;;  %s9457_s19 = smul.u32 224, %s184_s17  ;;  %198 = vst [vmem:[%s10677_s3] sm:$0x1] (!%p8365_p4), %v9566_v0  ;;  %199 = vst [vmem:[%s10678_s4] sm:$0x1] (!%p8365_p4), %v9566_v0 }
  0x10   : > { %s9610_s22 = scalar_lea.vmem %s10674_s0, %s8728_s18 }
  0x11   : > { %s9615_s25 = scalar_lea.vmem %s10676_s2, %s9457_s19 }
  0x15 PF: > { %v202_v1 = vld [vmem:[%s10675_s1] sm:$0x3f]  ;;  %v213_v2 = vlaneseq  ;;  %v9567_v3 = vmov 1983009808   ;;  %v9568_v5 = vmov 0.0   ;;  %v9569_v7 = vmov 0  }
  0x16   : > { %v211_v4 = vunpack.c.l.s4 %v9567_v3  ;;  %8897 = vmatprep.subr.bf16.mxu1 %v9568_v5  ;;  %271 = vmatprep.mubr.bf16.mxu0 %v9569_v7  ;;  %vm9570_vm0 = vmmov 0   ;;  %v8372_v8 = vld [vmem:[%s10675_s1 + $0x6] sm:$0x3f]  ;;  %v209_v10 = vcombine.high %v202_v1, %v202_v1  ;;  %v8379_v12 = vld [vmem:[%s10675_s1 + $0xc] sm:$0x3f]  ;;  %vm229_vm1 = vcmask 1041408  }
  0x17   : > { %v214_v6 = vshrl.u32 %v213_v2, 7  ;;  %8899 = vmatprep.mubr.msk.bf16.mxu1 %vm9570_vm0, %v9568_v5  ;;  %v356_v11 = vcombine.high %v8372_v8, %v8372_v8  ;;  %v637_v14 = vld [vmem:[%s10675_s1] sm:$0x3f]  ;;  %v499_v21 = vcombine.high %v8379_v12, %v8379_v12  ;;  %v8392_v23 = vld [vmem:[%s10675_s1 + $0x6] sm:$0x3f]  ;;  %vm225_vm2 = vcmask 31744  }
  0x18   : > { %v212_v9 = vunpack.c.0.s8 %v211_v4  ;;  %v9475_v17 = vld [vmem:[%s9610_s22] sm:$0xff]   ;;  %v644_v22 = vcombine.high %v637_v14, %v637_v14  ;;  %v785_v31 = vcombine.high %v8392_v23, %v8392_v23  ;;  %v9477_v36 = vld [vmem:[%s9610_s22 + $0x8] sm:$0xff]   ;;  %v9479_v43 = vld [vmem:[%s9610_s22 + $0x10] sm:$0xff]   ;;  %v9571_v57 = vmov 0.0|0.0  }
  0x19   : > { %v8399_v45 = vld [vmem:[%s10675_s1 + $0xc] sm:$0x3f]  ;;  %v9485_v56 = vld [vmem:[%s9610_s22 + $0x18] sm:$0xff]   ;;  %vm337_vm3 = vcmask 1045504   ;;  %vm327_vm4 = vcmask 1046528   ;;  %vm9572_vm5 = vmmov 1  }
  0x1a   : > { %v9636_v13 = vsub.s32 %v212_v9, %v214_v6  ;;  %v9481_v47 = vld [vmem:[%s9610_s22 + $0x8] sm:$0xff]   ;;  %v927_v49 = vcombine.high %v8399_v45, %v8399_v45  ;;  %v9483_v53 = vld [vmem:[%s9610_s22 + $0x10] sm:$0xff]   ;;  %vm9734_vm6 = vmpackc.low %vm337_vm3, %vm9572_vm5  ;;  %vm1062_vm7 = vcmask 113664  }
  0x1c   : > { %v216_v15 = vrot.slane %v202_v1, %v9636_v13  ;;  %v223_v16 = vrot.slane %v209_v10, %v9636_v13  ;;  %v363_v18 = vrot.slane %v8372_v8, %v9636_v13  ;;  %v370_v19 = vrot.slane %v356_v11, %v9636_v13 }
  0x1d   : > { %v506_v20 = vrot.slane %v8379_v12, %v9636_v13  ;;  %v513_v30 = vrot.slane %v499_v21, %v9636_v13  ;;  %v658_v33 = vrot.slane %v644_v22, %v9636_v13  ;;  %v651_v34 = vrot.slane %v637_v14, %v9636_v13 }
  0x1e   : > { %v224_v24 = vcombine.high %v216_v15, %v216_v15  ;;  %v231_v25 = vsel %vm229_vm1, %v216_v15, 0  ;;  %v237_v26 = vsel %vm229_vm1, %v223_v16, 0  ;;  %v371_v27 = vcombine.high %v363_v18, %v363_v18 }
  0x1f   : > { %8898 = vmatpush3.bf16.msra.mxu1 %v237_v26  ;;  %v376_v28 = vsel %vm229_vm1, %v363_v18, 0  ;;  %v382_v29 = vsel %vm229_vm1, %v370_v19, 0  ;;  %v514_v32 = vcombine.high %v506_v20, %v506_v20  ;;  %v799_v35 = vrot.slane %v785_v31, %v9636_v13 }
  0x20   : > { %8367 = vmatprep.subr.msk.bf16.mxu0 %vm229_vm1, %v224_v24  ;;  %8903 = vmatprep.subr.bf16.mxu1 %v9568_v5  ;;  %v519_v37 = vsel %vm229_vm1, %v506_v20, 0  ;;  %v525_v38 = vsel %vm229_vm1, %v513_v30, 0  ;;  %v664_v39 = vsel %vm229_vm1, %v651_v34, 0  ;;  %v670_v40 = vsel %vm229_vm1, %v658_v33, 0 }
  0x21   : > { %240 = vmatpush1.bf16.msra.mxu0 %v231_v25  ;;  %v811_v41 = vsel %vm229_vm1, %v799_v35, 0  ;;  %v659_v42 = vcombine.high %v651_v34, %v651_v34  ;;  %v792_v44 = vrot.slane %v8392_v23, %v9636_v13  ;;  %v934_v48 = vrot.slane %v8399_v45, %v9636_v13 }
  0x22   : > { %8900 = vmatmul.mubr.msk.bf16.vlgmr.msra.gmra.mrb[0].mxu1 %vm225_vm2, %v9475_v17  ;;  %8374 = vmatprep.subr.msk.bf16.mxu0 %vm229_vm1, %v371_v27  ;;  %v941_v52 = vrot.slane %v927_v49, %v9636_v13 }
  0x23   : > { %8904 = vmatpush3.bf16.msra.mxu1 %v382_v29  ;;  %8905 = vmatprep.mubr.msk.bf16.mxu1 %vm9570_vm0, %v9568_v5  ;;  %v800_v46 = vcombine.high %v792_v44, %v792_v44  ;;  %v805_v50 = vsel %vm229_vm1, %v792_v44, 0  ;;  %v942_v51 = vcombine.high %v934_v48, %v934_v48  ;;  %v947_v55 = vsel %vm229_vm1, %v934_v48, 0 }
  0x24   : > { %8368 = vmatmul.mubr.msk.bf16.vlgmr.msra.gmra.mrb[0].mxu0 %vm225_vm2, %v9475_v17  ;;  %8909 = vmatprep.subr.bf16.mxu1 %v9568_v5  ;;  %v953_v54 = vsel %vm229_vm1, %v941_v52, 0 }
  0x25   : > { %385 = vmatpush1.bf16.msra.mxu0 %v376_v28  ;;  %416 = vmatprep.mubr.bf16.mxu0 %v9569_v7 }
  0x26   : > { %8381 = vmatprep.subr.msk.bf16.mxu0 %vm229_vm1, %v514_v32 }
  0x2a   : > { %8906 = vmatmul.mubr.msk.bf16.vlgmr.msra.gmra.mrb[4].mxu1 %vm225_vm2, %v9477_v36 }
  0x2b   : > { %8910 = vmatpush3.bf16.msra.mxu1 %v525_v38  ;;  %8911 = vmatprep.mubr.msk.bf16.mxu1 %vm9570_vm0, %v9568_v5 }
  0x2c   : > { %8375 = vmatmul.mubr.msk.bf16.vlgmr.msra.gmra.mrb[4].mxu0 %vm225_vm2, %v9477_v36  ;;  %8915 = vmatprep.subr.bf16.mxu1 %v9568_v5 }
  0x2d   : > { %528 = vmatpush1.bf16.msra.mxu0 %v519_v37  ;;  %559 = vmatprep.mubr.bf16.mxu0 %v9569_v7 }
  0x2e   : > { %8387 = vmatprep.subr.msk.bf16.mxu0 %vm229_vm1, %v659_v42 }
  0x32   : > { %8912 = vmatmul.mubr.msk.bf16.vlgmr.msra.gmra.mrb[8].mxu1 %vm225_vm2, %v9479_v43 }
  0x33   : > { %8916 = vmatpush3.bf16.msra.mxu1 %v670_v40  ;;  %8917 = vmatprep.mubr.msk.bf16.mxu1 %vm9570_vm0, %v9568_v5 }
  0x34   : > { %8382 = vmatmul.mubr.msk.bf16.vlgmr.msra.gmra.mrb[8].mxu0 %vm225_vm2, %v9479_v43  ;;  %8921 = vmatprep.subr.bf16.mxu1 %v9568_v5 }
  0x35   : > { %673 = vmatpush1.bf16.msra.mxu0 %v664_v39  ;;  %704 = vmatprep.mubr.bf16.mxu0 %v9569_v7 }
  0x36   : > { %8394 = vmatprep.subr.msk.bf16.mxu0 %vm229_vm1, %v800_v46 }
  0x3a   : > { %8918 = vmatmul.mubr.msk.bf16.vlgmr.msra.gmra.mrb[12].mxu1 %vm225_vm2, %v9481_v47 }
  0x3b   : > { %8922 = vmatpush3.bf16.msra.mxu1 %v811_v41  ;;  %8923 = vmatprep.mubr.msk.bf16.mxu1 %vm9570_vm0, %v9568_v5 }
  0x3c   : > { %8388 = vmatmul.mubr.msk.bf16.vlgmr.msra.gmra.mrb[12].mxu0 %vm225_vm2, %v9481_v47  ;;  %8927 = vmatprep.subr.bf16.mxu1 %v9568_v5 }
  0x3d   : > { %814 = vmatpush1.bf16.msra.mxu0 %v805_v50  ;;  %845 = vmatprep.mubr.bf16.mxu0 %v9569_v7 }
  0x3e   : > { %8401 = vmatprep.subr.msk.bf16.mxu0 %vm229_vm1, %v942_v51 }
  0x42   : > { %8924 = vmatmul.mubr.msk.bf16.vlgmr.msra.gmra.mrb[16].mxu1 %vm225_vm2, %v9483_v53 }
  0x43   : > { %8928 = vmatpush3.bf16.msra.mxu1 %v953_v54  ;;  %8929 = vmatprep.mubr.msk.bf16.mxu1 %vm9570_vm0, %v9568_v5 }
  0x44   : > { %8395 = vmatmul.mubr.msk.bf16.vlgmr.msra.gmra.mrb[16].mxu0 %vm225_vm2, %v9483_v53  ;;  %9349 = vmatprep.subr.bf16.mxu1 %v9571_v57 }
  0x45   : > { %956 = vmatpush1.bf16.msra.mxu0 %v947_v55  ;;  %987 = vmatprep.mubr.bf16.mxu0 %v9569_v7 }
  0x46   : > { %9345 = vmatprep.subr.bf16.mxu0 %v9571_v57 }
  0x4a   : > { %8930 = vmatmul.mubr.msk.bf16.vlgmr.msra.gmra.mrb[20].mxu1 %vm225_vm2, %v9485_v56 }
  0x4b   : > { %8944 = vmatprep.mubr.msk.f32.mxu1 %vm9570_vm0, %v9568_v5 }
  0x4c   : > { %8402 = vmatmul.mubr.msk.bf16.vlgmr.msra.gmra.mrb[20].mxu0 %vm225_vm2, %v9485_v56  ;;  %v9730_v56 = vld [vmem:[%s10675_s1] sm:$0x3f] }
  0x4d   : > { %8937 = vmatprep.mubr.msk.f32.mxu0 %vm9570_vm0, %v9568_v5 }
  0xf5   : > { %v316_v58 = vpop.f32.mrb[0].mxu1 }
  0xf6   : > { %v338_v59 = vrot.slane %v316_v58, 2  ;;  %v8901_v60 = vpop.f32.mrb[1].mxu1 }
  0xf7   : > { %v273_v61 = vpop.f32.mrb[0].mxu0  ;;  %v319_v62 = vpop.f32.mrb[2].mxu1 }
  0xf8   : > { %v275_v63 = vpop.f32.mrb[1].mxu0  ;;  %v339_v0 = vrot.slane %v319_v62, 2  ;;  %v8902_v1 = vpop.f32.mrb[3].mxu1 }
  0xf9   : > { %v277_v2 = vpop.f32.mrb[2].mxu0  ;;  %v328_v6 = vrot.slane %v275_v63, 1 }
  0xfa   : > { %v279_v3 = vpop.f32.mrb[3].mxu0  ;;  %v340_v4 = vsel %vm337_vm3, %v338_v59, %v339_v0 }
  0xfb   : > { %v329_v8 = vrot.slane %v279_v3, 1  ;;  %v8287_v3 = vld [vmem:[%s10678_s4] sm:$0x1] }
  0xfd   : > { %v330_v9 = vsel %vm327_vm4, %v328_v6, %v329_v8  ;;  %v334_v10 = vadd.f32 %v329_v8, %v277_v2  ;;  %v461_v11 = vpop.f32.mrb[4].mxu1 }
  0xfe   : > { %v333_v12 = vadd.f32 %v330_v9, %v273_v61  ;;  %v481_v14 = vrot.slane %v461_v11, 2  ;;  %v8907_v15 = vpop.f32.mrb[5].mxu1  ;;  %v9745_v11 = vld [vmem:[%s10675_s1 + $0x6] sm:$0x3f] }
  0xff   : > { %v418_v16 = vpop.f32.mrb[4].mxu0  ;;  %v344_v17 = vadd.f32 %v339_v0, %v334_v10  ;;  %v464_v18 = vpop.f32.mrb[6].mxu1 }
 0x100   : > { %v343_v19 = vadd.f32 %v340_v4, %v333_v12  ;;  %v420_v20 = vpop.f32.mrb[5].mxu0  ;;  %v482_v21 = vrot.slane %v464_v18, 2  ;;  %v8908_v22 = vpop.f32.mrb[7].mxu1  ;;  %v1369_v4 = vcombine.high %v9730_v56, %v9730_v56 }
 0x101   : > { %v422_v23 = vpop.f32.mrb[6].mxu0  ;;  %v472_v28 = vrot.slane %v420_v20, 1  ;;  %v1510_v20 = vcombine.high %v9745_v11, %v9745_v11 }
 0x102   : > { %v468_v24 = vadd.f32 %v418_v16, %v343_v19  ;;  %v469_v25 = vadd.f32 %v422_v23, %v344_v17  ;;  %v424_v26 = vpop.f32.mrb[7].mxu0  ;;  %v483_v27 = vsel %vm337_vm3, %v481_v14, %v482_v21  ;;  %v1383_v19 = vrot.slane %v1369_v4, %v9636_v13 }
 0x103   : > { %v473_v29 = vrot.slane %v424_v26, 1 }
 0x105   : > { %v474_v30 = vsel %vm327_vm4, %v472_v28, %v473_v29  ;;  %v478_v31 = vadd.f32 %v473_v29, %v469_v25  ;;  %v604_v32 = vpop.f32.mrb[8].mxu1  ;;  %v9573_v25 = vmov 1.0  }
 0x106   : > { %v477_v33 = vadd.f32 %v474_v30, %v468_v24  ;;  %v624_v34 = vrot.slane %v604_v32, 2  ;;  %v8913_v35 = vpop.f32.mrb[9].mxu1 }
 0x107   : > { %v561_v36 = vpop.f32.mrb[8].mxu0  ;;  %v487_v37 = vadd.f32 %v482_v21, %v478_v31  ;;  %v607_v38 = vpop.f32.mrb[10].mxu1 }
 0x108   : > { %v486_v39 = vadd.f32 %v483_v27, %v477_v33  ;;  %v563_v40 = vpop.f32.mrb[9].mxu0  ;;  %v625_v41 = vrot.slane %v607_v38, 2  ;;  %v8914_v42 = vpop.f32.mrb[11].mxu1  ;;  %v1395_v33 = vsel %vm229_vm1, %v1383_v19, 0 }
 0x109   : > { %v565_v43 = vpop.f32.mrb[10].mxu0  ;;  %v615_v48 = vrot.slane %v563_v40, 1  ;;  %v9772_v42 = vld [vmem:[%s9610_s22 + $0x10] sm:$0xff]  }
 0x10a   : > { %v611_v44 = vadd.f32 %v561_v36, %v486_v39  ;;  %v612_v45 = vadd.f32 %v565_v43, %v487_v37  ;;  %v626_v46 = vsel %vm337_vm3, %v624_v34, %v625_v41  ;;  %v567_v47 = vpop.f32.mrb[11].mxu0  ;;  %v1524_v34 = vrot.slane %v1510_v20, %v9636_v13  ;;  %v9767_v39 = vld [vmem:[%s10675_s1 + $0xc] sm:$0x3f]  ;;  %v9491_v20 = vld [vmem:[%s9610_s22 + $0x20] sm:$0xff]  }
 0x10b   : > { %v616_v49 = vrot.slane %v567_v47, 1  ;;  %v1652_v47 = vcombine.high %v9767_v39, %v9767_v39 }
 0x10d   : > { %v617_v50 = vsel %vm327_vm4, %v615_v48, %v616_v49  ;;  %v621_v51 = vadd.f32 %v616_v49, %v612_v45  ;;  %v749_v52 = vpop.f32.mrb[12].mxu1 }
 0x10e   : > { %v620_v53 = vadd.f32 %v617_v50, %v611_v44  ;;  %v769_v54 = vrot.slane %v749_v52, 2  ;;  %v8919_v55 = vpop.f32.mrb[13].mxu1 }
 0x10f   : > { %v630_v58 = vadd.f32 %v625_v41, %v621_v51  ;;  %v706_v59 = vpop.f32.mrb[12].mxu0  ;;  %v752_v60 = vpop.f32.mrb[14].mxu1 }
 0x110   : > { %v629_v61 = vadd.f32 %v626_v46, %v620_v53  ;;  %v708_v62 = vpop.f32.mrb[13].mxu0  ;;  %v770_v63 = vrot.slane %v752_v60, 2  ;;  %v8920_v0 = vpop.f32.mrb[15].mxu1  ;;  %v1536_v46 = vsel %vm229_vm1, %v1524_v34, 0 }
 0x111   : > { %632 = vst [vmem:[%s9615_s25 + $0x8] sm:$0x3f] %v630_v58  ;;  %v634_v1 = vmul.f32 %v630_v58, %v630_v58  ;;  %v710_v2 = vpop.f32.mrb[14].mxu0  ;;  %v760_v12 = vrot.slane %v708_v62, 1 }
 0x112   : > { %631 = vst [vmem:[%s9615_s25] sm:$0xff] %v629_v61  ;;  %v633_v6 = vmul.f32 %v629_v61, %v629_v61  ;;  %v9350_v8 = vpack.c.bf16 %v630_v58, %v629_v61  ;;  %v712_v9 = vpop.f32.mrb[15].mxu0  ;;  %v771_v10 = vsel %vm337_vm3, %v769_v54, %v770_v63  ;;  %v1666_v61 = vrot.slane %v1652_v47, %v9636_v13 }
 0x113   : > { %v761_v14 = vrot.slane %v712_v9, 1 }
 0x114   : > { %v9358_v15 = vpack.c.bf16 %v634_v1, %v633_v6  ;;  %9352 = vmatpush3.bf16.msk.msra.mxu1 %vm9734_vm6, %v9350_v8  ;;  %v9489_v6 = vld [vmem:[%s9610_s22 + $0x18] sm:$0xff]  }
 0x115   : > { %v762_v16 = vsel %vm327_vm4, %v760_v12, %v761_v14  ;;  %v766_v17 = vadd.f32 %v761_v14, %v710_v2  ;;  %v890_v18 = vpop.f32.mrb[16].mxu1  ;;  %9357 = vmatprep.subr.bf16.mxu1 %v9571_v57 }
 0x116   : > { %v765_v21 = vadd.f32 %v762_v16, %v706_v59  ;;  %v910_v22 = vrot.slane %v890_v18, 2  ;;  %v8925_v23 = vpop.f32.mrb[17].mxu1 }
 0x117   : > { %v847_v24 = vpop.f32.mrb[16].mxu0  ;;  %8945 = vmatmul.mubr.msk.f32.vlgmr.msra.gmra.mrb[24].mxu1 %vm1062_vm7, %v9573_v25  ;;  %v775_v26 = vadd.f32 %v770_v63, %v766_v17  ;;  %v893_v27 = vpop.f32.mrb[18].mxu1  ;;  %v1376_v17 = vrot.slane %v9730_v56, %v9636_v13  ;;  %v1517_v23 = vrot.slane %v9745_v11, %v9636_v13 }
 0x118   : > { %v774_v28 = vadd.f32 %v771_v10, %v765_v21  ;;  %v849_v29 = vpop.f32.mrb[17].mxu0  ;;  %9360 = vmatpush3.bf16.msk.msra.mxu1 %vm9734_vm6, %v9358_v15  ;;  %v911_v30 = vrot.slane %v893_v27, 2  ;;  %v8926_v31 = vpop.f32.mrb[19].mxu1  ;;  %8958 = vmatprep.mubr.msk.f32.mxu1 %vm9570_vm0, %v9568_v5  ;;  %v1678_v10 = vsel %vm229_vm1, %v1666_v61, 0 }
 0x119   : > { %v851_v32 = vpop.f32.mrb[18].mxu0  ;;  %8961 = vmatprep.subr.bf16.mxu1 %v9568_v5  ;;  %v901_v40 = vrot.slane %v849_v29, 1  ;;  %v1389_v56 = vsel %vm229_vm1, %v1376_v17, 0  ;;  %v1530_v11 = vsel %vm229_vm1, %v1517_v23, 0 }
 0x11a   : > { %v897_v35 = vadd.f32 %v847_v24, %v774_v28  ;;  %v898_v36 = vadd.f32 %v851_v32, %v775_v26  ;;  %v853_v37 = vpop.f32.mrb[19].mxu0  ;;  %v912_v38 = vsel %vm337_vm3, %v910_v22, %v911_v30  ;;  %v1384_v22 = vcombine.high %v1376_v17, %v1376_v17 }
 0x11b   : > { %v902_v41 = vrot.slane %v853_v37, 1  ;;  %8959 = vmatmul.mubr.msk.f32.vlgmr.msra.gmra.mrb[26].mxu1 %vm1062_vm7, %v9573_v25  ;;  %v1525_v24 = vcombine.high %v1517_v23, %v1517_v23  ;;  %v1659_v26 = vrot.slane %v9767_v39, %v9636_v13 }
 0x11c   : > { %8962 = vmatpush3.bf16.msra.mxu1 %v1395_v33  ;;  %8963 = vmatprep.mubr.msk.bf16.mxu1 %vm9570_vm0, %v9568_v5 }
 0x11d   : > { %v903_v43 = vsel %vm327_vm4, %v901_v40, %v902_v41  ;;  %v907_v44 = vadd.f32 %v902_v41, %v898_v36  ;;  %v1032_v45 = vpop.f32.mrb[20].mxu1  ;;  %8967 = vmatprep.subr.bf16.mxu1 %v9568_v5  ;;  %v1667_v27 = vcombine.high %v1659_v26, %v1659_v26  ;;  %v1672_v28 = vsel %vm229_vm1, %v1659_v26, 0 }
 0x11e   : > { %v906_v48 = vadd.f32 %v903_v43, %v897_v35  ;;  %v1052_v49 = vrot.slane %v1032_v45, 2  ;;  %v8931_v50 = vpop.f32.mrb[21].mxu1 }
 0x11f   : > { %v989_v51 = vpop.f32.mrb[20].mxu0  ;;  %v916_v52 = vadd.f32 %v911_v30, %v907_v44  ;;  %v1035_v53 = vpop.f32.mrb[22].mxu1  ;;  %8964 = vmatmul.mubr.msk.bf16.vlgmr.msra.gmra.mrb[28].mxu1 %vm225_vm2, %v9772_v42 }
 0x120   : > { %v915_v54 = vadd.f32 %v912_v38, %v906_v48  ;;  %v991_v55 = vpop.f32.mrb[21].mxu0  ;;  %v1053_v58 = vrot.slane %v1035_v53, 2  ;;  %v8932_v59 = vpop.f32.mrb[23].mxu1  ;;  %8968 = vmatpush3.bf16.msra.mxu1 %v1536_v46  ;;  %8969 = vmatprep.mubr.msk.bf16.mxu1 %vm9570_vm0, %v9568_v5 }
 0x121   : > { %v993_v60 = vpop.f32.mrb[22].mxu0  ;;  %8973 = vmatprep.subr.bf16.mxu1 %v9568_v5  ;;  %v1043_v2 = vrot.slane %v991_v55, 1 }
 0x122   : > { %v1039_v62 = vadd.f32 %v989_v51, %v915_v54  ;;  %v1040_v63 = vadd.f32 %v993_v60, %v916_v52  ;;  %v1054_v0 = vsel %vm337_vm3, %v1052_v49, %v1053_v58  ;;  %v995_v1 = vpop.f32.mrb[23].mxu0 }
 0x123   : > { %v1044_v4 = vrot.slane %v995_v1, 1 }
 0x125   : > { %v1045_v8 = vsel %vm327_vm4, %v1043_v2, %v1044_v4  ;;  %v1049_v9 = vadd.f32 %v1044_v4, %v1040_v63 }
 0x126   : > { %v1048_v12 = vadd.f32 %v1045_v8, %v1039_v62 }
 0x127   : > { %v1058_v14 = vadd.f32 %v1053_v58, %v1049_v9  ;;  %8970 = vmatmul.mubr.msk.bf16.vlgmr.msra.gmra.mrb[32].mxu1 %vm225_vm2, %v9489_v6 }
 0x128   : > { %v1057_v15 = vadd.f32 %v1054_v0, %v1048_v12  ;;  %8974 = vmatpush3.bf16.msra.mxu1 %v1678_v10  ;;  %8975 = vmatprep.mubr.msk.bf16.mxu1 %vm9570_vm0, %v9568_v5 }
 0x129   : > { %8405 = vst [vmem:[%s9615_s25 + $0x18] sm:$0x3f] %v1058_v14  ;;  %v1213_v16 = vmul.f32 %v1058_v14, %v1058_v14  ;;  %9365 = vmatprep.subr.bf16.mxu1 %v9571_v57 }
 0x12a   : > { %8404 = vst [vmem:[%s9615_s25 + $0x10] sm:$0xff] %v1057_v15  ;;  %v9346_v18 = vpack.c.bf16 %v1058_v14, %v1057_v15  ;;  %v1212_v19 = vmul.f32 %v1057_v15, %v1057_v15 }
 0x12c   : > { %v9354_v21 = vpack.c.bf16 %v1213_v16, %v1212_v19  ;;  %9348 = vmatpush3.bf16.msk.msra.mxu0 %vm9734_vm6, %v9346_v18 }
 0x12d   : > { %9353 = vmatprep.subr.bf16.mxu0 %v9571_v57 }
 0x12f   : > { %8938 = vmatmul.mubr.msk.f32.vlgmr.msra.gmra.mrb[24].mxu0 %vm1062_vm7, %v9573_v25  ;;  %8976 = vmatmul.mubr.msk.bf16.vlgmr.msra.gmra.mrb[36].mxu1 %vm225_vm2, %v9491_v20 }
 0x130   : > { %9356 = vmatpush3.bf16.msk.msra.mxu0 %vm9734_vm6, %v9354_v21  ;;  %8951 = vmatprep.mubr.msk.f32.mxu0 %vm9570_vm0, %v9568_v5 }
 0x131   : > { %8417 = vmatprep.subr.msk.bf16.mxu0 %vm229_vm1, %v1384_v22  ;;  %8990 = vmatprep.mubr.msk.f32.mxu1 %vm9570_vm0, %v9568_v5 }
 0x133   : > { %8952 = vmatmul.mubr.msk.f32.vlgmr.msra.gmra.mrb[26].mxu0 %vm1062_vm7, %v9573_v25 }
 0x134   : > { %1398 = vmatpush1.bf16.msra.mxu0 %v1389_v56  ;;  %1429 = vmatprep.mubr.bf16.mxu0 %v9569_v7 }
 0x135   : > { %8424 = vmatprep.subr.msk.bf16.mxu0 %vm229_vm1, %v1525_v24 }
 0x137   : > { %8418 = vmatmul.mubr.msk.bf16.vlgmr.msra.gmra.mrb[28].mxu0 %vm225_vm2, %v9772_v42 }
 0x138   : > { %1539 = vmatpush1.bf16.msra.mxu0 %v1530_v11  ;;  %1570 = vmatprep.mubr.bf16.mxu0 %v9569_v7 }
 0x139   : > { %8431 = vmatprep.subr.msk.bf16.mxu0 %vm229_vm1, %v1667_v27 }
 0x13f   : > { %8425 = vmatmul.mubr.msk.bf16.vlgmr.msra.gmra.mrb[32].mxu0 %vm225_vm2, %v9489_v6 }
 0x140   : > { %1681 = vmatpush1.bf16.msra.mxu0 %v1672_v28  ;;  %1712 = vmatprep.mubr.bf16.mxu0 %v9569_v7 }
 0x141   : > { %9361 = vmatprep.subr.bf16.mxu0 %v9571_v57 }
 0x147   : > { %8432 = vmatmul.mubr.msk.bf16.vlgmr.msra.gmra.mrb[36].mxu0 %vm225_vm2, %v9491_v20 }
 0x148   : > { %8983 = vmatprep.mubr.msk.f32.mxu0 %vm9570_vm0, %v9568_v5 }
 0x1ea   : > { %v1208_v29 = vpop.f32.mrb[24].mxu1 }
 0x1eb   : > { %v8946_v30 = vpop.f32.mrb[25].mxu1 }
 0x1ee   : > { %v1356_v31 = vpop.f32.mrb[26].mxu1 }
 0x1ef   : > { %v8960_v32 = vpop.f32.mrb[27].mxu1 }
 0x1f0   : > { %v1939_v32 = vld [vmem:[%s10675_s1] sm:$0x3f] }
 0x1f2   : > { %v1474_v33 = vpop.f32.mrb[28].mxu1 }
 0x1f3   : > { %v1494_v34 = vrot.slane %v1474_v33, 2  ;;  %v8965_v35 = vpop.f32.mrb[29].mxu1 }
 0x1f4   : > { %v1477_v36 = vpop.f32.mrb[30].mxu1 }
 0x1f5   : > { %v1495_v37 = vrot.slane %v1477_v36, 2  ;;  %v8966_v38 = vpop.f32.mrb[31].mxu1 }
 0x1f7   : > { %v1496_v39 = vsel %vm337_vm3, %v1494_v34, %v1495_v37 }
 0x1fa   : > { %v1615_v40 = vpop.f32.mrb[32].mxu1 }
 0x1fb   : > { %v1635_v41 = vrot.slane %v1615_v40, 2  ;;  %v8971_v42 = vpop.f32.mrb[33].mxu1 }
 0x1fc   : > { %v1618_v43 = vpop.f32.mrb[34].mxu1 }
 0x1fd   : > { %v1636_v44 = vrot.slane %v1618_v43, 2  ;;  %v8972_v45 = vpop.f32.mrb[35].mxu1 }
 0x1ff   : > { %v1637_v46 = vsel %vm337_vm3, %v1635_v41, %v1636_v44  ;;  %v1946_v41 = vcombine.high %v1939_v32, %v1939_v32 }
 0x202   : > { %v1135_v47 = vpop.f32.mrb[24].mxu0  ;;  %v1757_v48 = vpop.f32.mrb[36].mxu1 }
 0x203   : > { %v9836_v49 = vadd.f32 %v1208_v29, %v1135_v47  ;;  %v8939_v50 = vpop.f32.mrb[25].mxu0  ;;  %v1777_v51 = vrot.slane %v1757_v48, 2  ;;  %v8977_v52 = vpop.f32.mrb[37].mxu1  ;;  %v8455_v48 = vld [vmem:[%s10675_s1 + $0xc] sm:$0x3f] }
 0x204   : > { %v1760_v53 = vpop.f32.mrb[38].mxu1  ;;  %v1960_v50 = vrot.slane %v1946_v41, %v9636_v13 }
 0x205   : > { %v1778_v54 = vrot.slane %v1760_v53, 2  ;;  %v8978_v55 = vpop.f32.mrb[39].mxu1 }
 0x206   : > { %v1283_v58 = vpop.f32.mrb[26].mxu0  ;;  %v2236_v55 = vrot.slane %v8455_v48, %v9636_v13 }
 0x207   : > { %v9838_v59 = vadd.f32 %v1356_v31, %v1283_v58  ;;  %v8953_v60 = vpop.f32.mrb[27].mxu0  ;;  %v1779_v61 = vsel %vm337_vm3, %v1777_v51, %v1778_v54  ;;  %v1972_v58 = vsel %vm229_vm1, %v1960_v50, 0 }
 0x208   : > { %v9493_v60 = vld [vmem:[%s9610_s22 + $0x18] sm:$0xff]  }
 0x20a   : > { %v1431_v62 = vpop.f32.mrb[28].mxu0 }
 0x20b   : > { %v1433_v63 = vpop.f32.mrb[29].mxu0 }
 0x20c   : > { %v1435_v0 = vpop.f32.mrb[30].mxu0  ;;  %v1485_v2 = vrot.slane %v1433_v63, 1  ;;  %v2244_v63 = vcombine.high %v2236_v55, %v2236_v55 }
 0x20d   : > { %v1437_v1 = vpop.f32.mrb[31].mxu0 }
 0x20e   : > { %v1486_v4 = vrot.slane %v1437_v1, 1  ;;  %v2229_v1 = vcombine.high %v8455_v48, %v8455_v48 }
 0x210   : > { %v1487_v6 = vsel %vm327_vm4, %v1485_v2, %v1486_v4  ;;  %v1491_v8 = vadd.f32 %v1486_v4, %v1435_v0  ;;  %v9495_v2 = vld [vmem:[%s9610_s22 + $0x20] sm:$0xff]   ;;  %v2243_v4 = vrot.slane %v2229_v1, %v9636_v13 }
 0x211   : > { %v1490_v9 = vadd.f32 %v1487_v6, %v1431_v62  ;;  %v2249_v6 = vsel %vm229_vm1, %v2236_v55, 0 }
 0x212   : > { %v1572_v10 = vpop.f32.mrb[32].mxu0  ;;  %v1500_v12 = vadd.f32 %v1495_v37, %v1491_v8  ;;  %v1953_v37 = vrot.slane %v1939_v32, %v9636_v13  ;;  %v2255_v8 = vsel %vm229_vm1, %v2243_v4, 0 }
 0x213   : > { %v1499_v14 = vadd.f32 %v1496_v39, %v1490_v9  ;;  %v1574_v15 = vpop.f32.mrb[33].mxu0  ;;  %v8448_v39 = vld [vmem:[%s10675_s1 + $0x6] sm:$0x3f] }
 0x214   : > { %v1576_v16 = vpop.f32.mrb[34].mxu0  ;;  %v1626_v20 = vrot.slane %v1574_v15, 1  ;;  %v2094_v45 = vrot.slane %v8448_v39, %v9636_v13  ;;  %v2087_v51 = vcombine.high %v8448_v39, %v8448_v39  ;;  %v1966_v53 = vsel %vm229_vm1, %v1953_v37, 0  ;;  %v9497_v9 = vld [vmem:[%s9610_s22 + $0x28] sm:$0xff]  }
 0x215   : > { %v1622_v17 = vadd.f32 %v1572_v10, %v1499_v14  ;;  %v1623_v18 = vadd.f32 %v1576_v16, %v1500_v12  ;;  %v1578_v19 = vpop.f32.mrb[35].mxu0 }
 0x216   : > { %v1627_v21 = vrot.slane %v1578_v19, 1  ;;  %v2107_v62 = vsel %vm229_vm1, %v2094_v45, 0 }
 0x218   : > { %v1628_v22 = vsel %vm327_vm4, %v1626_v20, %v1627_v21  ;;  %v1632_v23 = vadd.f32 %v1627_v21, %v1623_v18 }
 0x219   : > { %v1631_v56 = vadd.f32 %v1628_v22, %v1622_v17 }
 0x21a   : > { %v1714_v24 = vpop.f32.mrb[36].mxu0  ;;  %v1641_v26 = vadd.f32 %v1636_v44, %v1632_v23  ;;  %v1961_v44 = vcombine.high %v1953_v37, %v1953_v37 }
 0x21b   : > { %v1640_v11 = vadd.f32 %v1637_v46, %v1631_v56  ;;  %v1716_v27 = vpop.f32.mrb[37].mxu0 }
 0x21c   : > { %v1718_v28 = vpop.f32.mrb[38].mxu0  ;;  %v1768_v33 = vrot.slane %v1716_v27, 1 }
 0x21d   : > { %v1764_v29 = vadd.f32 %v1714_v24, %v1640_v11  ;;  %v1765_v30 = vadd.f32 %v1718_v28, %v1641_v26  ;;  %v1720_v31 = vpop.f32.mrb[39].mxu0 }
 0x21e   : > { %v1769_v34 = vrot.slane %v1720_v31, 1 }
 0x220   : > { %v1770_v35 = vsel %vm327_vm4, %v1768_v33, %v1769_v34  ;;  %v1774_v36 = vadd.f32 %v1769_v34, %v1765_v30 }
 0x221   : > { %v1773_v38 = vadd.f32 %v1770_v35, %v1764_v29 }
 0x222   : > { %v1783_v40 = vadd.f32 %v1778_v54, %v1774_v36  ;;  %v2102_v54 = vcombine.high %v2094_v45, %v2094_v45 }
 0x223   : > { %v1782_v42 = vadd.f32 %v1779_v61, %v1773_v38  ;;  %v2101_v61 = vrot.slane %v2087_v51, %v9636_v13 }
 0x224   : > { %8435 = vst [vmem:[%s9615_s25 + $0x28] sm:$0x3f] %v1783_v40  ;;  %v1862_v43 = vmul.f32 %v1783_v40, %v1783_v40 }
 0x225   : > { %8434 = vst [vmem:[%s9615_s25 + $0x20] sm:$0xff] %v1782_v42  ;;  %v9362_v46 = vpack.c.bf16 %v1783_v40, %v1782_v42  ;;  %v1861_v47 = vmul.f32 %v1782_v42, %v1782_v42  ;;  %v2113_v0 = vsel %vm229_vm1, %v2101_v61, 0 }
 0x227   : > { %v9366_v52 = vpack.c.bf16 %v1862_v43, %v1861_v47  ;;  %9364 = vmatpush3.bf16.msk.msra.mxu0 %vm9734_vm6, %v9362_v46 }
 0x228   : > { %8443 = vmatprep.subr.msk.bf16.mxu0 %vm229_vm1, %v1961_v44 }
 0x229   : > { %9368 = vmatpush3.bf16.msk.msra.mxu1 %vm9734_vm6, %v9366_v52 }
 0x22a   : > { %8984 = vmatmul.mubr.msk.f32.vlgmr.msra.gmra.mrb[40].mxu0 %vm1062_vm7, %v9573_v25  ;;  %8993 = vmatprep.subr.bf16.mxu1 %v9568_v5 }
 0x22b   : > { %1975 = vmatpush1.bf16.msra.mxu0 %v1966_v53  ;;  %2006 = vmatprep.mubr.bf16.mxu0 %v9569_v7 }
 0x22c   : > { %8991 = vmatmul.mubr.msk.f32.vlgmr.msra.gmra.mrb[40].mxu1 %vm1062_vm7, %v9573_v25  ;;  %8450 = vmatprep.subr.msk.bf16.mxu0 %vm229_vm1, %v2102_v54 }
 0x22d   : > { %8994 = vmatpush3.bf16.msra.mxu1 %v1972_v58  ;;  %8995 = vmatprep.mubr.msk.bf16.mxu1 %vm9570_vm0, %v9568_v5 }
 0x22e   : > { %8444 = vmatmul.mubr.msk.bf16.vlgmr.msra.gmra.mrb[44].mxu0 %vm225_vm2, %v9493_v60  ;;  %8999 = vmatprep.subr.bf16.mxu1 %v9568_v5 }
 0x22f   : > { %2116 = vmatpush1.bf16.msra.mxu0 %v2107_v62  ;;  %2147 = vmatprep.mubr.bf16.mxu0 %v9569_v7 }
 0x230   : > { %8996 = vmatmul.mubr.msk.bf16.vlgmr.msra.gmra.mrb[44].mxu1 %vm225_vm2, %v9493_v60  ;;  %8457 = vmatprep.subr.msk.bf16.mxu0 %vm229_vm1, %v2244_v63 }
 0x231   : > { %9000 = vmatpush3.bf16.msra.mxu1 %v2113_v0  ;;  %9001 = vmatprep.mubr.msk.bf16.mxu1 %vm9570_vm0, %v9568_v5 }
 0x232   : > { %9005 = vmatprep.subr.bf16.mxu1 %v9568_v5 }
 0x236   : > { %8451 = vmatmul.mubr.msk.bf16.vlgmr.msra.gmra.mrb[48].mxu0 %vm225_vm2, %v9495_v2 }
 0x237   : > { %2258 = vmatpush1.bf16.msra.mxu0 %v2249_v6  ;;  %2289 = vmatprep.mubr.bf16.mxu0 %v9569_v7 }
 0x238   : > { %9002 = vmatmul.mubr.msk.bf16.vlgmr.msra.gmra.mrb[48].mxu1 %vm225_vm2, %v9495_v2  ;;  %9369 = vmatprep.subr.bf16.mxu0 %v9571_v57  ;;  %v2516_v2 = vld [vmem:[%s10675_s1] sm:$0x3f] }
 0x239   : > { %9006 = vmatpush3.bf16.msra.mxu1 %v2255_v8  ;;  %9007 = vmatprep.mubr.msk.bf16.mxu1 %vm9570_vm0, %v9568_v5 }
 0x23a   : > { %9373 = vmatprep.subr.bf16.mxu1 %v9571_v57 }
 0x23e   : > { %8458 = vmatmul.mubr.msk.bf16.vlgmr.msra.gmra.mrb[52].mxu0 %vm225_vm2, %v9497_v9 }
 0x23f   : > { %9015 = vmatprep.mubr.msk.f32.mxu0 %vm9570_vm0, %v9568_v5 }
 0x240   : > { %9008 = vmatmul.mubr.msk.bf16.vlgmr.msra.gmra.mrb[52].mxu1 %vm225_vm2, %v9497_v9 }
 0x241   : > { %9022 = vmatprep.mubr.msk.f32.mxu1 %vm9570_vm0, %v9568_v5 }
 0x2fd   : > { %v1856_v10 = vpop.f32.mrb[40].mxu0 }
 0x2fe   : > { %v9906_v12 = vadd.f32 %v1856_v10, %v9836_v49  ;;  %v8985_v14 = vpop.f32.mrb[41].mxu0 }
 0x2ff   : > { %v1932_v15 = vpop.f32.mrb[40].mxu1 }
 0x300   : > { %v9909_v16 = vadd.f32 %v1932_v15, %v9838_v59  ;;  %v8992_v17 = vpop.f32.mrb[41].mxu1 }
 0x301   : > { %v2008_v18 = vpop.f32.mrb[44].mxu0  ;;  %v2530_v17 = vrot.slane %v2516_v2, %v9636_v13 }
 0x302   : > { %v2010_v19 = vpop.f32.mrb[45].mxu0 }
 0x303   : > { %v2012_v20 = vpop.f32.mrb[46].mxu0  ;;  %v2051_v21 = vpop.f32.mrb[44].mxu1  ;;  %v2062_v24 = vrot.slane %v2010_v19, 1 }
 0x304   : > { %v2071_v22 = vrot.slane %v2051_v21, 2  ;;  %v2014_v23 = vpop.f32.mrb[47].mxu0  ;;  %v8997_v56 = vpop.f32.mrb[45].mxu1 }
 0x305   : > { %v2063_v26 = vrot.slane %v2014_v23, 1  ;;  %v2054_v11 = vpop.f32.mrb[46].mxu1 }
 0x306   : > { %v2072_v27 = vrot.slane %v2054_v11, 2  ;;  %v8998_v28 = vpop.f32.mrb[47].mxu1 }
 0x307   : > { %v2064_v49 = vsel %vm327_vm4, %v2062_v24, %v2063_v26  ;;  %v2068_v29 = vadd.f32 %v2063_v26, %v2012_v20  ;;  %v8474_v20 = vld [vmem:[%s10675_s1 + $0x6] sm:$0x3f]  ;;  %v2538_v24 = vcombine.high %v2530_v17, %v2530_v17  ;;  %v8481_v28 = vld [vmem:[%s10675_s1 + $0xc] sm:$0x3f] }
 0x308   : > { %v2067_v30 = vadd.f32 %v2064_v49, %v2008_v18  ;;  %v2073_v59 = vsel %vm337_vm3, %v2071_v22, %v2072_v27  ;;  %v2523_v22 = vcombine.high %v2516_v2, %v2516_v2  ;;  %v2671_v26 = vrot.slane %v8474_v20, %v9636_v13 }
 0x309   : > { %v2149_v31 = vpop.f32.mrb[48].mxu0  ;;  %v2077_v32 = vadd.f32 %v2072_v27, %v2068_v29  ;;  %v2664_v29 = vcombine.high %v8474_v20, %v8474_v20 }
 0x30a   : > { %v2076_v33 = vadd.f32 %v2073_v59, %v2067_v30  ;;  %v2151_v34 = vpop.f32.mrb[49].mxu0  ;;  %v2537_v49 = vrot.slane %v2523_v22, %v9636_v13  ;;  %v2543_v59 = vsel %vm229_vm1, %v2530_v17, 0 }
 0x30b   : > { %v2153_v35 = vpop.f32.mrb[50].mxu0  ;;  %v2192_v36 = vpop.f32.mrb[48].mxu1  ;;  %v2203_v42 = vrot.slane %v2151_v34, 1  ;;  %v9499_v34 = vld [vmem:[%s9610_s22 + $0x20] sm:$0xff]  }
 0x30c   : > { %v2199_v37 = vadd.f32 %v2149_v31, %v2076_v33  ;;  %v2200_v38 = vadd.f32 %v2153_v35, %v2077_v32  ;;  %v2212_v39 = vrot.slane %v2192_v36, 2  ;;  %v2155_v40 = vpop.f32.mrb[51].mxu0  ;;  %v9003_v41 = vpop.f32.mrb[49].mxu1  ;;  %v2679_v31 = vcombine.high %v2671_v26, %v2671_v26 }
 0x30d   : > { %v2204_v43 = vrot.slane %v2155_v40, 1  ;;  %v2195_v44 = vpop.f32.mrb[50].mxu1  ;;  %v2813_v32 = vrot.slane %v8481_v28, %v9636_v13  ;;  %v2549_v33 = vsel %vm229_vm1, %v2537_v49, 0  ;;  %v2678_v35 = vrot.slane %v2664_v29, %v9636_v13  ;;  %v9501_v40 = vld [vmem:[%s9610_s22 + $0x28] sm:$0xff]  }
 0x30e   : > { %v2213_v45 = vrot.slane %v2195_v44, 2  ;;  %v9004_v46 = vpop.f32.mrb[51].mxu1  ;;  %v2684_v36 = vsel %vm229_vm1, %v2671_v26, 0  ;;  %v9503_v44 = vld [vmem:[%s9610_s22 + $0x30] sm:$0xff]  }
 0x30f   : > { %v2205_v47 = vsel %vm327_vm4, %v2203_v42, %v2204_v43  ;;  %v2209_v48 = vadd.f32 %v2204_v43, %v2200_v38  ;;  %v2690_v38 = vsel %vm229_vm1, %v2678_v35, 0  ;;  %v2826_v42 = vsel %vm229_vm1, %v2813_v32, 0 }
 0x310   : > { %v2208_v50 = vadd.f32 %v2205_v47, %v2199_v37  ;;  %v2214_v51 = vsel %vm337_vm3, %v2212_v39, %v2213_v45  ;;  %v2821_v37 = vcombine.high %v2813_v32, %v2813_v32  ;;  %v2806_v39 = vcombine.high %v8481_v28, %v8481_v28 }
 0x311   : > { %v2291_v52 = vpop.f32.mrb[52].mxu0  ;;  %v2218_v53 = vadd.f32 %v2213_v45, %v2209_v48 }
 0x312   : > { %v2217_v54 = vadd.f32 %v2214_v51, %v2208_v50  ;;  %v2293_v55 = vpop.f32.mrb[53].mxu0  ;;  %v2820_v41 = vrot.slane %v2806_v39, %v9636_v13 }
 0x313   : > { %v2295_v58 = vpop.f32.mrb[54].mxu0  ;;  %v2334_v60 = vpop.f32.mrb[52].mxu1  ;;  %v2345_v4 = vrot.slane %v2293_v55, 1 }
 0x314   : > { %v2341_v61 = vadd.f32 %v2291_v52, %v2217_v54  ;;  %v2342_v62 = vadd.f32 %v2295_v58, %v2218_v53  ;;  %v2354_v63 = vrot.slane %v2334_v60, 2  ;;  %v2297_v0 = vpop.f32.mrb[55].mxu0  ;;  %v9009_v1 = vpop.f32.mrb[53].mxu1  ;;  %v2832_v43 = vsel %vm229_vm1, %v2820_v41, 0 }
 0x315   : > { %v2346_v6 = vrot.slane %v2297_v0, 1  ;;  %v2337_v8 = vpop.f32.mrb[54].mxu1 }
 0x316   : > { %v2355_v9 = vrot.slane %v2337_v8, 2  ;;  %v9010_v10 = vpop.f32.mrb[55].mxu1 }
 0x317   : > { %v2347_v14 = vsel %vm327_vm4, %v2345_v4, %v2346_v6  ;;  %v2351_v15 = vadd.f32 %v2346_v6, %v2342_v62 }
 0x318   : > { %v2350_v18 = vadd.f32 %v2347_v14, %v2341_v61  ;;  %v2356_v19 = vsel %vm337_vm3, %v2354_v63, %v2355_v9 }
 0x319   : > { %v2360_v21 = vadd.f32 %v2355_v9, %v2351_v15 }
 0x31a   : > { %v2359_v23 = vadd.f32 %v2356_v19, %v2350_v18 }
 0x31b   : > { %8461 = vst [vmem:[%s9615_s25 + $0x38] sm:$0x3f] %v2360_v21  ;;  %v2439_v56 = vmul.f32 %v2360_v21, %v2360_v21 }
 0x31c   : > { %8460 = vst [vmem:[%s9615_s25 + $0x30] sm:$0xff] %v2359_v23  ;;  %v9370_v11 = vpack.c.bf16 %v2360_v21, %v2359_v23  ;;  %v2438_v27 = vmul.f32 %v2359_v23, %v2359_v23 }
 0x31e   : > { %v9374_v30 = vpack.c.bf16 %v2439_v56, %v2438_v27  ;;  %9372 = vmatpush3.bf16.msk.msra.mxu0 %vm9734_vm6, %v9370_v11 }
 0x31f   : > { %8469 = vmatprep.subr.msk.bf16.mxu0 %vm229_vm1, %v2538_v24 }
 0x320   : > { %9376 = vmatpush3.bf16.msk.msra.mxu1 %vm9734_vm6, %v9374_v30 }
 0x321   : > { %9016 = vmatmul.mubr.msk.f32.vlgmr.msra.gmra.mrb[42].mxu0 %vm1062_vm7, %v9573_v25  ;;  %9025 = vmatprep.subr.bf16.mxu1 %v9568_v5 }
 0x322   : > { %2552 = vmatpush1.bf16.msra.mxu0 %v2543_v59  ;;  %2583 = vmatprep.mubr.bf16.mxu0 %v9569_v7 }
 0x323   : > { %9023 = vmatmul.mubr.msk.f32.vlgmr.msra.gmra.mrb[42].mxu1 %vm1062_vm7, %v9573_v25  ;;  %8476 = vmatprep.subr.msk.bf16.mxu0 %vm229_vm1, %v2679_v31 }
 0x324   : > { %9026 = vmatpush3.bf16.msra.mxu1 %v2549_v33  ;;  %9027 = vmatprep.mubr.msk.bf16.mxu1 %vm9570_vm0, %v9568_v5 }
 0x325   : > { %8470 = vmatmul.mubr.msk.bf16.vlgmr.msra.gmra.mrb[56].mxu0 %vm225_vm2, %v9499_v34  ;;  %9031 = vmatprep.subr.bf16.mxu1 %v9568_v5 }
 0x326   : > { %2693 = vmatpush1.bf16.msra.mxu0 %v2684_v36  ;;  %2724 = vmatprep.mubr.bf16.mxu0 %v9569_v7 }
 0x327   : > { %9028 = vmatmul.mubr.msk.bf16.vlgmr.msra.gmra.mrb[56].mxu1 %vm225_vm2, %v9499_v34  ;;  %8483 = vmatprep.subr.msk.bf16.mxu0 %vm229_vm1, %v2821_v37 }
 0x328   : > { %9032 = vmatpush3.bf16.msra.mxu1 %v2690_v38  ;;  %9033 = vmatprep.mubr.msk.bf16.mxu1 %vm9570_vm0, %v9568_v5 }
 0x329   : > { %9037 = vmatprep.subr.bf16.mxu1 %v9568_v5 }
 0x32d   : > { %8477 = vmatmul.mubr.msk.bf16.vlgmr.msra.gmra.mrb[60].mxu0 %vm225_vm2, %v9501_v40 }
 0x32e   : > { %2835 = vmatpush1.bf16.msra.mxu0 %v2826_v42  ;;  %2866 = vmatprep.mubr.bf16.mxu0 %v9569_v7 }
 0x32f   : > { %9034 = vmatmul.mubr.msk.bf16.vlgmr.msra.gmra.mrb[60].mxu1 %vm225_vm2, %v9501_v40  ;;  %9377 = vmatprep.subr.bf16.mxu0 %v9571_v57  ;;  %v3093_v40 = vld [vmem:[%s10675_s1] sm:$0x3f] }
 0x330   : > { %9038 = vmatpush3.bf16.msra.mxu1 %v2832_v43  ;;  %9039 = vmatprep.mubr.msk.bf16.mxu1 %vm9570_vm0, %v9568_v5 }
 0x331   : > { %9381 = vmatprep.subr.bf16.mxu1 %v9571_v57 }
 0x335   : > { %8484 = vmatmul.mubr.msk.bf16.vlgmr.msra.gmra.mrb[64].mxu0 %vm225_vm2, %v9503_v44 }
 0x336   : > { %9047 = vmatprep.mubr.msk.f32.mxu0 %vm9570_vm0, %v9568_v5 }
 0x337   : > { %9040 = vmatmul.mubr.msk.bf16.vlgmr.msra.gmra.mrb[64].mxu1 %vm225_vm2, %v9503_v44 }
 0x338   : > { %9054 = vmatprep.mubr.msk.f32.mxu1 %vm9570_vm0, %v9568_v5 }
 0x3f4   : > { %v2433_v45 = vpop.f32.mrb[42].mxu0 }
 0x3f5   : > { %v9979_v46 = vadd.f32 %v2433_v45, %v9906_v12  ;;  %v9017_v47 = vpop.f32.mrb[43].mxu0 }
 0x3f6   : > { %v2509_v48 = vpop.f32.mrb[42].mxu1 }
 0x3f7   : > { %v9982_v50 = vadd.f32 %v2509_v48, %v9909_v16  ;;  %v9024_v51 = vpop.f32.mrb[43].mxu1 }
 0x3f8   : > { %v2585_v52 = vpop.f32.mrb[56].mxu0  ;;  %v3107_v51 = vrot.slane %v3093_v40, %v9636_v13 }
 0x3f9   : > { %v2587_v53 = vpop.f32.mrb[57].mxu0 }
 0x3fa   : > { %v2589_v54 = vpop.f32.mrb[58].mxu0  ;;  %v2628_v55 = vpop.f32.mrb[56].mxu1  ;;  %v2639_v62 = vrot.slane %v2587_v53, 1 }
 0x3fb   : > { %v2648_v58 = vrot.slane %v2628_v55, 2  ;;  %v2591_v60 = vpop.f32.mrb[59].mxu0  ;;  %v9029_v61 = vpop.f32.mrb[57].mxu1 }
 0x3fc   : > { %v2640_v63 = vrot.slane %v2591_v60, 1  ;;  %v2631_v0 = vpop.f32.mrb[58].mxu1 }
 0x3fd   : > { %v2649_v1 = vrot.slane %v2631_v0, 2  ;;  %v9030_v2 = vpop.f32.mrb[59].mxu1 }
 0x3fe   : > { %v2641_v12 = vsel %vm327_vm4, %v2639_v62, %v2640_v63  ;;  %v2645_v4 = vadd.f32 %v2640_v63, %v2589_v54  ;;  %v8500_v54 = vld [vmem:[%s10675_s1 + $0x6] sm:$0x3f]  ;;  %v3115_v62 = vcombine.high %v3107_v51, %v3107_v51  ;;  %v8507_v2 = vld [vmem:[%s10675_s1 + $0xc] sm:$0x3f] }
 0x3ff   : > { %v2644_v6 = vadd.f32 %v2641_v12, %v2585_v52  ;;  %v2650_v16 = vsel %vm337_vm3, %v2648_v58, %v2649_v1  ;;  %v3100_v58 = vcombine.high %v3093_v40, %v3093_v40  ;;  %v3248_v63 = vrot.slane %v8500_v54, %v9636_v13 }
 0x400   : > { %v2726_v8 = vpop.f32.mrb[60].mxu0  ;;  %v2654_v9 = vadd.f32 %v2649_v1, %v2645_v4  ;;  %v3241_v4 = vcombine.high %v8500_v54, %v8500_v54 }
 0x401   : > { %v2653_v10 = vadd.f32 %v2650_v16, %v2644_v6  ;;  %v2728_v14 = vpop.f32.mrb[61].mxu0  ;;  %v3114_v12 = vrot.slane %v3100_v58, %v9636_v13  ;;  %v3120_v16 = vsel %vm229_vm1, %v3107_v51, 0 }
 0x402   : > { %v2730_v15 = vpop.f32.mrb[62].mxu0  ;;  %v2769_v17 = vpop.f32.mrb[60].mxu1  ;;  %v2780_v23 = vrot.slane %v2728_v14, 1  ;;  %v9505_v14 = vld [vmem:[%s9610_s22 + $0x28] sm:$0xff]  }
 0x403   : > { %v2776_v18 = vadd.f32 %v2726_v8, %v2653_v10  ;;  %v2777_v19 = vadd.f32 %v2730_v15, %v2654_v9  ;;  %v2789_v20 = vrot.slane %v2769_v17, 2  ;;  %v2732_v21 = vpop.f32.mrb[63].mxu0  ;;  %v9035_v22 = vpop.f32.mrb[61].mxu1  ;;  %v3256_v8 = vcombine.high %v3248_v63, %v3248_v63 }
 0x404   : > { %v2781_v56 = vrot.slane %v2732_v21, 1  ;;  %v2772_v24 = vpop.f32.mrb[62].mxu1  ;;  %v3390_v9 = vrot.slane %v8507_v2, %v9636_v13  ;;  %v3126_v10 = vsel %vm229_vm1, %v3114_v12, 0  ;;  %v3255_v15 = vrot.slane %v3241_v4, %v9636_v13  ;;  %v9507_v21 = vld [vmem:[%s9610_s22 + $0x30] sm:$0xff]  }
 0x405   : > { %v2790_v26 = vrot.slane %v2772_v24, 2  ;;  %v9036_v11 = vpop.f32.mrb[63].mxu1  ;;  %v3261_v17 = vsel %vm229_vm1, %v3248_v63, 0  ;;  %v9509_v24 = vld [vmem:[%s9610_s22 + $0x38] sm:$0xff]  }
 0x406   : > { %v2782_v27 = vsel %vm327_vm4, %v2780_v23, %v2781_v56  ;;  %v2786_v28 = vadd.f32 %v2781_v56, %v2777_v19  ;;  %v3267_v19 = vsel %vm229_vm1, %v3255_v15, 0  ;;  %v3403_v23 = vsel %vm229_vm1, %v3390_v9, 0 }
 0x407   : > { %v2785_v49 = vadd.f32 %v2782_v27, %v2776_v18  ;;  %v2791_v29 = vsel %vm337_vm3, %v2789_v20, %v2790_v26  ;;  %v3398_v18 = vcombine.high %v3390_v9, %v3390_v9  ;;  %v3383_v20 = vcombine.high %v8507_v2, %v8507_v2 }
 0x408   : > { %v2868_v30 = vpop.f32.mrb[64].mxu0  ;;  %v2795_v59 = vadd.f32 %v2790_v26, %v2786_v28 }
 0x409   : > { %v2794_v31 = vadd.f32 %v2791_v29, %v2785_v49  ;;  %v2870_v32 = vpop.f32.mrb[65].mxu0  ;;  %v3397_v22 = vrot.slane %v3383_v20, %v9636_v13 }
 0x40a   : > { %v2872_v33 = vpop.f32.mrb[66].mxu0  ;;  %v2911_v34 = vpop.f32.mrb[64].mxu1  ;;  %v2922_v41 = vrot.slane %v2870_v32, 1 }
 0x40b   : > { %v2918_v35 = vadd.f32 %v2868_v30, %v2794_v31  ;;  %v2919_v36 = vadd.f32 %v2872_v33, %v2795_v59  ;;  %v2931_v37 = vrot.slane %v2911_v34, 2  ;;  %v2874_v38 = vpop.f32.mrb[67].mxu0  ;;  %v9041_v39 = vpop.f32.mrb[65].mxu1  ;;  %v3409_v56 = vsel %vm229_vm1, %v3397_v22, 0 }
 0x40c   : > { %v2923_v42 = vrot.slane %v2874_v38, 1  ;;  %v2914_v43 = vpop.f32.mrb[66].mxu1 }
 0x40d   : > { %v2932_v44 = vrot.slane %v2914_v43, 2  ;;  %v9042_v45 = vpop.f32.mrb[67].mxu1 }
 0x40e   : > { %v2924_v47 = vsel %vm327_vm4, %v2922_v41, %v2923_v42  ;;  %v2928_v48 = vadd.f32 %v2923_v42, %v2919_v36 }
 0x40f   : > { %v2927_v52 = vadd.f32 %v2924_v47, %v2918_v35  ;;  %v2933_v53 = vsel %vm337_vm3, %v2931_v37, %v2932_v44 }
 0x410   : > { %v2937_v55 = vadd.f32 %v2932_v44, %v2928_v48 }
 0x411   : > { %v2936_v60 = vadd.f32 %v2933_v53, %v2927_v52 }
 0x412   : > { %8487 = vst [vmem:[%s9615_s25 + $0x48] sm:$0x3f] %v2937_v55  ;;  %v3016_v61 = vmul.f32 %v2937_v55, %v2937_v55 }
 0x413   : > { %8486 = vst [vmem:[%s9615_s25 + $0x40] sm:$0xff] %v2936_v60  ;;  %v9378_v0 = vpack.c.bf16 %v2937_v55, %v2936_v60  ;;  %v3015_v1 = vmul.f32 %v2936_v60, %v2936_v60 }
 0x415   : > { %v9382_v6 = vpack.c.bf16 %v3016_v61, %v3015_v1  ;;  %9380 = vmatpush3.bf16.msk.msra.mxu0 %vm9734_vm6, %v9378_v0 }
 0x416   : > { %8495 = vmatprep.subr.msk.bf16.mxu0 %vm229_vm1, %v3115_v62 }
 0x417   : > { %9384 = vmatpush3.bf16.msk.msra.mxu1 %vm9734_vm6, %v9382_v6 }
 0x418   : > { %9048 = vmatmul.mubr.msk.f32.vlgmr.msra.gmra.mrb[68].mxu0 %vm1062_vm7, %v9573_v25  ;;  %9057 = vmatprep.subr.bf16.mxu1 %v9568_v5 }
 0x419   : > { %3129 = vmatpush1.bf16.msra.mxu0 %v3120_v16  ;;  %3160 = vmatprep.mubr.bf16.mxu0 %v9569_v7 }
 0x41a   : > { %9055 = vmatmul.mubr.msk.f32.vlgmr.msra.gmra.mrb[68].mxu1 %vm1062_vm7, %v9573_v25  ;;  %8502 = vmatprep.subr.msk.bf16.mxu0 %vm229_vm1, %v3256_v8 }
 0x41b   : > { %9058 = vmatpush3.bf16.msra.mxu1 %v3126_v10  ;;  %9059 = vmatprep.mubr.msk.bf16.mxu1 %vm9570_vm0, %v9568_v5 }
 0x41c   : > { %8496 = vmatmul.mubr.msk.bf16.vlgmr.msra.gmra.mrb[72].mxu0 %vm225_vm2, %v9505_v14  ;;  %9063 = vmatprep.subr.bf16.mxu1 %v9568_v5 }
 0x41d   : > { %3270 = vmatpush1.bf16.msra.mxu0 %v3261_v17  ;;  %3301 = vmatprep.mubr.bf16.mxu0 %v9569_v7 }
 0x41e   : > { %9060 = vmatmul.mubr.msk.bf16.vlgmr.msra.gmra.mrb[72].mxu1 %vm225_vm2, %v9505_v14  ;;  %8509 = vmatprep.subr.msk.bf16.mxu0 %vm229_vm1, %v3398_v18 }
 0x41f   : > { %9064 = vmatpush3.bf16.msra.mxu1 %v3267_v19  ;;  %9065 = vmatprep.mubr.msk.bf16.mxu1 %vm9570_vm0, %v9568_v5 }
 0x420   : > { %9069 = vmatprep.subr.bf16.mxu1 %v9568_v5 }
 0x424   : > { %8503 = vmatmul.mubr.msk.bf16.vlgmr.msra.gmra.mrb[76].mxu0 %vm225_vm2, %v9507_v21 }
 0x425   : > { %3412 = vmatpush1.bf16.msra.mxu0 %v3403_v23  ;;  %3443 = vmatprep.mubr.bf16.mxu0 %v9569_v7 }
 0x426   : > { %9066 = vmatmul.mubr.msk.bf16.vlgmr.msra.gmra.mrb[76].mxu1 %vm225_vm2, %v9507_v21  ;;  %9385 = vmatprep.subr.bf16.mxu0 %v9571_v57  ;;  %v3670_v21 = vld [vmem:[%s10675_s1] sm:$0x3f] }
 0x427   : > { %9070 = vmatpush3.bf16.msra.mxu1 %v3409_v56  ;;  %9071 = vmatprep.mubr.msk.bf16.mxu1 %vm9570_vm0, %v9568_v5 }
 0x428   : > { %9389 = vmatprep.subr.bf16.mxu1 %v9571_v57 }
 0x42c   : > { %8510 = vmatmul.mubr.msk.bf16.vlgmr.msra.gmra.mrb[80].mxu0 %vm225_vm2, %v9509_v24 }
 0x42d   : > { %9079 = vmatprep.mubr.msk.f32.mxu0 %vm9570_vm0, %v9568_v5 }
 0x42e   : > { %9072 = vmatmul.mubr.msk.bf16.vlgmr.msra.gmra.mrb[80].mxu1 %vm225_vm2, %v9509_v24 }
 0x42f   : > { %9086 = vmatprep.mubr.msk.f32.mxu1 %vm9570_vm0, %v9568_v5 }
 0x4eb   : > { %v3010_v26 = vpop.f32.mrb[68].mxu0 }
 0x4ec   : > { %v10052_v11 = vadd.f32 %v3010_v26, %v9979_v46  ;;  %v9049_v27 = vpop.f32.mrb[69].mxu0 }
 0x4ed   : > { %v3086_v28 = vpop.f32.mrb[68].mxu1 }
 0x4ee   : > { %v10055_v49 = vadd.f32 %v3086_v28, %v9982_v50  ;;  %v9056_v29 = vpop.f32.mrb[69].mxu1 }
 0x4ef   : > { %v3162_v30 = vpop.f32.mrb[72].mxu0  ;;  %v3684_v29 = vrot.slane %v3670_v21, %v9636_v13 }
 0x4f0   : > { %v3164_v59 = vpop.f32.mrb[73].mxu0 }
 0x4f1   : > { %v3166_v31 = vpop.f32.mrb[74].mxu0  ;;  %v3205_v32 = vpop.f32.mrb[72].mxu1  ;;  %v3216_v36 = vrot.slane %v3164_v59, 1 }
 0x4f2   : > { %v3225_v33 = vrot.slane %v3205_v32, 2  ;;  %v3168_v34 = vpop.f32.mrb[75].mxu0  ;;  %v9061_v35 = vpop.f32.mrb[73].mxu1 }
 0x4f3   : > { %v3217_v37 = vrot.slane %v3168_v34, 1  ;;  %v3208_v38 = vpop.f32.mrb[74].mxu1 }
 0x4f4   : > { %v3226_v39 = vrot.slane %v3208_v38, 2  ;;  %v9062_v40 = vpop.f32.mrb[75].mxu1 }
 0x4f5   : > { %v3218_v46 = vsel %vm327_vm4, %v3216_v36, %v3217_v37  ;;  %v3222_v41 = vadd.f32 %v3217_v37, %v3166_v31  ;;  %v8526_v31 = vld [vmem:[%s10675_s1 + $0x6] sm:$0x3f]  ;;  %v3692_v36 = vcombine.high %v3684_v29, %v3684_v29  ;;  %v8533_v40 = vld [vmem:[%s10675_s1 + $0xc] sm:$0x3f] }
 0x4f6   : > { %v3221_v42 = vadd.f32 %v3218_v46, %v3162_v30  ;;  %v3227_v50 = vsel %vm337_vm3, %v3225_v33, %v3226_v39  ;;  %v3677_v33 = vcombine.high %v3670_v21, %v3670_v21  ;;  %v3825_v37 = vrot.slane %v8526_v31, %v9636_v13 }
 0x4f7   : > { %v3303_v43 = vpop.f32.mrb[76].mxu0  ;;  %v3231_v44 = vadd.f32 %v3226_v39, %v3222_v41  ;;  %v3818_v41 = vcombine.high %v8526_v31, %v8526_v31 }
 0x4f8   : > { %v3230_v45 = vadd.f32 %v3227_v50, %v3221_v42  ;;  %v3305_v47 = vpop.f32.mrb[77].mxu0  ;;  %v3691_v46 = vrot.slane %v3677_v33, %v9636_v13  ;;  %v3697_v50 = vsel %vm229_vm1, %v3684_v29, 0 }
 0x4f9   : > { %v3307_v48 = vpop.f32.mrb[78].mxu0  ;;  %v3346_v51 = vpop.f32.mrb[76].mxu1  ;;  %v3357_v60 = vrot.slane %v3305_v47, 1  ;;  %v9511_v47 = vld [vmem:[%s9610_s22 + $0x30] sm:$0xff]  }
 0x4fa   : > { %v3353_v52 = vadd.f32 %v3303_v43, %v3230_v45  ;;  %v3354_v53 = vadd.f32 %v3307_v48, %v3231_v44  ;;  %v3366_v54 = vrot.slane %v3346_v51, 2  ;;  %v3309_v55 = vpop.f32.mrb[79].mxu0  ;;  %v9067_v58 = vpop.f32.mrb[77].mxu1  ;;  %v3833_v43 = vcombine.high %v3825_v37, %v3825_v37 }
 0x4fb   : > { %v3358_v61 = vrot.slane %v3309_v55, 1  ;;  %v3349_v62 = vpop.f32.mrb[78].mxu1  ;;  %v3967_v44 = vrot.slane %v8533_v40, %v9636_v13  ;;  %v3703_v45 = vsel %vm229_vm1, %v3691_v46, 0  ;;  %v3832_v48 = vrot.slane %v3818_v41, %v9636_v13  ;;  %v9513_v55 = vld [vmem:[%s9610_s22 + $0x38] sm:$0xff]  }
 0x4fc   : > { %v3367_v63 = vrot.slane %v3349_v62, 2  ;;  %v9068_v0 = vpop.f32.mrb[79].mxu1  ;;  %v3838_v51 = vsel %vm229_vm1, %v3825_v37, 0  ;;  %v9515_v62 = vld [vmem:[%s9610_s22 + $0x40] sm:$0xff]  }
 0x4fd   : > { %v3359_v1 = vsel %vm327_vm4, %v3357_v60, %v3358_v61  ;;  %v3363_v2 = vadd.f32 %v3358_v61, %v3354_v53  ;;  %v3844_v53 = vsel %vm229_vm1, %v3832_v48, 0  ;;  %v3980_v60 = vsel %vm229_vm1, %v3967_v44, 0 }
 0x4fe   : > { %v3362_v12 = vadd.f32 %v3359_v1, %v3353_v52  ;;  %v3368_v4 = vsel %vm337_vm3, %v3366_v54, %v3367_v63  ;;  %v3975_v52 = vcombine.high %v3967_v44, %v3967_v44  ;;  %v3960_v54 = vcombine.high %v8533_v40, %v8533_v40 }
 0x4ff   : > { %v3445_v6 = vpop.f32.mrb[80].mxu0  ;;  %v3372_v16 = vadd.f32 %v3367_v63, %v3363_v2 }
 0x500   : > { %v3371_v8 = vadd.f32 %v3368_v4, %v3362_v12  ;;  %v3447_v9 = vpop.f32.mrb[81].mxu0  ;;  %v3974_v58 = vrot.slane %v3960_v54, %v9636_v13 }
 0x501   : > { %v3449_v10 = vpop.f32.mrb[82].mxu0  ;;  %v3488_v14 = vpop.f32.mrb[80].mxu1  ;;  %v3499_v22 = vrot.slane %v3447_v9, 1 }
 0x502   : > { %v3495_v15 = vadd.f32 %v3445_v6, %v3371_v8  ;;  %v3496_v17 = vadd.f32 %v3449_v10, %v3372_v16  ;;  %v3508_v18 = vrot.slane %v3488_v14, 2  ;;  %v3451_v19 = vpop.f32.mrb[83].mxu0  ;;  %v9073_v20 = vpop.f32.mrb[81].mxu1  ;;  %v3986_v61 = vsel %vm229_vm1, %v3974_v58, 0 }
 0x503   : > { %v3500_v23 = vrot.slane %v3451_v19, 1  ;;  %v3491_v56 = vpop.f32.mrb[82].mxu1 }
 0x504   : > { %v3509_v24 = vrot.slane %v3491_v56, 2  ;;  %v9074_v26 = vpop.f32.mrb[83].mxu1 }
 0x505   : > { %v3501_v27 = vsel %vm327_vm4, %v3499_v22, %v3500_v23  ;;  %v3505_v28 = vadd.f32 %v3500_v23, %v3496_v17 }
 0x506   : > { %v3504_v30 = vadd.f32 %v3501_v27, %v3495_v15  ;;  %v3510_v59 = vsel %vm337_vm3, %v3508_v18, %v3509_v24 }
 0x507   : > { %v3514_v32 = vadd.f32 %v3509_v24, %v3505_v28 }
 0x508   : > { %v3513_v34 = vadd.f32 %v3510_v59, %v3504_v30 }
 0x509   : > { %8513 = vst [vmem:[%s9615_s25 + $0x58] sm:$0x3f] %v3514_v32  ;;  %v3593_v35 = vmul.f32 %v3514_v32, %v3514_v32 }
 0x50a   : > { %8512 = vst [vmem:[%s9615_s25 + $0x50] sm:$0xff] %v3513_v34  ;;  %v9386_v38 = vpack.c.bf16 %v3514_v32, %v3513_v34  ;;  %v3592_v39 = vmul.f32 %v3513_v34, %v3513_v34 }
 0x50c   : > { %v9390_v42 = vpack.c.bf16 %v3593_v35, %v3592_v39  ;;  %9388 = vmatpush3.bf16.msk.msra.mxu0 %vm9734_vm6, %v9386_v38 }
 0x50d   : > { %8521 = vmatprep.subr.msk.bf16.mxu0 %vm229_vm1, %v3692_v36 }
 0x50e   : > { %9392 = vmatpush3.bf16.msk.msra.mxu1 %vm9734_vm6, %v9390_v42 }
 0x50f   : > { %9080 = vmatmul.mubr.msk.f32.vlgmr.msra.gmra.mrb[70].mxu0 %vm1062_vm7, %v9573_v25  ;;  %9089 = vmatprep.subr.bf16.mxu1 %v9568_v5 }
 0x510   : > { %3706 = vmatpush1.bf16.msra.mxu0 %v3697_v50  ;;  %3737 = vmatprep.mubr.bf16.mxu0 %v9569_v7 }
 0x511   : > { %9087 = vmatmul.mubr.msk.f32.vlgmr.msra.gmra.mrb[70].mxu1 %vm1062_vm7, %v9573_v25  ;;  %8528 = vmatprep.subr.msk.bf16.mxu0 %vm229_vm1, %v3833_v43 }
 0x512   : > { %9090 = vmatpush3.bf16.msra.mxu1 %v3703_v45  ;;  %9091 = vmatprep.mubr.msk.bf16.mxu1 %vm9570_vm0, %v9568_v5 }
 0x513   : > { %8522 = vmatmul.mubr.msk.bf16.vlgmr.msra.gmra.mrb[84].mxu0 %vm225_vm2, %v9511_v47  ;;  %9095 = vmatprep.subr.bf16.mxu1 %v9568_v5 }
 0x514   : > { %3847 = vmatpush1.bf16.msra.mxu0 %v3838_v51  ;;  %3878 = vmatprep.mubr.bf16.mxu0 %v9569_v7 }
 0x515   : > { %9092 = vmatmul.mubr.msk.bf16.vlgmr.msra.gmra.mrb[84].mxu1 %vm225_vm2, %v9511_v47  ;;  %8535 = vmatprep.subr.msk.bf16.mxu0 %vm229_vm1, %v3975_v52 }
 0x516   : > { %9096 = vmatpush3.bf16.msra.mxu1 %v3844_v53  ;;  %9097 = vmatprep.mubr.msk.bf16.mxu1 %vm9570_vm0, %v9568_v5 }
 0x517   : > { %9101 = vmatprep.subr.bf16.mxu1 %v9568_v5 }
 0x51b   : > { %8529 = vmatmul.mubr.msk.bf16.vlgmr.msra.gmra.mrb[88].mxu0 %vm225_vm2, %v9513_v55 }
 0x51c   : > { %3989 = vmatpush1.bf16.msra.mxu0 %v3980_v60  ;;  %4020 = vmatprep.mubr.bf16.mxu0 %v9569_v7 }
 0x51d   : > { %9098 = vmatmul.mubr.msk.bf16.vlgmr.msra.gmra.mrb[88].mxu1 %vm225_vm2, %v9513_v55  ;;  %9393 = vmatprep.subr.bf16.mxu0 %v9571_v57  ;;  %v4247_v55 = vld [vmem:[%s10675_s1] sm:$0x3f] }
 0x51e   : > { %9102 = vmatpush3.bf16.msra.mxu1 %v3986_v61  ;;  %9103 = vmatprep.mubr.msk.bf16.mxu1 %vm9570_vm0, %v9568_v5 }
 0x51f   : > { %9397 = vmatprep.subr.bf16.mxu1 %v9571_v57 }
 0x523   : > { %8536 = vmatmul.mubr.msk.bf16.vlgmr.msra.gmra.mrb[92].mxu0 %vm225_vm2, %v9515_v62 }
 0x524   : > { %9111 = vmatprep.mubr.msk.f32.mxu0 %vm9570_vm0, %v9568_v5 }
 0x525   : > { %9104 = vmatmul.mubr.msk.bf16.vlgmr.msra.gmra.mrb[92].mxu1 %vm225_vm2, %v9515_v62 }
 0x526   : > { %9118 = vmatprep.mubr.msk.f32.mxu1 %vm9570_vm0, %v9568_v5 }
 0x5e2   : > { %v3587_v63 = vpop.f32.mrb[70].mxu0 }
 0x5e3   : > { %v10125_v0 = vadd.f32 %v3587_v63, %v10052_v11  ;;  %v9081_v1 = vpop.f32.mrb[71].mxu0 }
 0x5e4   : > { %v3663_v2 = vpop.f32.mrb[70].mxu1 }
 0x5e5   : > { %v10128_v12 = vadd.f32 %v3663_v2, %v10055_v49  ;;  %v9088_v4 = vpop.f32.mrb[71].mxu1 }
 0x5e6   : > { %v3739_v6 = vpop.f32.mrb[84].mxu0  ;;  %v4261_v4 = vrot.slane %v4247_v55, %v9636_v13 }
 0x5e7   : > { %v3741_v16 = vpop.f32.mrb[85].mxu0 }
 0x5e8   : > { %v3743_v8 = vpop.f32.mrb[86].mxu0  ;;  %v3782_v9 = vpop.f32.mrb[84].mxu1  ;;  %v3793_v17 = vrot.slane %v3741_v16, 1 }
 0x5e9   : > { %v3802_v10 = vrot.slane %v3782_v9, 2  ;;  %v3745_v14 = vpop.f32.mrb[87].mxu0  ;;  %v9093_v15 = vpop.f32.mrb[85].mxu1 }
 0x5ea   : > { %v3794_v18 = vrot.slane %v3745_v14, 1  ;;  %v3785_v19 = vpop.f32.mrb[86].mxu1 }
 0x5eb   : > { %v3803_v20 = vrot.slane %v3785_v19, 2  ;;  %v9094_v21 = vpop.f32.mrb[87].mxu1 }
 0x5ec   : > { %v3795_v11 = vsel %vm327_vm4, %v3793_v17, %v3794_v18  ;;  %v3799_v22 = vadd.f32 %v3794_v18, %v3743_v8  ;;  %v8552_v8 = vld [vmem:[%s10675_s1 + $0x6] sm:$0x3f]  ;;  %v4269_v17 = vcombine.high %v4261_v4, %v4261_v4  ;;  %v8559_v21 = vld [vmem:[%s10675_s1 + $0xc] sm:$0x3f] }
 0x5ed   : > { %v3798_v23 = vadd.f32 %v3795_v11, %v3739_v6  ;;  %v3804_v49 = vsel %vm337_vm3, %v3802_v10, %v3803_v20  ;;  %v4254_v10 = vcombine.high %v4247_v55, %v4247_v55  ;;  %v4402_v18 = vrot.slane %v8552_v8, %v9636_v13 }
 0x5ee   : > { %v3880_v56 = vpop.f32.mrb[88].mxu0  ;;  %v3808_v24 = vadd.f32 %v3803_v20, %v3799_v22  ;;  %v4395_v22 = vcombine.high %v8552_v8, %v8552_v8 }
 0x5ef   : > { %v3807_v26 = vadd.f32 %v3804_v49, %v3798_v23  ;;  %v3882_v27 = vpop.f32.mrb[89].mxu0  ;;  %v4268_v11 = vrot.slane %v4254_v10, %v9636_v13  ;;  %v4274_v49 = vsel %vm229_vm1, %v4261_v4, 0 }
 0x5f0   : > { %v3884_v28 = vpop.f32.mrb[90].mxu0  ;;  %v3923_v29 = vpop.f32.mrb[88].mxu1  ;;  %v3934_v34 = vrot.slane %v3882_v27, 1  ;;  %v9517_v27 = vld [vmem:[%s9610_s22 + $0x38] sm:$0xff]  }
 0x5f1   : > { %v3930_v30 = vadd.f32 %v3880_v56, %v3807_v26  ;;  %v3931_v59 = vadd.f32 %v3884_v28, %v3808_v24  ;;  %v3943_v31 = vrot.slane %v3923_v29, 2  ;;  %v3886_v32 = vpop.f32.mrb[91].mxu0  ;;  %v9099_v33 = vpop.f32.mrb[89].mxu1  ;;  %v4410_v56 = vcombine.high %v4402_v18, %v4402_v18 }
 0x5f2   : > { %v3935_v35 = vrot.slane %v3886_v32, 1  ;;  %v3926_v36 = vpop.f32.mrb[90].mxu1  ;;  %v4544_v24 = vrot.slane %v8559_v21, %v9636_v13  ;;  %v4280_v26 = vsel %vm229_vm1, %v4268_v11, 0  ;;  %v4409_v28 = vrot.slane %v4395_v22, %v9636_v13  ;;  %v9519_v32 = vld [vmem:[%s9610_s22 + $0x40] sm:$0xff]  }
 0x5f3   : > { %v3944_v37 = vrot.slane %v3926_v36, 2  ;;  %v9100_v38 = vpop.f32.mrb[91].mxu1  ;;  %v4415_v29 = vsel %vm229_vm1, %v4402_v18, 0  ;;  %v9521_v36 = vld [vmem:[%s9610_s22 + $0x48] sm:$0xff]  }
 0x5f4   : > { %v3936_v39 = vsel %vm327_vm4, %v3934_v34, %v3935_v35  ;;  %v3940_v40 = vadd.f32 %v3935_v35, %v3931_v59  ;;  %v4421_v59 = vsel %vm229_vm1, %v4409_v28, 0  ;;  %v4557_v34 = vsel %vm229_vm1, %v4544_v24, 0 }
 0x5f5   : > { %v3939_v46 = vadd.f32 %v3936_v39, %v3930_v30  ;;  %v3945_v41 = vsel %vm337_vm3, %v3943_v31, %v3944_v37  ;;  %v4552_v30 = vcombine.high %v4544_v24, %v4544_v24  ;;  %v4537_v31 = vcombine.high %v8559_v21, %v8559_v21 }
 0x5f6   : > { %v4022_v42 = vpop.f32.mrb[92].mxu0  ;;  %v3949_v50 = vadd.f32 %v3944_v37, %v3940_v40 }
 0x5f7   : > { %v3948_v43 = vadd.f32 %v3945_v41, %v3939_v46  ;;  %v4024_v44 = vpop.f32.mrb[93].mxu0  ;;  %v4551_v33 = vrot.slane %v4537_v31, %v9636_v13 }
 0x5f8   : > { %v4026_v45 = vpop.f32.mrb[94].mxu0  ;;  %v4065_v47 = vpop.f32.mrb[92].mxu1  ;;  %v4076_v58 = vrot.slane %v4024_v44, 1 }
 0x5f9   : > { %v4072_v48 = vadd.f32 %v4022_v42, %v3948_v43  ;;  %v4073_v51 = vadd.f32 %v4026_v45, %v3949_v50  ;;  %v4085_v52 = vrot.slane %v4065_v47, 2  ;;  %v4028_v53 = vpop.f32.mrb[95].mxu0  ;;  %v9105_v54 = vpop.f32.mrb[93].mxu1  ;;  %v4563_v35 = vsel %vm229_vm1, %v4551_v33, 0 }
 0x5fa   : > { %v4077_v60 = vrot.slane %v4028_v53, 1  ;;  %v4068_v61 = vpop.f32.mrb[94].mxu1 }
 0x5fb   : > { %v4086_v62 = vrot.slane %v4068_v61, 2  ;;  %v9106_v63 = vpop.f32.mrb[95].mxu1 }
 0x5fc   : > { %v4078_v1 = vsel %vm327_vm4, %v4076_v58, %v4077_v60  ;;  %v4082_v2 = vadd.f32 %v4077_v60, %v4073_v51 }
 0x5fd   : > { %v4081_v6 = vadd.f32 %v4078_v1, %v4072_v48  ;;  %v4087_v16 = vsel %vm337_vm3, %v4085_v52, %v4086_v62 }
 0x5fe   : > { %v4091_v9 = vadd.f32 %v4086_v62, %v4082_v2 }
 0x5ff   : > { %v4090_v14 = vadd.f32 %v4087_v16, %v4081_v6 }
 0x600   : > { %8539 = vst [vmem:[%s9615_s25 + $0x68] sm:$0x3f] %v4091_v9  ;;  %v4170_v15 = vmul.f32 %v4091_v9, %v4091_v9 }
 0x601   : > { %8538 = vst [vmem:[%s9615_s25 + $0x60] sm:$0xff] %v4090_v14  ;;  %v9394_v19 = vpack.c.bf16 %v4091_v9, %v4090_v14  ;;  %v4169_v20 = vmul.f32 %v4090_v14, %v4090_v14 }
 0x603   : > { %v9398_v23 = vpack.c.bf16 %v4170_v15, %v4169_v20  ;;  %9396 = vmatpush3.bf16.msk.msra.mxu0 %vm9734_vm6, %v9394_v19 }
 0x604   : > { %8547 = vmatprep.subr.msk.bf16.mxu0 %vm229_vm1, %v4269_v17 }
 0x605   : > { %9400 = vmatpush3.bf16.msk.msra.mxu1 %vm9734_vm6, %v9398_v23 }
 0x606   : > { %9112 = vmatmul.mubr.msk.f32.vlgmr.msra.gmra.mrb[96].mxu0 %vm1062_vm7, %v9573_v25  ;;  %9121 = vmatprep.subr.bf16.mxu1 %v9568_v5 }
 0x607   : > { %4283 = vmatpush1.bf16.msra.mxu0 %v4274_v49  ;;  %4314 = vmatprep.mubr.bf16.mxu0 %v9569_v7 }
 0x608   : > { %9119 = vmatmul.mubr.msk.f32.vlgmr.msra.gmra.mrb[96].mxu1 %vm1062_vm7, %v9573_v25  ;;  %8554 = vmatprep.subr.msk.bf16.mxu0 %vm229_vm1, %v4410_v56 }
 0x609   : > { %9122 = vmatpush3.bf16.msra.mxu1 %v4280_v26  ;;  %9123 = vmatprep.mubr.msk.bf16.mxu1 %vm9570_vm0, %v9568_v5 }
 0x60a   : > { %8548 = vmatmul.mubr.msk.bf16.vlgmr.msra.gmra.mrb[100].mxu0 %vm225_vm2, %v9517_v27  ;;  %9127 = vmatprep.subr.bf16.mxu1 %v9568_v5 }
 0x60b   : > { %4424 = vmatpush1.bf16.msra.mxu0 %v4415_v29  ;;  %4455 = vmatprep.mubr.bf16.mxu0 %v9569_v7 }
 0x60c   : > { %9124 = vmatmul.mubr.msk.bf16.vlgmr.msra.gmra.mrb[100].mxu1 %vm225_vm2, %v9517_v27  ;;  %8561 = vmatprep.subr.msk.bf16.mxu0 %vm229_vm1, %v4552_v30 }
 0x60d   : > { %9128 = vmatpush3.bf16.msra.mxu1 %v4421_v59  ;;  %9129 = vmatprep.mubr.msk.bf16.mxu1 %vm9570_vm0, %v9568_v5 }
 0x60e   : > { %9133 = vmatprep.subr.bf16.mxu1 %v9568_v5 }
 0x612   : > { %8555 = vmatmul.mubr.msk.bf16.vlgmr.msra.gmra.mrb[104].mxu0 %vm225_vm2, %v9519_v32 }
 0x613   : > { %4566 = vmatpush1.bf16.msra.mxu0 %v4557_v34  ;;  %4597 = vmatprep.mubr.bf16.mxu0 %v9569_v7 }
 0x614   : > { %9130 = vmatmul.mubr.msk.bf16.vlgmr.msra.gmra.mrb[104].mxu1 %vm225_vm2, %v9519_v32  ;;  %9401 = vmatprep.subr.bf16.mxu0 %v9571_v57  ;;  %v4824_v32 = vld [vmem:[%s10675_s1] sm:$0x3f] }
 0x615   : > { %9134 = vmatpush3.bf16.msra.mxu1 %v4563_v35  ;;  %9135 = vmatprep.mubr.msk.bf16.mxu1 %vm9570_vm0, %v9568_v5 }
 0x616   : > { %9405 = vmatprep.subr.bf16.mxu1 %v9571_v57 }
 0x61a   : > { %8562 = vmatmul.mubr.msk.bf16.vlgmr.msra.gmra.mrb[108].mxu0 %vm225_vm2, %v9521_v36 }
 0x61b   : > { %9143 = vmatprep.mubr.msk.f32.mxu0 %vm9570_vm0, %v9568_v5 }
 0x61c   : > { %9136 = vmatmul.mubr.msk.bf16.vlgmr.msra.gmra.mrb[108].mxu1 %vm225_vm2, %v9521_v36 }
 0x61d   : > { %9150 = vmatprep.mubr.msk.f32.mxu1 %vm9570_vm0, %v9568_v5 }
 0x6d9   : > { %v4164_v37 = vpop.f32.mrb[96].mxu0 }
 0x6da   : > { %v10198_v38 = vadd.f32 %v4164_v37, %v10125_v0  ;;  %v9113_v39 = vpop.f32.mrb[97].mxu0 }
 0x6db   : > { %v4240_v40 = vpop.f32.mrb[96].mxu1 }
 0x6dc   : > { %v10201_v46 = vadd.f32 %v4240_v40, %v10128_v12  ;;  %v9120_v41 = vpop.f32.mrb[97].mxu1 }
 0x6dd   : > { %v4316_v42 = vpop.f32.mrb[100].mxu0  ;;  %v4838_v41 = vrot.slane %v4824_v32, %v9636_v13 }
 0x6de   : > { %v4318_v50 = vpop.f32.mrb[101].mxu0 }
 0x6df   : > { %v4320_v43 = vpop.f32.mrb[102].mxu0  ;;  %v4359_v44 = vpop.f32.mrb[100].mxu1  ;;  %v4370_v51 = vrot.slane %v4318_v50, 1 }
 0x6e0   : > { %v4379_v45 = vrot.slane %v4359_v44, 2  ;;  %v4322_v47 = vpop.f32.mrb[103].mxu0  ;;  %v9125_v48 = vpop.f32.mrb[101].mxu1 }
 0x6e1   : > { %v4371_v52 = vrot.slane %v4322_v47, 1  ;;  %v4362_v53 = vpop.f32.mrb[102].mxu1 }
 0x6e2   : > { %v4380_v54 = vrot.slane %v4362_v53, 2  ;;  %v9126_v55 = vpop.f32.mrb[103].mxu1 }
 0x6e3   : > { %v4372_v0 = vsel %vm327_vm4, %v4370_v51, %v4371_v52  ;;  %v4376_v58 = vadd.f32 %v4371_v52, %v4320_v43  ;;  %v8578_v43 = vld [vmem:[%s10675_s1 + $0x6] sm:$0x3f]  ;;  %v4846_v51 = vcombine.high %v4838_v41, %v4838_v41  ;;  %v8585_v55 = vld [vmem:[%s10675_s1 + $0xc] sm:$0x3f] }
 0x6e4   : > { %v4375_v60 = vadd.f32 %v4372_v0, %v4316_v42  ;;  %v4381_v12 = vsel %vm337_vm3, %v4379_v45, %v4380_v54  ;;  %v4831_v45 = vcombine.high %v4824_v32, %v4824_v32  ;;  %v4979_v52 = vrot.slane %v8578_v43, %v9636_v13 }
 0x6e5   : > { %v4457_v61 = vpop.f32.mrb[104].mxu0  ;;  %v4385_v62 = vadd.f32 %v4380_v54, %v4376_v58  ;;  %v4972_v58 = vcombine.high %v8578_v43, %v8578_v43 }
 0x6e6   : > { %v4384_v63 = vadd.f32 %v4381_v12, %v4375_v60  ;;  %v4459_v1 = vpop.f32.mrb[105].mxu0  ;;  %v4845_v0 = vrot.slane %v4831_v45, %v9636_v13  ;;  %v4851_v12 = vsel %vm229_vm1, %v4838_v41, 0 }
 0x6e7   : > { %v4461_v2 = vpop.f32.mrb[106].mxu0  ;;  %v4500_v4 = vpop.f32.mrb[104].mxu1  ;;  %v4511_v14 = vrot.slane %v4459_v1, 1  ;;  %v9523_v1 = vld [vmem:[%s9610_s22 + $0x40] sm:$0xff]  }
 0x6e8   : > { %v4507_v6 = vadd.f32 %v4457_v61, %v4384_v63  ;;  %v4508_v16 = vadd.f32 %v4461_v2, %v4385_v62  ;;  %v4520_v8 = vrot.slane %v4500_v4, 2  ;;  %v4463_v9 = vpop.f32.mrb[107].mxu0  ;;  %v9131_v10 = vpop.f32.mrb[105].mxu1  ;;  %v4987_v61 = vcombine.high %v4979_v52, %v4979_v52 }
 0x6e9   : > { %v4512_v15 = vrot.slane %v4463_v9, 1  ;;  %v4503_v17 = vpop.f32.mrb[106].mxu1  ;;  %v5121_v62 = vrot.slane %v8585_v55, %v9636_v13  ;;  %v4857_v63 = vsel %vm229_vm1, %v4845_v0, 0  ;;  %v4986_v2 = vrot.slane %v4972_v58, %v9636_v13  ;;  %v9525_v9 = vld [vmem:[%s9610_s22 + $0x48] sm:$0xff]  }
 0x6ea   : > { %v4521_v18 = vrot.slane %v4503_v17, 2  ;;  %v9132_v19 = vpop.f32.mrb[107].mxu1  ;;  %v4992_v4 = vsel %vm229_vm1, %v4979_v52, 0  ;;  %v9527_v17 = vld [vmem:[%s9610_s22 + $0x50] sm:$0xff]  }
 0x6eb   : > { %v4513_v20 = vsel %vm327_vm4, %v4511_v14, %v4512_v15  ;;  %v4517_v21 = vadd.f32 %v4512_v15, %v4508_v16  ;;  %v4998_v16 = vsel %vm229_vm1, %v4986_v2, 0  ;;  %v5134_v14 = vsel %vm229_vm1, %v5121_v62, 0 }
 0x6ec   : > { %v4516_v11 = vadd.f32 %v4513_v20, %v4507_v6  ;;  %v4522_v22 = vsel %vm337_vm3, %v4520_v8, %v4521_v18  ;;  %v5129_v6 = vcombine.high %v5121_v62, %v5121_v62  ;;  %v5114_v8 = vcombine.high %v8585_v55, %v8585_v55 }
 0x6ed   : > { %v4599_v23 = vpop.f32.mrb[108].mxu0  ;;  %v4526_v49 = vadd.f32 %v4521_v18, %v4517_v21 }
 0x6ee   : > { %v4525_v56 = vadd.f32 %v4522_v22, %v4516_v11  ;;  %v4601_v24 = vpop.f32.mrb[109].mxu0  ;;  %v5128_v10 = vrot.slane %v5114_v8, %v9636_v13 }
 0x6ef   : > { %v4603_v26 = vpop.f32.mrb[110].mxu0  ;;  %v4642_v27 = vpop.f32.mrb[108].mxu1  ;;  %v4653_v33 = vrot.slane %v4601_v24, 1 }
 0x6f0   : > { %v4649_v28 = vadd.f32 %v4599_v23, %v4525_v56  ;;  %v4650_v29 = vadd.f32 %v4603_v26, %v4526_v49  ;;  %v4662_v30 = vrot.slane %v4642_v27, 2  ;;  %v4605_v59 = vpop.f32.mrb[111].mxu0  ;;  %v9137_v31 = vpop.f32.mrb[109].mxu1  ;;  %v5140_v15 = vsel %vm229_vm1, %v5128_v10, 0 }
 0x6f1   : > { %v4654_v34 = vrot.slane %v4605_v59, 1  ;;  %v4645_v35 = vpop.f32.mrb[110].mxu1 }
 0x6f2   : > { %v4663_v36 = vrot.slane %v4645_v35, 2  ;;  %v9138_v37 = vpop.f32.mrb[111].mxu1 }
 0x6f3   : > { %v4655_v39 = vsel %vm327_vm4, %v4653_v33, %v4654_v34  ;;  %v4659_v40 = vadd.f32 %v4654_v34, %v4650_v29 }
 0x6f4   : > { %v4658_v42 = vadd.f32 %v4655_v39, %v4649_v28  ;;  %v4664_v50 = vsel %vm337_vm3, %v4662_v30, %v4663_v36 }
 0x6f5   : > { %v4668_v44 = vadd.f32 %v4663_v36, %v4659_v40 }
 0x6f6   : > { %v4667_v47 = vadd.f32 %v4664_v50, %v4658_v42 }
 0x6f7   : > { %8565 = vst [vmem:[%s9615_s25 + $0x78] sm:$0x3f] %v4668_v44  ;;  %v4747_v48 = vmul.f32 %v4668_v44, %v4668_v44 }
 0x6f8   : > { %8564 = vst [vmem:[%s9615_s25 + $0x70] sm:$0xff] %v4667_v47  ;;  %v9402_v53 = vpack.c.bf16 %v4668_v44, %v4667_v47  ;;  %v4746_v54 = vmul.f32 %v4667_v47, %v4667_v47 }
 0x6fa   : > { %v9406_v60 = vpack.c.bf16 %v4747_v48, %v4746_v54  ;;  %9404 = vmatpush3.bf16.msk.msra.mxu0 %vm9734_vm6, %v9402_v53 }
 0x6fb   : > { %8573 = vmatprep.subr.msk.bf16.mxu0 %vm229_vm1, %v4846_v51 }
 0x6fc   : > { %9408 = vmatpush3.bf16.msk.msra.mxu1 %vm9734_vm6, %v9406_v60 }
 0x6fd   : > { %9144 = vmatmul.mubr.msk.f32.vlgmr.msra.gmra.mrb[98].mxu0 %vm1062_vm7, %v9573_v25  ;;  %9153 = vmatprep.subr.bf16.mxu1 %v9568_v5 }
 0x6fe   : > { %4860 = vmatpush1.bf16.msra.mxu0 %v4851_v12  ;;  %4891 = vmatprep.mubr.bf16.mxu0 %v9569_v7 }
 0x6ff   : > { %9151 = vmatmul.mubr.msk.f32.vlgmr.msra.gmra.mrb[98].mxu1 %vm1062_vm7, %v9573_v25  ;;  %8580 = vmatprep.subr.msk.bf16.mxu0 %vm229_vm1, %v4987_v61 }
 0x700   : > { %9154 = vmatpush3.bf16.msra.mxu1 %v4857_v63  ;;  %9155 = vmatprep.mubr.msk.bf16.mxu1 %vm9570_vm0, %v9568_v5 }
 0x701   : > { %8574 = vmatmul.mubr.msk.bf16.vlgmr.msra.gmra.mrb[112].mxu0 %vm225_vm2, %v9523_v1  ;;  %9159 = vmatprep.subr.bf16.mxu1 %v9568_v5 }
 0x702   : > { %5001 = vmatpush1.bf16.msra.mxu0 %v4992_v4  ;;  %5032 = vmatprep.mubr.bf16.mxu0 %v9569_v7 }
 0x703   : > { %9156 = vmatmul.mubr.msk.bf16.vlgmr.msra.gmra.mrb[112].mxu1 %vm225_vm2, %v9523_v1  ;;  %8587 = vmatprep.subr.msk.bf16.mxu0 %vm229_vm1, %v5129_v6 }
 0x704   : > { %9160 = vmatpush3.bf16.msra.mxu1 %v4998_v16  ;;  %9161 = vmatprep.mubr.msk.bf16.mxu1 %vm9570_vm0, %v9568_v5 }
 0x705   : > { %9165 = vmatprep.subr.bf16.mxu1 %v9568_v5 }
 0x709   : > { %8581 = vmatmul.mubr.msk.bf16.vlgmr.msra.gmra.mrb[116].mxu0 %vm225_vm2, %v9525_v9 }
 0x70a   : > { %5143 = vmatpush1.bf16.msra.mxu0 %v5134_v14  ;;  %5174 = vmatprep.mubr.bf16.mxu0 %v9569_v7 }
 0x70b   : > { %9162 = vmatmul.mubr.msk.bf16.vlgmr.msra.gmra.mrb[116].mxu1 %vm225_vm2, %v9525_v9  ;;  %9409 = vmatprep.subr.bf16.mxu0 %v9571_v57  ;;  %v5401_v9 = vld [vmem:[%s10675_s1] sm:$0x3f] }
 0x70c   : > { %9166 = vmatpush3.bf16.msra.mxu1 %v5140_v15  ;;  %9167 = vmatprep.mubr.msk.bf16.mxu1 %vm9570_vm0, %v9568_v5 }
 0x70d   : > { %9413 = vmatprep.subr.bf16.mxu1 %v9571_v57 }
 0x711   : > { %8588 = vmatmul.mubr.msk.bf16.vlgmr.msra.gmra.mrb[120].mxu0 %vm225_vm2, %v9527_v17 }
 0x712   : > { %9175 = vmatprep.mubr.msk.f32.mxu0 %vm9570_vm0, %v9568_v5 }
 0x713   : > { %9168 = vmatmul.mubr.msk.bf16.vlgmr.msra.gmra.mrb[120].mxu1 %vm225_vm2, %v9527_v17 }
 0x714   : > { %9182 = vmatprep.mubr.msk.f32.mxu1 %vm9570_vm0, %v9568_v5 }
 0x7d0   : > { %v4741_v18 = vpop.f32.mrb[98].mxu0 }
 0x7d1   : > { %v10271_v19 = vadd.f32 %v4741_v18, %v10198_v38  ;;  %v9145_v20 = vpop.f32.mrb[99].mxu0 }
 0x7d2   : > { %v4817_v21 = vpop.f32.mrb[98].mxu1 }
 0x7d3   : > { %v10274_v11 = vadd.f32 %v4817_v21, %v10201_v46  ;;  %v9152_v22 = vpop.f32.mrb[99].mxu1 }
 0x7d4   : > { %v4893_v23 = vpop.f32.mrb[112].mxu0  ;;  %v5415_v22 = vrot.slane %v5401_v9, %v9636_v13 }
 0x7d5   : > { %v4895_v49 = vpop.f32.mrb[113].mxu0 }
 0x7d6   : > { %v4897_v56 = vpop.f32.mrb[114].mxu0  ;;  %v4936_v24 = vpop.f32.mrb[112].mxu1  ;;  %v4947_v29 = vrot.slane %v4895_v49, 1 }
 0x7d7   : > { %v4956_v26 = vrot.slane %v4936_v24, 2  ;;  %v4899_v27 = vpop.f32.mrb[115].mxu0  ;;  %v9157_v28 = vpop.f32.mrb[113].mxu1 }
 0x7d8   : > { %v4948_v30 = vrot.slane %v4899_v27, 1  ;;  %v4939_v59 = vpop.f32.mrb[114].mxu1 }
 0x7d9   : > { %v4957_v31 = vrot.slane %v4939_v59, 2  ;;  %v9158_v32 = vpop.f32.mrb[115].mxu1 }
 0x7da   : > { %v4949_v38 = vsel %vm327_vm4, %v4947_v29, %v4948_v30  ;;  %v4953_v33 = vadd.f32 %v4948_v30, %v4897_v56  ;;  %v8604_v56 = vld [vmem:[%s10675_s1 + $0x6] sm:$0x3f]  ;;  %v5423_v29 = vcombine.high %v5415_v22, %v5415_v22  ;;  %v8611_v32 = vld [vmem:[%s10675_s1 + $0xc] sm:$0x3f] }
 0x7db   : > { %v4952_v34 = vadd.f32 %v4949_v38, %v4893_v23  ;;  %v4958_v46 = vsel %vm337_vm3, %v4956_v26, %v4957_v31  ;;  %v5408_v26 = vcombine.high %v5401_v9, %v5401_v9  ;;  %v5556_v30 = vrot.slane %v8604_v56, %v9636_v13 }
 0x7dc   : > { %v5034_v35 = vpop.f32.mrb[116].mxu0  ;;  %v4962_v36 = vadd.f32 %v4957_v31, %v4953_v33  ;;  %v5549_v33 = vcombine.high %v8604_v56, %v8604_v56 }
 0x7dd   : > { %v4961_v37 = vadd.f32 %v4958_v46, %v4952_v34  ;;  %v5036_v39 = vpop.f32.mrb[117].mxu0  ;;  %v5422_v38 = vrot.slane %v5408_v26, %v9636_v13  ;;  %v5428_v46 = vsel %vm229_vm1, %v5415_v22, 0 }
 0x7de   : > { %v5038_v40 = vpop.f32.mrb[118].mxu0  ;;  %v5077_v41 = vpop.f32.mrb[116].mxu1  ;;  %v5088_v47 = vrot.slane %v5036_v39, 1  ;;  %v9529_v39 = vld [vmem:[%s9610_s22 + $0x48] sm:$0xff]  }
 0x7df   : > { %v5084_v42 = vadd.f32 %v5034_v35, %v4961_v37  ;;  %v5085_v50 = vadd.f32 %v5038_v40, %v4962_v36  ;;  %v5097_v43 = vrot.slane %v5077_v41, 2  ;;  %v5040_v44 = vpop.f32.mrb[119].mxu0  ;;  %v9163_v45 = vpop.f32.mrb[117].mxu1  ;;  %v5564_v35 = vcombine.high %v5556_v30, %v5556_v30 }
 0x7e0   : > { %v5089_v48 = vrot.slane %v5040_v44, 1  ;;  %v5080_v51 = vpop.f32.mrb[118].mxu1  ;;  %v5698_v36 = vrot.slane %v8611_v32, %v9636_v13  ;;  %v5434_v37 = vsel %vm229_vm1, %v5422_v38, 0  ;;  %v5563_v40 = vrot.slane %v5549_v33, %v9636_v13  ;;  %v9531_v44 = vld [vmem:[%s9610_s22 + $0x50] sm:$0xff]  }
 0x7e1   : > { %v5098_v52 = vrot.slane %v5080_v51, 2  ;;  %v9164_v53 = vpop.f32.mrb[119].mxu1  ;;  %v5569_v41 = vsel %vm229_vm1, %v5556_v30, 0  ;;  %v9533_v51 = vld [vmem:[%s9610_s22 + $0x58] sm:$0xff]  }
 0x7e2   : > { %v5090_v54 = vsel %vm327_vm4, %v5088_v47, %v5089_v48  ;;  %v5094_v55 = vadd.f32 %v5089_v48, %v5085_v50  ;;  %v5575_v50 = vsel %vm229_vm1, %v5563_v40, 0  ;;  %v5711_v47 = vsel %vm229_vm1, %v5698_v36, 0 }
 0x7e3   : > { %v5093_v0 = vadd.f32 %v5090_v54, %v5084_v42  ;;  %v5099_v58 = vsel %vm337_vm3, %v5097_v43, %v5098_v52  ;;  %v5706_v42 = vcombine.high %v5698_v36, %v5698_v36  ;;  %v5691_v43 = vcombine.high %v8611_v32, %v8611_v32 }
 0x7e4   : > { %v5176_v60 = vpop.f32.mrb[120].mxu0  ;;  %v5103_v12 = vadd.f32 %v5098_v52, %v5094_v55 }
 0x7e5   : > { %v5102_v61 = vadd.f32 %v5099_v58, %v5093_v0  ;;  %v5178_v62 = vpop.f32.mrb[121].mxu0  ;;  %v5705_v45 = vrot.slane %v5691_v43, %v9636_v13 }
 0x7e6   : > { %v5180_v63 = vpop.f32.mrb[122].mxu0  ;;  %v5219_v1 = vpop.f32.mrb[120].mxu1  ;;  %v5230_v10 = vrot.slane %v5178_v62, 1 }
 0x7e7   : > { %v5226_v2 = vadd.f32 %v5176_v60, %v5102_v61  ;;  %v5227_v4 = vadd.f32 %v5180_v63, %v5103_v12  ;;  %v5239_v6 = vrot.slane %v5219_v1, 2  ;;  %v5182_v16 = vpop.f32.mrb[123].mxu0  ;;  %v9169_v8 = vpop.f32.mrb[121].mxu1  ;;  %v5717_v48 = vsel %vm229_vm1, %v5705_v45, 0 }
 0x7e8   : > { %v5231_v14 = vrot.slane %v5182_v16, 1  ;;  %v5222_v15 = vpop.f32.mrb[122].mxu1 }
 0x7e9   : > { %v5240_v17 = vrot.slane %v5222_v15, 2  ;;  %v9170_v18 = vpop.f32.mrb[123].mxu1 }
 0x7ea   : > { %v5232_v20 = vsel %vm327_vm4, %v5230_v10, %v5231_v14  ;;  %v5236_v21 = vadd.f32 %v5231_v14, %v5227_v4 }
 0x7eb   : > { %v5235_v23 = vadd.f32 %v5232_v20, %v5226_v2  ;;  %v5241_v49 = vsel %vm337_vm3, %v5239_v6, %v5240_v17 }
 0x7ec   : > { %v5245_v24 = vadd.f32 %v5240_v17, %v5236_v21 }
 0x7ed   : > { %v5244_v27 = vadd.f32 %v5241_v49, %v5235_v23 }
 0x7ee   : > { %8591 = vst [vmem:[%s9615_s25 + $0x88] sm:$0x3f] %v5245_v24  ;;  %v5324_v28 = vmul.f32 %v5245_v24, %v5245_v24 }
 0x7ef   : > { %8590 = vst [vmem:[%s9615_s25 + $0x80] sm:$0xff] %v5244_v27  ;;  %v9410_v59 = vpack.c.bf16 %v5245_v24, %v5244_v27  ;;  %v5323_v31 = vmul.f32 %v5244_v27, %v5244_v27 }
 0x7f1   : > { %v9414_v34 = vpack.c.bf16 %v5324_v28, %v5323_v31  ;;  %9412 = vmatpush3.bf16.msk.msra.mxu0 %vm9734_vm6, %v9410_v59 }
 0x7f2   : > { %8599 = vmatprep.subr.msk.bf16.mxu0 %vm229_vm1, %v5423_v29 }
 0x7f3   : > { %9416 = vmatpush3.bf16.msk.msra.mxu1 %vm9734_vm6, %v9414_v34 }
 0x7f4   : > { %9176 = vmatmul.mubr.msk.f32.vlgmr.msra.gmra.mrb[124].mxu0 %vm1062_vm7, %v9573_v25  ;;  %9185 = vmatprep.subr.bf16.mxu1 %v9568_v5 }
 0x7f5   : > { %5437 = vmatpush1.bf16.msra.mxu0 %v5428_v46  ;;  %5468 = vmatprep.mubr.bf16.mxu0 %v9569_v7 }
 0x7f6   : > { %9183 = vmatmul.mubr.msk.f32.vlgmr.msra.gmra.mrb[124].mxu1 %vm1062_vm7, %v9573_v25  ;;  %8606 = vmatprep.subr.msk.bf16.mxu0 %vm229_vm1, %v5564_v35 }
 0x7f7   : > { %9186 = vmatpush3.bf16.msra.mxu1 %v5434_v37  ;;  %9187 = vmatprep.mubr.msk.bf16.mxu1 %vm9570_vm0, %v9568_v5 }
 0x7f8   : > { %8600 = vmatmul.mubr.msk.bf16.vlgmr.msra.gmra.mrb[128].mxu0 %vm225_vm2, %v9529_v39  ;;  %9191 = vmatprep.subr.bf16.mxu1 %v9568_v5 }
 0x7f9   : > { %5578 = vmatpush1.bf16.msra.mxu0 %v5569_v41  ;;  %5609 = vmatprep.mubr.bf16.mxu0 %v9569_v7 }
 0x7fa   : > { %9188 = vmatmul.mubr.msk.bf16.vlgmr.msra.gmra.mrb[128].mxu1 %vm225_vm2, %v9529_v39  ;;  %8613 = vmatprep.subr.msk.bf16.mxu0 %vm229_vm1, %v5706_v42 }
 0x7fb   : > { %9192 = vmatpush3.bf16.msra.mxu1 %v5575_v50  ;;  %9193 = vmatprep.mubr.msk.bf16.mxu1 %vm9570_vm0, %v9568_v5 }
 0x7fc   : > { %9197 = vmatprep.subr.bf16.mxu1 %v9568_v5 }
 0x800   : > { %8607 = vmatmul.mubr.msk.bf16.vlgmr.msra.gmra.mrb[132].mxu0 %vm225_vm2, %v9531_v44 }
 0x801   : > { %5720 = vmatpush1.bf16.msra.mxu0 %v5711_v47  ;;  %5751 = vmatprep.mubr.bf16.mxu0 %v9569_v7 }
 0x802   : > { %9194 = vmatmul.mubr.msk.bf16.vlgmr.msra.gmra.mrb[132].mxu1 %vm225_vm2, %v9531_v44  ;;  %9417 = vmatprep.subr.bf16.mxu0 %v9571_v57  ;;  %v5978_v44 = vld [vmem:[%s10675_s1] sm:$0x3f] }
 0x803   : > { %9198 = vmatpush3.bf16.msra.mxu1 %v5717_v48  ;;  %9199 = vmatprep.mubr.msk.bf16.mxu1 %vm9570_vm0, %v9568_v5 }
 0x804   : > { %9421 = vmatprep.subr.bf16.mxu1 %v9571_v57 }
 0x808   : > { %8614 = vmatmul.mubr.msk.bf16.vlgmr.msra.gmra.mrb[136].mxu0 %vm225_vm2, %v9533_v51 }
 0x809   : > { %9207 = vmatprep.mubr.msk.f32.mxu0 %vm9570_vm0, %v9568_v5 }
 0x80a   : > { %9200 = vmatmul.mubr.msk.bf16.vlgmr.msra.gmra.mrb[136].mxu1 %vm225_vm2, %v9533_v51 }
 0x80b   : > { %9214 = vmatprep.mubr.msk.f32.mxu1 %vm9570_vm0, %v9568_v5 }
 0x8c7   : > { %v5318_v52 = vpop.f32.mrb[124].mxu0 }
 0x8c8   : > { %v10344_v53 = vadd.f32 %v5318_v52, %v10271_v19  ;;  %v9177_v54 = vpop.f32.mrb[125].mxu0 }
 0x8c9   : > { %v5394_v55 = vpop.f32.mrb[124].mxu1 }
 0x8ca   : > { %v10347_v0 = vadd.f32 %v5394_v55, %v10274_v11  ;;  %v9184_v58 = vpop.f32.mrb[125].mxu1 }
 0x8cb   : > { %v5470_v60 = vpop.f32.mrb[128].mxu0  ;;  %v5992_v58 = vrot.slane %v5978_v44, %v9636_v13 }
 0x8cc   : > { %v5472_v12 = vpop.f32.mrb[129].mxu0 }
 0x8cd   : > { %v5474_v61 = vpop.f32.mrb[130].mxu0  ;;  %v5513_v62 = vpop.f32.mrb[128].mxu1  ;;  %v5524_v4 = vrot.slane %v5472_v12, 1 }
 0x8ce   : > { %v5533_v63 = vrot.slane %v5513_v62, 2  ;;  %v5476_v1 = vpop.f32.mrb[131].mxu0  ;;  %v9189_v2 = vpop.f32.mrb[129].mxu1 }
 0x8cf   : > { %v5525_v6 = vrot.slane %v5476_v1, 1  ;;  %v5516_v16 = vpop.f32.mrb[130].mxu1 }
 0x8d0   : > { %v5534_v8 = vrot.slane %v5516_v16, 2  ;;  %v9190_v9 = vpop.f32.mrb[131].mxu1 }
 0x8d1   : > { %v5526_v19 = vsel %vm327_vm4, %v5524_v4, %v5525_v6  ;;  %v5530_v10 = vadd.f32 %v5525_v6, %v5474_v61  ;;  %v8630_v61 = vld [vmem:[%s10675_s1 + $0x6] sm:$0x3f]  ;;  %v6000_v4 = vcombine.high %v5992_v58, %v5992_v58  ;;  %v8637_v9 = vld [vmem:[%s10675_s1 + $0xc] sm:$0x3f] }
 0x8d2   : > { %v5529_v14 = vadd.f32 %v5526_v19, %v5470_v60  ;;  %v5535_v11 = vsel %vm337_vm3, %v5533_v63, %v5534_v8  ;;  %v5985_v63 = vcombine.high %v5978_v44, %v5978_v44  ;;  %v6133_v6 = vrot.slane %v8630_v61, %v9636_v13 }
 0x8d3   : > { %v5611_v15 = vpop.f32.mrb[132].mxu0  ;;  %v5539_v17 = vadd.f32 %v5534_v8, %v5530_v10  ;;  %v6126_v10 = vcombine.high %v8630_v61, %v8630_v61 }
 0x8d4   : > { %v5538_v18 = vadd.f32 %v5535_v11, %v5529_v14  ;;  %v5613_v20 = vpop.f32.mrb[133].mxu0  ;;  %v5999_v19 = vrot.slane %v5985_v63, %v9636_v13  ;;  %v6005_v11 = vsel %vm229_vm1, %v5992_v58, 0 }
 0x8d5   : > { %v5615_v21 = vpop.f32.mrb[134].mxu0  ;;  %v5654_v22 = vpop.f32.mrb[132].mxu1  ;;  %v5665_v27 = vrot.slane %v5613_v20, 1  ;;  %v9535_v20 = vld [vmem:[%s9610_s22 + $0x50] sm:$0xff]  }
 0x8d6   : > { %v5661_v23 = vadd.f32 %v5611_v15, %v5538_v18  ;;  %v5662_v49 = vadd.f32 %v5615_v21, %v5539_v17  ;;  %v5674_v56 = vrot.slane %v5654_v22, 2  ;;  %v5617_v24 = vpop.f32.mrb[135].mxu0  ;;  %v9195_v26 = vpop.f32.mrb[133].mxu1  ;;  %v6141_v15 = vcombine.high %v6133_v6, %v6133_v6 }
 0x8d7   : > { %v5666_v28 = vrot.slane %v5617_v24, 1  ;;  %v5657_v29 = vpop.f32.mrb[134].mxu1  ;;  %v6275_v17 = vrot.slane %v8637_v9, %v9636_v13  ;;  %v6011_v18 = vsel %vm229_vm1, %v5999_v19, 0  ;;  %v6140_v21 = vrot.slane %v6126_v10, %v9636_v13  ;;  %v9537_v24 = vld [vmem:[%s9610_s22 + $0x58] sm:$0xff]  }
 0x8d8   : > { %v5675_v30 = vrot.slane %v5657_v29, 2  ;;  %v9196_v59 = vpop.f32.mrb[135].mxu1  ;;  %v6146_v22 = vsel %vm229_vm1, %v6133_v6, 0  ;;  %v9539_v29 = vld [vmem:[%s9610_s22 + $0x60] sm:$0xff]  }
 0x8d9   : > { %v5667_v31 = vsel %vm327_vm4, %v5665_v27, %v5666_v28  ;;  %v5671_v32 = vadd.f32 %v5666_v28, %v5662_v49  ;;  %v6152_v49 = vsel %vm229_vm1, %v6140_v21, 0  ;;  %v6288_v27 = vsel %vm229_vm1, %v6275_v17, 0 }
 0x8da   : > { %v5670_v38 = vadd.f32 %v5667_v31, %v5661_v23  ;;  %v5676_v33 = vsel %vm337_vm3, %v5674_v56, %v5675_v30  ;;  %v6283_v23 = vcombine.high %v6275_v17, %v6275_v17  ;;  %v6268_v56 = vcombine.high %v8637_v9, %v8637_v9 }
 0x8db   : > { %v5753_v34 = vpop.f32.mrb[136].mxu0  ;;  %v5680_v46 = vadd.f32 %v5675_v30, %v5671_v32 }
 0x8dc   : > { %v5679_v35 = vadd.f32 %v5676_v33, %v5670_v38  ;;  %v5755_v36 = vpop.f32.mrb[137].mxu0  ;;  %v6282_v26 = vrot.slane %v6268_v56, %v9636_v13 }
 0x8dd   : > { %v5757_v37 = vpop.f32.mrb[138].mxu0  ;;  %v5796_v39 = vpop.f32.mrb[136].mxu1  ;;  %v5807_v45 = vrot.slane %v5755_v36, 1 }
 0x8de   : > { %v5803_v40 = vadd.f32 %v5753_v34, %v5679_v35  ;;  %v5804_v41 = vadd.f32 %v5757_v37, %v5680_v46  ;;  %v5816_v42 = vrot.slane %v5796_v39, 2  ;;  %v5759_v50 = vpop.f32.mrb[139].mxu0  ;;  %v9201_v43 = vpop.f32.mrb[137].mxu1  ;;  %v6294_v28 = vsel %vm229_vm1, %v6282_v26, 0 }
 0x8df   : > { %v5808_v47 = vrot.slane %v5759_v50, 1  ;;  %v5799_v48 = vpop.f32.mrb[138].mxu1 }
 0x8e0   : > { %v5817_v51 = vrot.slane %v5799_v48, 2  ;;  %v9202_v52 = vpop.f32.mrb[139].mxu1 }
 0x8e1   : > { %v5809_v54 = vsel %vm327_vm4, %v5807_v45, %v5808_v47  ;;  %v5813_v55 = vadd.f32 %v5808_v47, %v5804_v41 }
 0x8e2   : > { %v5812_v60 = vadd.f32 %v5809_v54, %v5803_v40  ;;  %v5818_v12 = vsel %vm337_vm3, %v5816_v42, %v5817_v51 }
 0x8e3   : > { %v5822_v62 = vadd.f32 %v5817_v51, %v5813_v55 }
 0x8e4   : > { %v5821_v1 = vadd.f32 %v5818_v12, %v5812_v60 }
 0x8e5   : > { %8617 = vst [vmem:[%s9615_s25 + $0x98] sm:$0x3f] %v5822_v62  ;;  %v5901_v2 = vmul.f32 %v5822_v62, %v5822_v62 }
 0x8e6   : > { %8616 = vst [vmem:[%s9615_s25 + $0x90] sm:$0xff] %v5821_v1  ;;  %v9418_v16 = vpack.c.bf16 %v5822_v62, %v5821_v1  ;;  %v5900_v8 = vmul.f32 %v5821_v1, %v5821_v1 }
 0x8e8   : > { %v9422_v14 = vpack.c.bf16 %v5901_v2, %v5900_v8  ;;  %9420 = vmatpush3.bf16.msk.msra.mxu0 %vm9734_vm6, %v9418_v16 }
 0x8e9   : > { %8625 = vmatprep.subr.msk.bf16.mxu0 %vm229_vm1, %v6000_v4 }
 0x8ea   : > { %9424 = vmatpush3.bf16.msk.msra.mxu1 %vm9734_vm6, %v9422_v14 }
 0x8eb   : > { %9208 = vmatmul.mubr.msk.f32.vlgmr.msra.gmra.mrb[126].mxu0 %vm1062_vm7, %v9573_v25  ;;  %9217 = vmatprep.subr.bf16.mxu1 %v9568_v5 }
 0x8ec   : > { %6014 = vmatpush1.bf16.msra.mxu0 %v6005_v11  ;;  %6045 = vmatprep.mubr.bf16.mxu0 %v9569_v7 }
 0x8ed   : > { %9215 = vmatmul.mubr.msk.f32.vlgmr.msra.gmra.mrb[126].mxu1 %vm1062_vm7, %v9573_v25  ;;  %8632 = vmatprep.subr.msk.bf16.mxu0 %vm229_vm1, %v6141_v15 }
 0x8ee   : > { %9218 = vmatpush3.bf16.msra.mxu1 %v6011_v18  ;;  %9219 = vmatprep.mubr.msk.bf16.mxu1 %vm9570_vm0, %v9568_v5 }
 0x8ef   : > { %8626 = vmatmul.mubr.msk.bf16.vlgmr.msra.gmra.mrb[140].mxu0 %vm225_vm2, %v9535_v20  ;;  %9223 = vmatprep.subr.bf16.mxu1 %v9568_v5 }
 0x8f0   : > { %6155 = vmatpush1.bf16.msra.mxu0 %v6146_v22  ;;  %6186 = vmatprep.mubr.bf16.mxu0 %v9569_v7 }
 0x8f1   : > { %9220 = vmatmul.mubr.msk.bf16.vlgmr.msra.gmra.mrb[140].mxu1 %vm225_vm2, %v9535_v20  ;;  %8639 = vmatprep.subr.msk.bf16.mxu0 %vm229_vm1, %v6283_v23 }
 0x8f2   : > { %9224 = vmatpush3.bf16.msra.mxu1 %v6152_v49  ;;  %9225 = vmatprep.mubr.msk.bf16.mxu1 %vm9570_vm0, %v9568_v5 }
 0x8f3   : > { %9229 = vmatprep.subr.bf16.mxu1 %v9568_v5 }
 0x8f7   : > { %8633 = vmatmul.mubr.msk.bf16.vlgmr.msra.gmra.mrb[144].mxu0 %vm225_vm2, %v9537_v24 }
 0x8f8   : > { %6297 = vmatpush1.bf16.msra.mxu0 %v6288_v27  ;;  %6328 = vmatprep.mubr.bf16.mxu0 %v9569_v7 }
 0x8f9   : > { %9226 = vmatmul.mubr.msk.bf16.vlgmr.msra.gmra.mrb[144].mxu1 %vm225_vm2, %v9537_v24  ;;  %9425 = vmatprep.subr.bf16.mxu0 %v9571_v57  ;;  %v6555_v24 = vld [vmem:[%s10675_s1] sm:$0x3f] }
 0x8fa   : > { %9230 = vmatpush3.bf16.msra.mxu1 %v6294_v28  ;;  %9231 = vmatprep.mubr.msk.bf16.mxu1 %vm9570_vm0, %v9568_v5 }
 0x8fb   : > { %9429 = vmatprep.subr.bf16.mxu1 %v9571_v57 }
 0x8ff   : > { %8640 = vmatmul.mubr.msk.bf16.vlgmr.msra.gmra.mrb[148].mxu0 %vm225_vm2, %v9539_v29 }
 0x900   : > { %9239 = vmatprep.mubr.msk.f32.mxu0 %vm9570_vm0, %v9568_v5 }
 0x901   : > { %9232 = vmatmul.mubr.msk.bf16.vlgmr.msra.gmra.mrb[148].mxu1 %vm225_vm2, %v9539_v29 }
 0x902   : > { %9246 = vmatprep.mubr.msk.f32.mxu1 %vm9570_vm0, %v9568_v5 }
 0x9be   : > { %v5895_v30 = vpop.f32.mrb[126].mxu0 }
 0x9bf   : > { %v10417_v59 = vadd.f32 %v5895_v30, %v10344_v53  ;;  %v9209_v31 = vpop.f32.mrb[127].mxu0 }
 0x9c0   : > { %v5971_v32 = vpop.f32.mrb[126].mxu1 }
 0x9c1   : > { %v10420_v38 = vadd.f32 %v5971_v32, %v10347_v0  ;;  %v9216_v33 = vpop.f32.mrb[127].mxu1 }
 0x9c2   : > { %v6047_v34 = vpop.f32.mrb[140].mxu0  ;;  %v6569_v33 = vrot.slane %v6555_v24, %v9636_v13 }
 0x9c3   : > { %v6049_v46 = vpop.f32.mrb[141].mxu0 }
 0x9c4   : > { %v6051_v35 = vpop.f32.mrb[142].mxu0  ;;  %v6090_v36 = vpop.f32.mrb[140].mxu1  ;;  %v6101_v41 = vrot.slane %v6049_v46, 1 }
 0x9c5   : > { %v6110_v37 = vrot.slane %v6090_v36, 2  ;;  %v6053_v39 = vpop.f32.mrb[143].mxu0  ;;  %v9221_v40 = vpop.f32.mrb[141].mxu1 }
 0x9c6   : > { %v6102_v42 = vrot.slane %v6053_v39, 1  ;;  %v6093_v50 = vpop.f32.mrb[142].mxu1 }
 0x9c7   : > { %v6111_v43 = vrot.slane %v6093_v50, 2  ;;  %v9222_v44 = vpop.f32.mrb[143].mxu1 }
 0x9c8   : > { %v6103_v53 = vsel %vm327_vm4, %v6101_v41, %v6102_v42  ;;  %v6107_v45 = vadd.f32 %v6102_v42, %v6051_v35  ;;  %v8656_v35 = vld [vmem:[%s10675_s1 + $0x6] sm:$0x3f]  ;;  %v6577_v41 = vcombine.high %v6569_v33, %v6569_v33  ;;  %v8663_v44 = vld [vmem:[%s10675_s1 + $0xc] sm:$0x3f] }
 0x9c9   : > { %v6106_v47 = vadd.f32 %v6103_v53, %v6047_v34  ;;  %v6112_v0 = vsel %vm337_vm3, %v6110_v37, %v6111_v43  ;;  %v6562_v37 = vcombine.high %v6555_v24, %v6555_v24  ;;  %v6710_v42 = vrot.slane %v8656_v35, %v9636_v13 }
 0x9ca   : > { %v6188_v48 = vpop.f32.mrb[144].mxu0  ;;  %v6116_v51 = vadd.f32 %v6111_v43, %v6107_v45  ;;  %v6703_v45 = vcombine.high %v8656_v35, %v8656_v35 }
 0x9cb   : > { %v6115_v52 = vadd.f32 %v6112_v0, %v6106_v47  ;;  %v6190_v54 = vpop.f32.mrb[145].mxu0  ;;  %v6576_v53 = vrot.slane %v6562_v37, %v9636_v13  ;;  %v6582_v0 = vsel %vm229_vm1, %v6569_v33, 0 }
 0x9cc   : > { %v6192_v55 = vpop.f32.mrb[146].mxu0  ;;  %v6231_v58 = vpop.f32.mrb[144].mxu1  ;;  %v6242_v1 = vrot.slane %v6190_v54, 1  ;;  %v9541_v54 = vld [vmem:[%s9610_s22 + $0x58] sm:$0xff]  }
 0x9cd   : > { %v6238_v60 = vadd.f32 %v6188_v48, %v6115_v52  ;;  %v6239_v12 = vadd.f32 %v6192_v55, %v6116_v51  ;;  %v6251_v61 = vrot.slane %v6231_v58, 2  ;;  %v6194_v62 = vpop.f32.mrb[147].mxu0  ;;  %v9227_v63 = vpop.f32.mrb[145].mxu1  ;;  %v6718_v48 = vcombine.high %v6710_v42, %v6710_v42 }
 0x9ce   : > { %v6243_v2 = vrot.slane %v6194_v62, 1  ;;  %v6234_v4 = vpop.f32.mrb[146].mxu1  ;;  %v6852_v51 = vrot.slane %v8663_v44, %v9636_v13  ;;  %v6588_v52 = vsel %vm229_vm1, %v6576_v53, 0  ;;  %v6717_v55 = vrot.slane %v6703_v45, %v9636_v13  ;;  %v9543_v62 = vld [vmem:[%s9610_s22 + $0x60] sm:$0xff]  }
 0x9cf   : > { %v6252_v6 = vrot.slane %v6234_v4, 2  ;;  %v9228_v16 = vpop.f32.mrb[147].mxu1  ;;  %v6723_v58 = vsel %vm229_vm1, %v6710_v42, 0  ;;  %v9545_v4 = vld [vmem:[%s9610_s22 + $0x68] sm:$0xff]  }
 0x9d0   : > { %v6244_v8 = vsel %vm327_vm4, %v6242_v1, %v6243_v2  ;;  %v6248_v9 = vadd.f32 %v6243_v2, %v6239_v12  ;;  %v6729_v12 = vsel %vm229_vm1, %v6717_v55, 0  ;;  %v6865_v1 = vsel %vm229_vm1, %v6852_v51, 0 }
 0x9d1   : > { %v6247_v19 = vadd.f32 %v6244_v8, %v6238_v60  ;;  %v6253_v10 = vsel %vm337_vm3, %v6251_v61, %v6252_v6  ;;  %v6860_v60 = vcombine.high %v6852_v51, %v6852_v51  ;;  %v6845_v61 = vcombine.high %v8663_v44, %v8663_v44 }
 0x9d2   : > { %v6330_v14 = vpop.f32.mrb[148].mxu0  ;;  %v6257_v11 = vadd.f32 %v6252_v6, %v6248_v9 }
 0x9d3   : > { %v6256_v15 = vadd.f32 %v6253_v10, %v6247_v19  ;;  %v6332_v17 = vpop.f32.mrb[149].mxu0  ;;  %v6859_v63 = vrot.slane %v6845_v61, %v9636_v13 }
 0x9d4   : > { %v6334_v18 = vpop.f32.mrb[150].mxu0  ;;  %v6373_v20 = vpop.f32.mrb[148].mxu1  ;;  %v6384_v26 = vrot.slane %v6332_v17, 1 }
 0x9d5   : > { %v6380_v21 = vadd.f32 %v6330_v14, %v6256_v15  ;;  %v6381_v22 = vadd.f32 %v6334_v18, %v6257_v11  ;;  %v6393_v23 = vrot.slane %v6373_v20, 2  ;;  %v6336_v49 = vpop.f32.mrb[151].mxu0  ;;  %v9233_v56 = vpop.f32.mrb[149].mxu1  ;;  %v6871_v2 = vsel %vm229_vm1, %v6859_v63, 0 }
 0x9d6   : > { %v6385_v27 = vrot.slane %v6336_v49, 1  ;;  %v6376_v28 = vpop.f32.mrb[150].mxu1 }
 0x9d7   : > { %v6394_v29 = vrot.slane %v6376_v28, 2  ;;  %v9234_v30 = vpop.f32.mrb[151].mxu1 }
 0x9d8   : > { %v6386_v31 = vsel %vm327_vm4, %v6384_v26, %v6385_v27  ;;  %v6390_v32 = vadd.f32 %v6385_v27, %v6381_v22 }
 0x9d9   : > { %v6389_v34 = vadd.f32 %v6386_v31, %v6380_v21  ;;  %v6395_v46 = vsel %vm337_vm3, %v6393_v23, %v6394_v29 }
 0x9da   : > { %v6399_v36 = vadd.f32 %v6394_v29, %v6390_v32 }
 0x9db   : > { %v6398_v39 = vadd.f32 %v6395_v46, %v6389_v34 }
 0x9dc   : > { %8643 = vst [vmem:[%s9615_s25 + $0xa8] sm:$0x3f] %v6399_v36  ;;  %v6478_v40 = vmul.f32 %v6399_v36, %v6399_v36 }
 0x9dd   : > { %8642 = vst [vmem:[%s9615_s25 + $0xa0] sm:$0xff] %v6398_v39  ;;  %v9426_v50 = vpack.c.bf16 %v6399_v36, %v6398_v39  ;;  %v6477_v43 = vmul.f32 %v6398_v39, %v6398_v39 }
 0x9df   : > { %v9430_v47 = vpack.c.bf16 %v6478_v40, %v6477_v43  ;;  %9428 = vmatpush3.bf16.msk.msra.mxu0 %vm9734_vm6, %v9426_v50 }
 0x9e0   : > { %8651 = vmatprep.subr.msk.bf16.mxu0 %vm229_vm1, %v6577_v41 }
 0x9e1   : > { %9432 = vmatpush3.bf16.msk.msra.mxu1 %vm9734_vm6, %v9430_v47 }
 0x9e2   : > { %9240 = vmatmul.mubr.msk.f32.vlgmr.msra.gmra.mrb[152].mxu0 %vm1062_vm7, %v9573_v25  ;;  %9249 = vmatprep.subr.bf16.mxu1 %v9568_v5 }
 0x9e3   : > { %6591 = vmatpush1.bf16.msra.mxu0 %v6582_v0  ;;  %6622 = vmatprep.mubr.bf16.mxu0 %v9569_v7 }
 0x9e4   : > { %9247 = vmatmul.mubr.msk.f32.vlgmr.msra.gmra.mrb[152].mxu1 %vm1062_vm7, %v9573_v25  ;;  %8658 = vmatprep.subr.msk.bf16.mxu0 %vm229_vm1, %v6718_v48 }
 0x9e5   : > { %9250 = vmatpush3.bf16.msra.mxu1 %v6588_v52  ;;  %9251 = vmatprep.mubr.msk.bf16.mxu1 %vm9570_vm0, %v9568_v5 }
 0x9e6   : > { %8652 = vmatmul.mubr.msk.bf16.vlgmr.msra.gmra.mrb[156].mxu0 %vm225_vm2, %v9541_v54  ;;  %9255 = vmatprep.subr.bf16.mxu1 %v9568_v5 }
 0x9e7   : > { %6732 = vmatpush1.bf16.msra.mxu0 %v6723_v58  ;;  %6763 = vmatprep.mubr.bf16.mxu0 %v9569_v7 }
 0x9e8   : > { %9252 = vmatmul.mubr.msk.bf16.vlgmr.msra.gmra.mrb[156].mxu1 %vm225_vm2, %v9541_v54  ;;  %8665 = vmatprep.subr.msk.bf16.mxu0 %vm229_vm1, %v6860_v60 }
 0x9e9   : > { %9256 = vmatpush3.bf16.msra.mxu1 %v6729_v12  ;;  %9257 = vmatprep.mubr.msk.bf16.mxu1 %vm9570_vm0, %v9568_v5 }
 0x9ea   : > { %9261 = vmatprep.subr.bf16.mxu1 %v9568_v5 }
 0x9ee   : > { %8659 = vmatmul.mubr.msk.bf16.vlgmr.msra.gmra.mrb[160].mxu0 %vm225_vm2, %v9543_v62 }
 0x9ef   : > { %6874 = vmatpush1.bf16.msra.mxu0 %v6865_v1  ;;  %6905 = vmatprep.mubr.bf16.mxu0 %v9569_v7 }
 0x9f0   : > { %9258 = vmatmul.mubr.msk.bf16.vlgmr.msra.gmra.mrb[160].mxu1 %vm225_vm2, %v9543_v62  ;;  %9433 = vmatprep.subr.bf16.mxu0 %v9571_v57  ;;  %v7132_v62 = vld [vmem:[%s10675_s1] sm:$0x3f] }
 0x9f1   : > { %9262 = vmatpush3.bf16.msra.mxu1 %v6871_v2  ;;  %9263 = vmatprep.mubr.msk.bf16.mxu1 %vm9570_vm0, %v9568_v5 }
 0x9f2   : > { %9437 = vmatprep.subr.bf16.mxu1 %v9571_v57 }
 0x9f6   : > { %8666 = vmatmul.mubr.msk.bf16.vlgmr.msra.gmra.mrb[164].mxu0 %vm225_vm2, %v9545_v4 }
 0x9f7   : > { %9271 = vmatprep.mubr.msk.f32.mxu0 %vm9570_vm0, %v9568_v5 }
 0x9f8   : > { %9264 = vmatmul.mubr.msk.bf16.vlgmr.msra.gmra.mrb[164].mxu1 %vm225_vm2, %v9545_v4 }
 0x9f9   : > { %9278 = vmatprep.mubr.msk.f32.mxu1 %vm9570_vm0, %v9568_v5 }
 0xab5   : > { %v6472_v6 = vpop.f32.mrb[152].mxu0 }
 0xab6   : > { %v10490_v16 = vadd.f32 %v6472_v6, %v10417_v59  ;;  %v9241_v8 = vpop.f32.mrb[153].mxu0 }
 0xab7   : > { %v6548_v9 = vpop.f32.mrb[152].mxu1 }
 0xab8   : > { %v10493_v19 = vadd.f32 %v6548_v9, %v10420_v38  ;;  %v9248_v10 = vpop.f32.mrb[153].mxu1 }
 0xab9   : > { %v6624_v14 = vpop.f32.mrb[156].mxu0  ;;  %v7146_v10 = vrot.slane %v7132_v62, %v9636_v13 }
 0xaba   : > { %v6626_v11 = vpop.f32.mrb[157].mxu0 }
 0xabb   : > { %v6628_v15 = vpop.f32.mrb[158].mxu0  ;;  %v6667_v17 = vpop.f32.mrb[156].mxu1  ;;  %v6678_v22 = vrot.slane %v6626_v11, 1 }
 0xabc   : > { %v6687_v18 = vrot.slane %v6667_v17, 2  ;;  %v6630_v20 = vpop.f32.mrb[159].mxu0  ;;  %v9253_v21 = vpop.f32.mrb[157].mxu1 }
 0xabd   : > { %v6679_v23 = vrot.slane %v6630_v20, 1  ;;  %v6670_v49 = vpop.f32.mrb[158].mxu1 }
 0xabe   : > { %v6688_v56 = vrot.slane %v6670_v49, 2  ;;  %v9254_v24 = vpop.f32.mrb[159].mxu1 }
 0xabf   : > { %v6680_v59 = vsel %vm327_vm4, %v6678_v22, %v6679_v23  ;;  %v6684_v26 = vadd.f32 %v6679_v23, %v6628_v15  ;;  %v8682_v15 = vld [vmem:[%s10675_s1 + $0x6] sm:$0x3f]  ;;  %v7154_v22 = vcombine.high %v7146_v10, %v7146_v10  ;;  %v8689_v24 = vld [vmem:[%s10675_s1 + $0xc] sm:$0x3f] }
 0xac0   : > { %v6683_v27 = vadd.f32 %v6680_v59, %v6624_v14  ;;  %v6689_v38 = vsel %vm337_vm3, %v6687_v18, %v6688_v56  ;;  %v7139_v18 = vcombine.high %v7132_v62, %v7132_v62  ;;  %v7287_v23 = vrot.slane %v8682_v15, %v9636_v13 }
 0xac1   : > { %v6765_v28 = vpop.f32.mrb[160].mxu0  ;;  %v6693_v29 = vadd.f32 %v6688_v56, %v6684_v26  ;;  %v7280_v26 = vcombine.high %v8682_v15, %v8682_v15 }
 0xac2   : > { %v6692_v30 = vadd.f32 %v6689_v38, %v6683_v27  ;;  %v6767_v31 = vpop.f32.mrb[161].mxu0  ;;  %v7153_v59 = vrot.slane %v7139_v18, %v9636_v13  ;;  %v7159_v38 = vsel %vm229_vm1, %v7146_v10, 0 }
 0xac3   : > { %v6769_v32 = vpop.f32.mrb[162].mxu0  ;;  %v6808_v33 = vpop.f32.mrb[160].mxu1  ;;  %v6819_v39 = vrot.slane %v6767_v31, 1  ;;  %v9547_v31 = vld [vmem:[%s9610_s22 + $0x60] sm:$0xff]  }
 0xac4   : > { %v6815_v34 = vadd.f32 %v6765_v28, %v6692_v30  ;;  %v6816_v46 = vadd.f32 %v6769_v32, %v6693_v29  ;;  %v6828_v35 = vrot.slane %v6808_v33, 2  ;;  %v6771_v36 = vpop.f32.mrb[163].mxu0  ;;  %v9259_v37 = vpop.f32.mrb[161].mxu1  ;;  %v7295_v28 = vcombine.high %v7287_v23, %v7287_v23 }
 0xac5   : > { %v6820_v40 = vrot.slane %v6771_v36, 1  ;;  %v6811_v41 = vpop.f32.mrb[162].mxu1  ;;  %v7429_v29 = vrot.slane %v8689_v24, %v9636_v13  ;;  %v7165_v30 = vsel %vm229_vm1, %v7153_v59, 0  ;;  %v7294_v32 = vrot.slane %v7280_v26, %v9636_v13  ;;  %v9549_v36 = vld [vmem:[%s9610_s22 + $0x68] sm:$0xff]  }
 0xac6   : > { %v6829_v42 = vrot.slane %v6811_v41, 2  ;;  %v9260_v50 = vpop.f32.mrb[163].mxu1  ;;  %v7300_v33 = vsel %vm229_vm1, %v7287_v23, 0  ;;  %v9551_v41 = vld [vmem:[%s9610_s22 + $0x70] sm:$0xff]  }
 0xac7   : > { %v6821_v43 = vsel %vm327_vm4, %v6819_v39, %v6820_v40  ;;  %v6825_v44 = vadd.f32 %v6820_v40, %v6816_v46  ;;  %v7306_v46 = vsel %vm229_vm1, %v7294_v32, 0  ;;  %v7442_v39 = vsel %vm229_vm1, %v7429_v29, 0 }
 0xac8   : > { %v6824_v53 = vadd.f32 %v6821_v43, %v6815_v34  ;;  %v6830_v45 = vsel %vm337_vm3, %v6828_v35, %v6829_v42  ;;  %v7437_v34 = vcombine.high %v7429_v29, %v7429_v29  ;;  %v7422_v35 = vcombine.high %v8689_v24, %v8689_v24 }
 0xac9   : > { %v6907_v47 = vpop.f32.mrb[164].mxu0  ;;  %v6834_v0 = vadd.f32 %v6829_v42, %v6825_v44 }
 0xaca   : > { %v6833_v48 = vadd.f32 %v6830_v45, %v6824_v53  ;;  %v6909_v51 = vpop.f32.mrb[165].mxu0  ;;  %v7436_v37 = vrot.slane %v7422_v35, %v9636_v13 }
 0xacb   : > { %v6911_v52 = vpop.f32.mrb[166].mxu0  ;;  %v6950_v54 = vpop.f32.mrb[164].mxu1  ;;  %v6961_v63 = vrot.slane %v6909_v51, 1 }
 0xacc   : > { %v6957_v55 = vadd.f32 %v6907_v47, %v6833_v48  ;;  %v6958_v58 = vadd.f32 %v6911_v52, %v6834_v0  ;;  %v6970_v60 = vrot.slane %v6950_v54, 2  ;;  %v6913_v12 = vpop.f32.mrb[167].mxu0  ;;  %v9265_v61 = vpop.f32.mrb[165].mxu1  ;;  %v7448_v40 = vsel %vm229_vm1, %v7436_v37, 0 }
 0xacd   : > { %v6962_v1 = vrot.slane %v6913_v12, 1  ;;  %v6953_v2 = vpop.f32.mrb[166].mxu1 }
 0xace   : > { %v6971_v4 = vrot.slane %v6953_v2, 2  ;;  %v9266_v6 = vpop.f32.mrb[167].mxu1 }
 0xacf   : > { %v6963_v8 = vsel %vm327_vm4, %v6961_v63, %v6962_v1  ;;  %v6967_v9 = vadd.f32 %v6962_v1, %v6958_v58 }
 0xad0   : > { %v6966_v14 = vadd.f32 %v6963_v8, %v6957_v55  ;;  %v6972_v11 = vsel %vm337_vm3, %v6970_v60, %v6971_v4 }
 0xad1   : > { %v6976_v17 = vadd.f32 %v6971_v4, %v6967_v9 }
 0xad2   : > { %v6975_v20 = vadd.f32 %v6972_v11, %v6966_v14 }
 0xad3   : > { %8669 = vst [vmem:[%s9615_s25 + $0xb8] sm:$0x3f] %v6976_v17  ;;  %v7055_v21 = vmul.f32 %v6976_v17, %v6976_v17 }
 0xad4   : > { %8668 = vst [vmem:[%s9615_s25 + $0xb0] sm:$0xff] %v6975_v20  ;;  %v9434_v49 = vpack.c.bf16 %v6976_v17, %v6975_v20  ;;  %v7054_v56 = vmul.f32 %v6975_v20, %v6975_v20 }
 0xad6   : > { %v9438_v27 = vpack.c.bf16 %v7055_v21, %v7054_v56  ;;  %9436 = vmatpush3.bf16.msk.msra.mxu0 %vm9734_vm6, %v9434_v49 }
 0xad7   : > { %8677 = vmatprep.subr.msk.bf16.mxu0 %vm229_vm1, %v7154_v22 }
 0xad8   : > { %9440 = vmatpush3.bf16.msk.msra.mxu1 %vm9734_vm6, %v9438_v27 }
 0xad9   : > { %9272 = vmatmul.mubr.msk.f32.vlgmr.msra.gmra.mrb[154].mxu0 %vm1062_vm7, %v9573_v25  ;;  %9281 = vmatprep.subr.bf16.mxu1 %v9568_v5 }
 0xada   : > { %7168 = vmatpush1.bf16.msra.mxu0 %v7159_v38  ;;  %7199 = vmatprep.mubr.bf16.mxu0 %v9569_v7 }
 0xadb   : > { %9279 = vmatmul.mubr.msk.f32.vlgmr.msra.gmra.mrb[154].mxu1 %vm1062_vm7, %v9573_v25  ;;  %8684 = vmatprep.subr.msk.bf16.mxu0 %vm229_vm1, %v7295_v28 }
 0xadc   : > { %9282 = vmatpush3.bf16.msra.mxu1 %v7165_v30  ;;  %9283 = vmatprep.mubr.msk.bf16.mxu1 %vm9570_vm0, %v9568_v5 }
 0xadd   : > { %8678 = vmatmul.mubr.msk.bf16.vlgmr.msra.gmra.mrb[168].mxu0 %vm225_vm2, %v9547_v31  ;;  %9287 = vmatprep.subr.bf16.mxu1 %v9568_v5 }
 0xade   : > { %7309 = vmatpush1.bf16.msra.mxu0 %v7300_v33  ;;  %7340 = vmatprep.mubr.bf16.mxu0 %v9569_v7 }
 0xadf   : > { %9284 = vmatmul.mubr.msk.bf16.vlgmr.msra.gmra.mrb[168].mxu1 %vm225_vm2, %v9547_v31  ;;  %8691 = vmatprep.subr.msk.bf16.mxu0 %vm229_vm1, %v7437_v34 }
 0xae0   : > { %9288 = vmatpush3.bf16.msra.mxu1 %v7306_v46  ;;  %9289 = vmatprep.mubr.msk.bf16.mxu1 %vm9570_vm0, %v9568_v5 }
 0xae1   : > { %9293 = vmatprep.subr.bf16.mxu1 %v9568_v5 }
 0xae5   : > { %8685 = vmatmul.mubr.msk.bf16.vlgmr.msra.gmra.mrb[172].mxu0 %vm225_vm2, %v9549_v36 }
 0xae6   : > { %7451 = vmatpush1.bf16.msra.mxu0 %v7442_v39  ;;  %7482 = vmatprep.mubr.bf16.mxu0 %v9569_v7 }
 0xae7   : > { %9290 = vmatmul.mubr.msk.bf16.vlgmr.msra.gmra.mrb[172].mxu1 %vm225_vm2, %v9549_v36  ;;  %9441 = vmatprep.subr.bf16.mxu0 %v9571_v57  ;;  %v7709_v36 = vld [vmem:[%s10675_s1] sm:$0x3f] }
 0xae8   : > { %9294 = vmatpush3.bf16.msra.mxu1 %v7448_v40  ;;  %9295 = vmatprep.mubr.msk.bf16.mxu1 %vm9570_vm0, %v9568_v5 }
 0xae9   : > { %9445 = vmatprep.subr.bf16.mxu1 %v9571_v57 }
 0xaed   : > { %8692 = vmatmul.mubr.msk.bf16.vlgmr.msra.gmra.mrb[176].mxu0 %vm225_vm2, %v9551_v41 }
 0xaee   : > { %9303 = vmatprep.mubr.msk.f32.mxu0 %vm9570_vm0, %v9568_v5 }
 0xaef   : > { %9296 = vmatmul.mubr.msk.bf16.vlgmr.msra.gmra.mrb[176].mxu1 %vm225_vm2, %v9551_v41 }
 0xaf0   : > { %9310 = vmatprep.mubr.msk.f32.mxu1 %vm9570_vm0, %v9568_v5 }
 0xbac   : > { %v7049_v42 = vpop.f32.mrb[154].mxu0 }
 0xbad   : > { %v10563_v50 = vadd.f32 %v7049_v42, %v10490_v16  ;;  %v9273_v43 = vpop.f32.mrb[155].mxu0 }
 0xbae   : > { %v7125_v44 = vpop.f32.mrb[154].mxu1 }
 0xbaf   : > { %v10566_v53 = vadd.f32 %v7125_v44, %v10493_v19  ;;  %v9280_v45 = vpop.f32.mrb[155].mxu1 }
 0xbb0   : > { %v7201_v47 = vpop.f32.mrb[168].mxu0  ;;  %v7723_v45 = vrot.slane %v7709_v36, %v9636_v13 }
 0xbb1   : > { %v7203_v0 = vpop.f32.mrb[169].mxu0 }
 0xbb2   : > { %v7205_v48 = vpop.f32.mrb[170].mxu0  ;;  %v7244_v51 = vpop.f32.mrb[168].mxu1  ;;  %v7255_v58 = vrot.slane %v7203_v0, 1 }
 0xbb3   : > { %v7264_v52 = vrot.slane %v7244_v51, 2  ;;  %v7207_v54 = vpop.f32.mrb[171].mxu0  ;;  %v9285_v55 = vpop.f32.mrb[169].mxu1 }
 0xbb4   : > { %v7256_v60 = vrot.slane %v7207_v54, 1  ;;  %v7247_v12 = vpop.f32.mrb[170].mxu1 }
 0xbb5   : > { %v7265_v61 = vrot.slane %v7247_v12, 2  ;;  %v9286_v62 = vpop.f32.mrb[171].mxu1 }
 0xbb6   : > { %v7257_v16 = vsel %vm327_vm4, %v7255_v58, %v7256_v60  ;;  %v7261_v63 = vadd.f32 %v7256_v60, %v7205_v48  ;;  %v8708_v48 = vld [vmem:[%s10675_s1 + $0x6] sm:$0x3f]  ;;  %v7731_v58 = vcombine.high %v7723_v45, %v7723_v45  ;;  %v8715_v62 = vld [vmem:[%s10675_s1 + $0xc] sm:$0x3f] }
 0xbb7   : > { %v7260_v1 = vadd.f32 %v7257_v16, %v7201_v47  ;;  %v7266_v19 = vsel %vm337_vm3, %v7264_v52, %v7265_v61  ;;  %v7716_v52 = vcombine.high %v7709_v36, %v7709_v36  ;;  %v7864_v60 = vrot.slane %v8708_v48, %v9636_v13 }
 0xbb8   : > { %v7342_v2 = vpop.f32.mrb[172].mxu0  ;;  %v7270_v4 = vadd.f32 %v7265_v61, %v7261_v63  ;;  %v7857_v63 = vcombine.high %v8708_v48, %v8708_v48 }
 0xbb9   : > { %v7269_v6 = vadd.f32 %v7266_v19, %v7260_v1  ;;  %v7344_v8 = vpop.f32.mrb[173].mxu0  ;;  %v7730_v16 = vrot.slane %v7716_v52, %v9636_v13  ;;  %v7736_v19 = vsel %vm229_vm1, %v7723_v45, 0 }
 0xbba   : > { %v7346_v9 = vpop.f32.mrb[174].mxu0  ;;  %v7385_v10 = vpop.f32.mrb[172].mxu1  ;;  %v7396_v20 = vrot.slane %v7344_v8, 1  ;;  %v9553_v8 = vld [vmem:[%s9610_s22 + $0x68] sm:$0xff]  }
 0xbbb   : > { %v7392_v14 = vadd.f32 %v7342_v2, %v7269_v6  ;;  %v7393_v11 = vadd.f32 %v7346_v9, %v7270_v4  ;;  %v7405_v15 = vrot.slane %v7385_v10, 2  ;;  %v7348_v17 = vpop.f32.mrb[175].mxu0  ;;  %v9291_v18 = vpop.f32.mrb[173].mxu1  ;;  %v7872_v2 = vcombine.high %v7864_v60, %v7864_v60 }
 0xbbc   : > { %v7397_v21 = vrot.slane %v7348_v17, 1  ;;  %v7388_v22 = vpop.f32.mrb[174].mxu1  ;;  %v8006_v4 = vrot.slane %v8715_v62, %v9636_v13  ;;  %v7742_v6 = vsel %vm229_vm1, %v7730_v16, 0  ;;  %v7871_v9 = vrot.slane %v7857_v63, %v9636_v13  ;;  %v9555_v17 = vld [vmem:[%s9610_s22 + $0x70] sm:$0xff]  }
 0xbbd   : > { %v7406_v23 = vrot.slane %v7388_v22, 2  ;;  %v9292_v49 = vpop.f32.mrb[175].mxu1  ;;  %v7877_v10 = vsel %vm229_vm1, %v7864_v60, 0  ;;  %v9557_v22 = vld [vmem:[%s9610_s22 + $0x78] sm:$0xff]  }
 0xbbe   : > { %v7398_v56 = vsel %vm327_vm4, %v7396_v20, %v7397_v21  ;;  %v7402_v24 = vadd.f32 %v7397_v21, %v7393_v11  ;;  %v7883_v11 = vsel %vm229_vm1, %v7871_v9, 0  ;;  %v8019_v20 = vsel %vm229_vm1, %v8006_v4, 0 }
 0xbbf   : > { %v7401_v59 = vadd.f32 %v7398_v56, %v7392_v14  ;;  %v7407_v26 = vsel %vm337_vm3, %v7405_v15, %v7406_v23  ;;  %v8014_v14 = vcombine.high %v8006_v4, %v8006_v4  ;;  %v7999_v15 = vcombine.high %v8715_v62, %v8715_v62 }
 0xbc0   : > { %v7484_v27 = vpop.f32.mrb[176].mxu0  ;;  %v7411_v38 = vadd.f32 %v7406_v23, %v7402_v24 }
 0xbc1   : > { %v7410_v28 = vadd.f32 %v7407_v26, %v7401_v59  ;;  %v7486_v29 = vpop.f32.mrb[177].mxu0  ;;  %v8013_v18 = vrot.slane %v7999_v15, %v9636_v13 }
 0xbc2   : > { %v7488_v30 = vpop.f32.mrb[178].mxu0  ;;  %v7527_v31 = vpop.f32.mrb[176].mxu1  ;;  %v7538_v37 = vrot.slane %v7486_v29, 1 }
 0xbc3   : > { %v7534_v32 = vadd.f32 %v7484_v27, %v7410_v28  ;;  %v7535_v33 = vadd.f32 %v7488_v30, %v7411_v38  ;;  %v7547_v34 = vrot.slane %v7527_v31, 2  ;;  %v7490_v46 = vpop.f32.mrb[179].mxu0  ;;  %v9297_v35 = vpop.f32.mrb[177].mxu1  ;;  %v8025_v21 = vsel %vm229_vm1, %v8013_v18, 0 }
 0xbc4   : > { %v7539_v39 = vrot.slane %v7490_v46, 1  ;;  %v7530_v40 = vpop.f32.mrb[178].mxu1 }
 0xbc5   : > { %v7548_v41 = vrot.slane %v7530_v40, 2  ;;  %v9298_v42 = vpop.f32.mrb[179].mxu1 }
 0xbc6   : > { %v7540_v43 = vsel %vm327_vm4, %v7538_v37, %v7539_v39  ;;  %v7544_v44 = vadd.f32 %v7539_v39, %v7535_v33 }
 0xbc7   : > { %v7543_v47 = vadd.f32 %v7540_v43, %v7534_v32  ;;  %v7549_v0 = vsel %vm337_vm3, %v7547_v34, %v7548_v41 }
 0xbc8   : > { %v7553_v51 = vadd.f32 %v7548_v41, %v7544_v44 }
 0xbc9   : > { %v7552_v54 = vadd.f32 %v7549_v0, %v7543_v47 }
 0xbca   : > { %8695 = vst [vmem:[%s9615_s25 + $0xc8] sm:$0x3f] %v7553_v51  ;;  %v7632_v55 = vmul.f32 %v7553_v51, %v7553_v51 }
 0xbcb   : > { %8694 = vst [vmem:[%s9615_s25 + $0xc0] sm:$0xff] %v7552_v54  ;;  %v9442_v12 = vpack.c.bf16 %v7553_v51, %v7552_v54  ;;  %v7631_v61 = vmul.f32 %v7552_v54, %v7552_v54 }
 0xbcd   : > { %v9446_v1 = vpack.c.bf16 %v7632_v55, %v7631_v61  ;;  %9444 = vmatpush3.bf16.msk.msra.mxu0 %vm9734_vm6, %v9442_v12 }
 0xbce   : > { %8703 = vmatprep.subr.msk.bf16.mxu0 %vm229_vm1, %v7731_v58 }
 0xbcf   : > { %9448 = vmatpush3.bf16.msk.msra.mxu1 %vm9734_vm6, %v9446_v1 }
 0xbd0   : > { %9304 = vmatmul.mubr.msk.f32.vlgmr.msra.gmra.mrb[180].mxu0 %vm1062_vm7, %v9573_v25  ;;  %9313 = vmatprep.subr.bf16.mxu1 %v9568_v5 }
 0xbd1   : > { %7745 = vmatpush1.bf16.msra.mxu0 %v7736_v19  ;;  %7776 = vmatprep.mubr.bf16.mxu0 %v9569_v7 }
 0xbd2   : > { %9311 = vmatmul.mubr.msk.f32.vlgmr.msra.gmra.mrb[180].mxu1 %vm1062_vm7, %v9573_v25  ;;  %8710 = vmatprep.subr.msk.bf16.mxu0 %vm229_vm1, %v7872_v2 }
 0xbd3   : > { %9314 = vmatpush3.bf16.msra.mxu1 %v7742_v6  ;;  %9315 = vmatprep.mubr.msk.bf16.mxu1 %vm9570_vm0, %v9568_v5 }
 0xbd4   : > { %8704 = vmatmul.mubr.msk.bf16.vlgmr.msra.gmra.mrb[184].mxu0 %vm225_vm2, %v9553_v8  ;;  %9319 = vmatprep.subr.bf16.mxu1 %v9568_v5 }
 0xbd5   : > { %7886 = vmatpush1.bf16.msra.mxu0 %v7877_v10  ;;  %7917 = vmatprep.mubr.bf16.mxu0 %v9569_v7 }
 0xbd6   : > { %9316 = vmatmul.mubr.msk.bf16.vlgmr.msra.gmra.mrb[184].mxu1 %vm225_vm2, %v9553_v8  ;;  %8717 = vmatprep.subr.msk.bf16.mxu0 %vm229_vm1, %v8014_v14 }
 0xbd7   : > { %9320 = vmatpush3.bf16.msra.mxu1 %v7883_v11  ;;  %9321 = vmatprep.mubr.msk.bf16.mxu1 %vm9570_vm0, %v9568_v5 }
 0xbd8   : > { %9325 = vmatprep.subr.bf16.mxu1 %v9568_v5 }
 0xbdc   : > { %8711 = vmatmul.mubr.msk.bf16.vlgmr.msra.gmra.mrb[188].mxu0 %vm225_vm2, %v9555_v17 }
 0xbdd   : > { %8028 = vmatpush1.bf16.msra.mxu0 %v8019_v20  ;;  %8059 = vmatprep.mubr.bf16.mxu0 %v9569_v7 }
 0xbde   : > { %9322 = vmatmul.mubr.msk.bf16.vlgmr.msra.gmra.mrb[188].mxu1 %vm225_vm2, %v9555_v17  ;;  %9449 = vmatprep.subr.bf16.mxu0 %v9571_v57 }
 0xbdf   : > { %9326 = vmatpush3.bf16.msra.mxu1 %v8025_v21  ;;  %9327 = vmatprep.mubr.msk.bf16.mxu1 %vm9570_vm0, %v9568_v5 }
 0xbe0   : > { %9453 = vmatprep.subr.bf16.mxu1 %v9571_v57 }
 0xbe4   : > { %8718 = vmatmul.mubr.msk.bf16.vlgmr.msra.gmra.mrb[192].mxu0 %vm225_vm2, %v9557_v22 }
 0xbe5   : > { %9335 = vmatprep.mubr.msk.f32.mxu0 %vm9570_vm0, %v9568_v5 }
 0xbe6   : > { %9328 = vmatmul.mubr.msk.bf16.vlgmr.msra.gmra.mrb[192].mxu1 %vm225_vm2, %v9557_v22 }
 0xbe7   : > { %9342 = vmatprep.mubr.msk.f32.mxu1 %vm9570_vm0, %v9568_v5 }
 0xca3   : > { %v7626_v7 = vpop.f32.mrb[180].mxu0 }
 0xca4   : > { %v10636_v13 = vadd.f32 %v7626_v7, %v10563_v50  ;;  %v9305_v23 = vpop.f32.mrb[181].mxu0 }
 0xca5   : > { %v7702_v49 = vpop.f32.mrb[180].mxu1 }
 0xca6   : > { %v10639_v56 = vadd.f32 %v7702_v49, %v10566_v53  ;;  %v9312_v57 = vpop.f32.mrb[181].mxu1 }
 0xca7   : > { %v7778_v24 = vpop.f32.mrb[184].mxu0 }
 0xca8   : > { %v7780_v59 = vpop.f32.mrb[185].mxu0 }
 0xca9   : > { %v7782_v26 = vpop.f32.mrb[186].mxu0  ;;  %v7821_v27 = vpop.f32.mrb[184].mxu1  ;;  %v7832_v30 = vrot.slane %v7780_v59, 1 }
 0xcaa   : > { %v7841_v38 = vrot.slane %v7821_v27, 2  ;;  %v7784_v28 = vpop.f32.mrb[187].mxu0  ;;  %v9317_v29 = vpop.f32.mrb[185].mxu1  ;;  %v8284_v27 = vld [vmem:[%s10677_s3] sm:$0x1] }
 0xcab   : > { %v7833_v31 = vrot.slane %v7784_v28, 1  ;;  %v7824_v5 = vpop.f32.mrb[186].mxu1 }
 0xcac   : > { %v7842_v32 = vrot.slane %v7824_v5, 2  ;;  %v9318_v33 = vpop.f32.mrb[187].mxu1 }
 0xcad   : > { %v7834_v50 = vsel %vm327_vm4, %v7832_v30, %v7833_v31  ;;  %v7838_v34 = vadd.f32 %v7833_v31, %v7782_v26 }
 0xcae   : > { %v7837_v46 = vadd.f32 %v7834_v50, %v7778_v24  ;;  %v7843_v53 = vsel %vm337_vm3, %v7841_v38, %v7842_v32 }
 0xcaf   : > { %v7919_v35 = vpop.f32.mrb[188].mxu0  ;;  %v7847_v36 = vadd.f32 %v7842_v32, %v7838_v34 }
 0xcb0   : > { %v7846_v37 = vadd.f32 %v7843_v53, %v7837_v46  ;;  %v7921_v39 = vpop.f32.mrb[189].mxu0 }
 0xcb1   : > { %v7923_v40 = vpop.f32.mrb[190].mxu0  ;;  %v7962_v41 = vpop.f32.mrb[188].mxu1  ;;  %v7973_v0 = vrot.slane %v7921_v39, 1 }
 0xcb2   : > { %v7969_v42 = vadd.f32 %v7919_v35, %v7846_v37  ;;  %v7970_v43 = vadd.f32 %v7923_v40, %v7847_v36  ;;  %v7982_v44 = vrot.slane %v7962_v41, 2  ;;  %v7925_v45 = vpop.f32.mrb[191].mxu0  ;;  %v9323_v47 = vpop.f32.mrb[189].mxu1 }
 0xcb3   : > { %v7974_v48 = vrot.slane %v7925_v45, 1  ;;  %v7965_v51 = vpop.f32.mrb[190].mxu1 }
 0xcb4   : > { %v7983_v52 = vrot.slane %v7965_v51, 2  ;;  %v9324_v54 = vpop.f32.mrb[191].mxu1 }
 0xcb5   : > { %v7975_v55 = vsel %vm327_vm4, %v7973_v0, %v7974_v48  ;;  %v7979_v58 = vadd.f32 %v7974_v48, %v7970_v43 }
 0xcb6   : > { %v7978_v60 = vadd.f32 %v7975_v55, %v7969_v42  ;;  %v7984_v12 = vsel %vm337_vm3, %v7982_v44, %v7983_v52 }
 0xcb7   : > { %v8061_v61 = vpop.f32.mrb[192].mxu0  ;;  %v7988_v62 = vadd.f32 %v7983_v52, %v7979_v58 }
 0xcb8   : > { %v7987_v16 = vadd.f32 %v7984_v12, %v7978_v60  ;;  %v8063_v63 = vpop.f32.mrb[193].mxu0 }
 0xcb9   : > { %v8065_v1 = vpop.f32.mrb[194].mxu0  ;;  %v8104_v19 = vpop.f32.mrb[192].mxu1  ;;  %v8115_v10 = vrot.slane %v8063_v63, 1 }
 0xcba   : > { %v8111_v2 = vadd.f32 %v8061_v61, %v7987_v16  ;;  %v8112_v4 = vadd.f32 %v8065_v1, %v7988_v62  ;;  %v8124_v6 = vrot.slane %v8104_v19, 2  ;;  %v8067_v8 = vpop.f32.mrb[195].mxu0  ;;  %v9329_v9 = vpop.f32.mrb[193].mxu1 }
 0xcbb   : > { %v8116_v14 = vrot.slane %v8067_v8, 1  ;;  %v8107_v11 = vpop.f32.mrb[194].mxu1 }
 0xcbc   : > { %v8125_v15 = vrot.slane %v8107_v11, 2  ;;  %v9330_v17 = vpop.f32.mrb[195].mxu1 }
 0xcbd   : > { %v8117_v18 = vsel %vm327_vm4, %v8115_v10, %v8116_v14  ;;  %v8121_v20 = vadd.f32 %v8116_v14, %v8112_v4 }
 0xcbe   : > { %v8120_v21 = vadd.f32 %v8117_v18, %v8111_v2  ;;  %v8126_v22 = vsel %vm337_vm3, %v8124_v6, %v8125_v15 }
 0xcbf   : > { %v8130_v7 = vadd.f32 %v8125_v15, %v8121_v20 }
 0xcc0   : > { %v8129_v23 = vadd.f32 %v8126_v22, %v8120_v21 }
 0xcc1   : > { %8721 = vst [vmem:[%s9615_s25 + $0xd8] sm:$0x3f] %v8130_v7  ;;  %v8209_v49 = vmul.f32 %v8130_v7, %v8130_v7 }
 0xcc2   : > { %8720 = vst [vmem:[%s9615_s25 + $0xd0] sm:$0xff] %v8129_v23  ;;  %v9450_v57 = vpack.c.bf16 %v8130_v7, %v8129_v23  ;;  %v8208_v24 = vmul.f32 %v8129_v23, %v8129_v23 }
 0xcc4   : > { %v9454_v59 = vpack.c.bf16 %v8209_v49, %v8208_v24  ;;  %9452 = vmatpush3.bf16.msk.msra.mxu0 %vm9734_vm6, %v9450_v57 }
 0xcc6   : > { %9456 = vmatpush3.bf16.msk.msra.mxu1 %vm9734_vm6, %v9454_v59 }
 0xcc7   : > { %9336 = vmatmul.mubr.msk.f32.vlgmr.msra.gmra.mrb[182].mxu0 %vm1062_vm7, %v9573_v25 }
 0xcc9   : > { %9343 = vmatmul.mubr.msk.f32.vlgmr.msra.gmra.mrb[182].mxu1 %vm1062_vm7, %v9573_v25 }
 0xd9a   : > { %v8203_v26 = vpop.f32.mrb[182].mxu0 }
 0xd9b   : > { %v8207_v38 = vadd.f32 %v8203_v26, %v10636_v13  ;;  %v9337_v28 = vpop.f32.mrb[183].mxu0 }
 0xd9c   : > { %v8279_v29 = vpop.f32.mrb[182].mxu1 }
 0xd9d   : > { %v8285_v30 = vadd.f32 %v8284_v27, %v8207_v38  ;;  %v8283_v31 = vadd.f32 %v8279_v29, %v10639_v56  ;;  %v9344_v5 = vpop.f32.mrb[183].mxu1 }
 0xd9f   : > { %8286 = vst [vmem:[%s10677_s3] sm:$0x1] %v8285_v30  ;;  %v8288_v25 = vadd.f32 %v8287_v3, %v8283_v31 }
 0xda1   : > { %8289 = vst [vmem:[%s10678_s4] sm:$0x1] %v8288_v25 }
 0xda2 PF: > { %s15_s15 = sadd.s32 1, %s9564_s15  }
 0xda3   : > { %p12_p5 = scmp.ge.s32.totalorder %s15_s15, 4  }
 0xda5   :  { %14 = sbr.rel (!%p12_p5) target bundleno = 1 (0x1), region = 108 }

</bundles_post_ra>
